<compile_context>
chip_gen: v6e
topology: v6e:2x2x1
jax: 0.10.0
libtpu: 0.0.40
codegen_flags: <defaults>
</compile_context>

<pallas_src>
import jax
import jax.numpy as jnp
from jax.experimental import pallas as pl
from jax.experimental.pallas import tpu as pltpu

# ----------------------------- small config -----------------------------------
# vision (SigLIP)
V_IMAGE = 16
V_PATCH = 8
V_CHANS = 3
V_HID = 32
V_INTER = 64
V_LAYERS = 2
V_HEADS = 4
V_HEAD_DIM = V_HID // V_HEADS
V_NUM_PATCHES = (V_IMAGE // V_PATCH) ** 2  # 4
LN_EPS = 1e-6

# text (Gemma)
T_HID = 32
T_INTER = 64
T_LAYERS = 2
T_HEADS = 4
T_HEAD_DIM = T_HID // T_HEADS
T_VOCAB = 64
RMS_EPS = 1e-6
ROPE_THETA = 10000.0

# PaliGemma
PROJECTION_DIM = T_HID
HIDDEN_SIZE = T_HID
IMAGE_TOKEN_INDEX = 63
PAD_TOKEN_ID = 0

BATCH = 2
TEXT_TOKENS = 4
SEQ_LEN = V_NUM_PATCHES + TEXT_TOKENS  # 8

VMEM_SPEC = pl.BlockSpec(memory_space=pltpu.MemorySpace.VMEM)


# ----------------------------- in-kernel helpers --------------------------------
def _bf(x):
    return x.astype(jnp.bfloat16)


def _ln(x, w, b):
    """LayerNorm, f32 elementwise math.  x: [M, D]; w/b: [1, D]."""
    mean = jnp.mean(x, axis=-1, keepdims=True)
    var = jnp.mean(jnp.square(x - mean), axis=-1, keepdims=True)
    return (x - mean) * jax.lax.rsqrt(var + LN_EPS) * w + b


def _rms(x, w):
    """Gemma RMSNorm (scale = 1 + w), f32 elementwise math."""
    return x * jax.lax.rsqrt(jnp.mean(x * x, axis=-1, keepdims=True) + RMS_EPS) * (1.0 + w)


def _mha_headsum(qkv, wo_ref, acc, *, batch, seq, n_heads, head_dim, hidden,
                 cos=None, sin=None):
    """Multi-head attention with the per-head output projection accumulated into `acc`.

    qkv    : [batch*seq, 3*hidden] f32 (q | k | v lane-concatenated).
    wo_ref : [n_heads, head_dim, hidden] bf16 per-head slabs of the output projection.
    acc    : [batch*seq, hidden] f32 starting value (residual (+ out-proj bias)).
    cos/sin: optional [batch*seq, head_dim] RoPE tables; sin already carries the
             rotate_half sign (first half negated), so rotate_half(x)*sin == concat(x2,x1)*sin.
    No attention mask: prefill causal mask is identically zero (enforced by caller's assert).
    Score / PV / out-proj matmuls run bf16 on the MXU with f32 accumulation; softmax is f32.
    """
    scale = head_dim ** -0.5
    half = head_dim // 2
    for h in range(n_heads):
        q0 = h * head_dim
        k0 = hidden + h * head_dim
        v0 = 2 * hidden + h * head_dim
        qh = qkv[:, q0:q0 + head_dim]
        kh = qkv[:, k0:k0 + head_dim]
        vh = qkv[:, v0:v0 + head_dim]
        if cos is not None:
            # RoPE, no MXU: two static half slices + lane concat (sign folded into sin).
            qh = qh * cos + jnp.concatenate([qh[:, half:], qh[:, :half]], axis=-1) * sin
            kh = kh * cos + jnp.concatenate([kh[:, half:], kh[:, :half]], axis=-1) * sin
        q3 = _bf(qh.reshape(batch, seq, head_dim))
        k3 = _bf(kh.reshape(batch, seq, head_dim))
        v3 = _bf(vh.reshape(batch, seq, head_dim))
        s = jnp.einsum('bqd,bkd->bqk', q3, k3,
                       preferred_element_type=jnp.float32) * scale
        s = s - jnp.max(s, axis=-1, keepdims=True)
        p = jnp.exp(s)
        p = p * pl.reciprocal(jnp.sum(p, axis=-1, keepdims=True), approx=True)
        o3 = jnp.einsum('bqk,bkd->bqd', _bf(p), v3,
                        preferred_element_type=jnp.float32)
        oh = o3.reshape(batch * seq, head_dim)
        # fold the output projection per head -> no concatenated attn tensor is materialized
        acc = acc + jnp.dot(_bf(oh), wo_ref[h], preferred_element_type=jnp.float32)
    return acc


# ----------------------------- fused Pallas kernels ------------------------------
def _patch_embed_kernel(p_ref, w_ref, b_ref, pos_ref, o_ref):
    """Patch conv (as matmul) + bias + position embedding, fused."""
    o_ref[...] = (jnp.dot(_bf(p_ref[...]), w_ref[...], preferred_element_type=jnp.float32)
                  + b_ref[...] + pos_ref[...])


def _siglip_tower_kernel(x0_ref, ln1_w, ln1_b, wqkv, bqkv, wo, bo,
                         ln2_w, ln2_b, w1, b1, w2, b2, o_ref):
    """SigLIP encoder, one layer per grid step; residual lives in o_ref across the grid."""
    @pl.when(pl.program_id(0) == 0)
    def _():
        o_ref[...] = x0_ref[...]

    x = o_ref[...]                                                     # [B*Np, H] f32
    h = _ln(x, ln1_w[...], ln1_b[...])
    qkv = jnp.dot(_bf(h), wqkv[...], preferred_element_type=jnp.float32) + bqkv[...]
    x = _mha_headsum(qkv, wo, x + bo[...], batch=BATCH, seq=V_NUM_PATCHES,
                     n_heads=V_HEADS, head_dim=V_HEAD_DIM, hidden=V_HID)
    h = _ln(x, ln2_w[...], ln2_b[...])
    hm = jnp.dot(_bf(h), w1[...], preferred_element_type=jnp.float32) + b1[...]
    hm = jax.nn.gelu(hm, approximate=True)                             # gelu_pytorch_tanh
    x = x + jnp.dot(_bf(hm), w2[...], preferred_element_type=jnp.float32) + b2[...]
    o_ref[...] = x


def _postln_proj_kernel(x_ref, ln_w, ln_b, w_ref, b_ref, o_ref):
    """SigLIP post-LayerNorm fused with the multimodal projector Linear."""
    h = _ln(x_ref[...], ln_w[...], ln_b[...])
    o_ref[...] = jnp.dot(_bf(h), w_ref[...], preferred_element_type=jnp.float32) + b_ref[...]


def _gemma_tower_kernel(x0_ref, cos_ref, sin_ref, in_norm, wqkv, wo,
                        post_norm, wgu, wdown, o_ref):
    """Gemma decoder, one layer per grid step; residual lives in o_ref across the grid."""
    @pl.when(pl.program_id(0) == 0)
    def _():
        o_ref[...] = x0_ref[...]

    x = o_ref[...]                                                     # [B*S, H] f32
    h = _rms(x, in_norm[...])
    qkv = jnp.dot(_bf(h), wqkv[...], preferred_element_type=jnp.float32)
    x = _mha_headsum(qkv, wo, x, batch=BATCH, seq=SEQ_LEN,
                     n_heads=T_HEADS, head_dim=T_HEAD_DIM, hidden=T_HID,
                     cos=cos_ref[...], sin=sin_ref[...])
    h = _rms(x, post_norm[...])
    gu = jnp.dot(_bf(h), wgu[...], preferred_element_type=jnp.float32)
    g = jax.nn.gelu(gu[:, :T_INTER], approximate=True)
    x = x + jnp.dot(_bf(g * gu[:, T_INTER:]), wdown[...], preferred_element_type=jnp.float32)
    o_ref[...] = x


def _final_lmhead_kernel(x_ref, norm_ref, wlm_ref, o_ref):
    """Final RMSNorm fused with tied lm_head matmul."""
    h = _rms(x_ref[...], norm_ref[...])
    o_ref[...] = jnp.dot(_bf(h), wlm_ref[...], preferred_element_type=jnp.float32)


# ----------------------------- pallas_call builders ------------------------------
def _full_vmem_call(kernel, out_shape, n_in):
    return pl.pallas_call(
        kernel,
        out_shape=jax.ShapeDtypeStruct(out_shape, jnp.float32),
        in_specs=[VMEM_SPEC] * n_in,
        out_specs=VMEM_SPEC,
    )


def _siglip_tower_call():
    M = BATCH * V_NUM_PATCHES
    row = lambda d: pl.BlockSpec((None, 1, d), lambda l: (l, 0, 0))
    mat = lambda r, c: pl.BlockSpec((None, r, c), lambda l: (l, 0, 0))
    return pl.pallas_call(
        _siglip_tower_kernel,
        out_shape=jax.ShapeDtypeStruct((M, V_HID), jnp.float32),
        grid=(V_LAYERS,),
        in_specs=[
            pl.BlockSpec((M, V_HID), lambda l: (0, 0)),                       # x0 (layer-0 seed)
            row(V_HID), row(V_HID),                                           # ln1 w/b
            mat(V_HID, 3 * V_HID), row(3 * V_HID),                            # wqkv, bqkv
            pl.BlockSpec((None, V_HEADS, V_HEAD_DIM, V_HID),
                         lambda l: (l, 0, 0, 0)),                             # wo per-head
            row(V_HID),                                                       # bo
            row(V_HID), row(V_HID),                                           # ln2 w/b
            mat(V_HID, V_INTER), row(V_INTER),                                # fc1
            mat(V_INTER, V_HID), row(V_HID),                                  # fc2
        ],
        out_specs=pl.BlockSpec((M, V_HID), lambda l: (0, 0)),                 # residual-resident
        compiler_params=pltpu.CompilerParams(dimension_semantics=("arbitrary",)),
    )


def _gemma_tower_call():
    M = BATCH * SEQ_LEN
    row = lambda d: pl.BlockSpec((None, 1, d), lambda l: (l, 0, 0))
    mat = lambda r, c: pl.BlockSpec((None, r, c), lambda l: (l, 0, 0))
    return pl.pallas_call(
        _gemma_tower_kernel,
        out_shape=jax.ShapeDtypeStruct((M, T_HID), jnp.float32),
        grid=(T_LAYERS,),
        in_specs=[
            pl.BlockSpec((M, T_HID), lambda l: (0, 0)),                       # x0 (layer-0 seed)
            pl.BlockSpec((M, T_HEAD_DIM), lambda l: (0, 0)),                  # cos
            pl.BlockSpec((M, T_HEAD_DIM), lambda l: (0, 0)),                  # sin (signed)
            row(T_HID),                                                       # input RMSNorm
            mat(T_HID, 3 * T_HID),                                            # wqkv
            pl.BlockSpec((None, T_HEADS, T_HEAD_DIM, T_HID),
                         lambda l: (l, 0, 0, 0)),                             # wo per-head
            row(T_HID),                                                       # post-attn RMSNorm
            mat(T_HID, 2 * T_INTER),                                          # gate|up
            mat(T_INTER, T_HID),                                              # down
        ],
        out_specs=pl.BlockSpec((M, T_HID), lambda l: (0, 0)),                 # residual-resident
        compiler_params=pltpu.CompilerParams(dimension_semantics=("arbitrary",)),
    )


# ----------------------------- forward pass --------------------------------------
def paligemma_forward(params, input_ids, pixel_values, attention_mask):
    B, S = input_ids.shape
    vp = params['vision']
    lm = params['lm']

    # ---- SigLIP patch embedding (stride=patch conv as matmul; im2col is XLA glue) ----
    _, C, Hi, Wi = pixel_values.shape
    P = V_PATCH
    nh, nw = Hi // P, Wi // P
    patches = pixel_values.reshape(B, C, nh, P, nw, P).transpose(0, 2, 4, 1, 3, 5)
    patches = patches.reshape(B * nh * nw, C * P * P)                  # feature order (c, kh, kw)
    x = _full_vmem_call(_patch_embed_kernel, (B * V_NUM_PATCHES, V_HID), 4)(
        patches, vp['patch_w'], vp['patch_b'], vp['pos_emb'])

    # ---- SigLIP encoder: single gridded call over layers ----
    x = _siglip_tower_call()(x, vp['ln1_w'], vp['ln1_b'], vp['wqkv'], vp['bqkv'],
                             vp['wo'], vp['bo'], vp['ln2_w'], vp['ln2_b'],
                             vp['w1'], vp['b1'], vp['w2'], vp['b2'])

    # ---- post-LN + multimodal projector ----
    img_feat = _full_vmem_call(_postln_proj_kernel, (B * V_NUM_PATCHES, PROJECTION_DIM), 5)(
        x, vp['post_ln_w'], vp['post_ln_b'], params['proj']['w'], params['proj']['b'])
    img_feat = img_feat.reshape(B, V_NUM_PATCHES, PROJECTION_DIM)

    # ---- merge image features with text embeddings (tiny XLA glue) ----
    # text embeddings pre-scaled by sqrt(H); image /sqrt(H) (merge) and *sqrt(H) (Gemma
    # input normalizer) cancel exactly, so img_feat is used unscaled.
    inputs_embeds = jnp.take(lm['embed_lookup'], input_ids, axis=0)
    text_mask = (input_ids != IMAGE_TOKEN_INDEX) & (input_ids != PAD_TOKEN_ID)
    image_mask = input_ids == IMAGE_TOKEN_INDEX
    pad_mask = input_ids == PAD_TOKEN_ID
    # TODO(synk): true masked_scatter; assumes image tokens are a contiguous prefix
    # (PaliGemma prompt format).
    img_padded = jnp.pad(img_feat, ((0, 0), (0, S - V_NUM_PATCHES), (0, 0)))
    final = jnp.where(text_mask[..., None], inputs_embeds, 0.0)
    final = jnp.where(image_mask[..., None], img_padded, final)
    final = jnp.where(pad_mask[..., None], 0.0, final)

    # Prefill causal mask is identically zero (all-ones attention_mask enforced by caller's
    # assert) -> the additive mask is dropped from the attention kernels entirely.
    position_ids = jnp.cumsum(attention_mask, axis=-1)
    position_ids = jnp.where(attention_mask == 0, 1, position_ids)

    # RoPE tables per (batch, position): [B*S, head_dim]; rotate_half sign folded into sin.
    inv_freq = 1.0 / (ROPE_THETA ** (jnp.arange(0, T_HEAD_DIM, 2, dtype=jnp.float32) / T_HEAD_DIM))
    freqs = position_ids[..., None].astype(jnp.float32) * inv_freq[None, None, :]   # [B, S, hd/2]
    cos = jnp.concatenate([jnp.cos(freqs), jnp.cos(freqs)], axis=-1).reshape(B * S, T_HEAD_DIM)
    sin_signed = jnp.concatenate([-jnp.sin(freqs), jnp.sin(freqs)], axis=-1
                                 ).reshape(B * S, T_HEAD_DIM)

    # ---- Gemma decoder: single gridded call over layers ----
    x = final.reshape(B * S, T_HID)
    x = _gemma_tower_call()(x, cos, sin_signed, lm['in_norm'], lm['wqkv'], lm['wo'],
                            lm['post_norm'], lm['wgu'], lm['wdown'])

    logits = _full_vmem_call(_final_lmhead_kernel, (B * S, T_VOCAB), 3)(
        x, lm['final_norm'], lm['embed_lm_T'])
    return logits.reshape(B, S, T_VOCAB)


# ----------------------------- parameter init / packing ---------------------------
def init_params(key):
    """Raw parameters in PyTorch nn.Module layout."""
    keys = iter(jax.random.split(key, 256))

    def nrm(shape, scale=0.02):
        return scale * jax.random.normal(next(keys), shape, dtype=jnp.float32)

    vision_layers = []
    for _ in range(V_LAYERS):
        vision_layers.append(dict(
            ln1_w=jnp.ones((V_HID,), jnp.float32), ln1_b=jnp.zeros((V_HID,), jnp.float32),
            q_w=nrm((V_HID, V_HID)), q_b=nrm((V_HID,)),
            k_w=nrm((V_HID, V_HID)), k_b=nrm((V_HID,)),
            v_w=nrm((V_HID, V_HID)), v_b=nrm((V_HID,)),
            o_w=nrm((V_HID, V_HID)), o_b=nrm((V_HID,)),
            ln2_w=jnp.ones((V_HID,), jnp.float32), ln2_b=jnp.zeros((V_HID,), jnp.float32),
            fc1_w=nrm((V_INTER, V_HID)), fc1_b=nrm((V_INTER,)),
            fc2_w=nrm((V_HID, V_INTER)), fc2_b=nrm((V_HID,)),
        ))
    vision = dict(
        patch_w=nrm((V_HID, V_CHANS, V_PATCH, V_PATCH)),
        patch_b=nrm((V_HID,)),
        pos_emb=nrm((V_NUM_PATCHES, V_HID)),
        layers=vision_layers,
        post_ln_w=jnp.ones((V_HID,), jnp.float32),
        post_ln_b=jnp.zeros((V_HID,), jnp.float32),
    )

    proj = dict(w=nrm((PROJECTION_DIM, V_HID)), b=nrm((PROJECTION_DIM,)))

    lm_layers = []
    for _ in range(T_LAYERS):
        lm_layers.append(dict(
            input_norm=jnp.zeros((T_HID,), jnp.float32),
            q_w=nrm((T_HEADS * T_HEAD_DIM, T_HID)),
            k_w=nrm((T_HEADS * T_HEAD_DIM, T_HID)),
            v_w=nrm((T_HEADS * T_HEAD_DIM, T_HID)),
            o_w=nrm((T_HID, T_HEADS * T_HEAD_DIM)),
            post_norm=nrm((T_HID,)),
            gate_w=nrm((T_INTER, T_HID)),
            up_w=nrm((T_INTER, T_HID)),
            down_w=nrm((T_HID, T_INTER)),
        ))
    lm = dict(
        embed=nrm((T_VOCAB, T_HID)),
        layers=lm_layers,
        final_norm=jnp.zeros((T_HID,), jnp.float32),
    )
    return dict(vision=vision, proj=proj, lm=lm)


def pack_params(raw):
    """One-time repack into kernel layout: per-layer weights stacked along a leading layer
    axis, QKV / gate-up concatenated, matmul weights pre-transposed and cast to bf16, the
    output projection split per head ([L, heads, head_dim, hidden]), norms/biases as f32
    [L, 1, N] rows, sqrt(H) folded into the embedding lookup."""
    def row(v):
        return v.reshape(1, -1).astype(jnp.float32)

    rv = raw['vision']
    vl = rv['layers']

    def vstack(fn):
        return jnp.stack([fn(l) for l in vl])

    vision = dict(
        patch_w=_bf(rv['patch_w'].reshape(V_HID, -1).T),               # [C*P*P, V_HID]
        patch_b=row(rv['patch_b']),
        pos_emb=jnp.tile(rv['pos_emb'], (BATCH, 1)),                   # [B*Np, V_HID]
        ln1_w=vstack(lambda l: row(l['ln1_w'])),
        ln1_b=vstack(lambda l: row(l['ln1_b'])),
        wqkv=vstack(lambda l: _bf(jnp.concatenate([l['q_w'].T, l['k_w'].T, l['v_w'].T], axis=1))),
        bqkv=vstack(lambda l: jnp.concatenate([l['q_b'], l['k_b'], l['v_b']]).reshape(1, -1)),
        wo=vstack(lambda l: _bf(l['o_w'].T.reshape(V_HEADS, V_HEAD_DIM, V_HID))),
        bo=vstack(lambda l: row(l['o_b'])),
        ln2_w=vstack(lambda l: row(l['ln2_w'])),
        ln2_b=vstack(lambda l: row(l['ln2_b'])),
        w1=vstack(lambda l: _bf(l['fc1_w'].T)),
        b1=vstack(lambda l: row(l['fc1_b'])),
        w2=vstack(lambda l: _bf(l['fc2_w'].T)),
        b2=vstack(lambda l: row(l['fc2_b'])),
        post_ln_w=row(rv['post_ln_w']),
        post_ln_b=row(rv['post_ln_b']),
    )

    proj = dict(w=_bf(raw['proj']['w'].T), b=row(raw['proj']['b']))

    gl = raw['lm']['layers']

    def gstack(fn):
        return jnp.stack([fn(l) for l in gl])

    lm = dict(
        embed_lookup=raw['lm']['embed'] * (T_HID ** 0.5),   # folds Gemma's sqrt(H) input scale
        embed_lm_T=_bf(raw['lm']['embed'].T),               # tied lm_head, pre-transposed
        in_norm=gstack(lambda l: row(l['input_norm'])),
        wqkv=gstack(lambda l: _bf(jnp.concatenate([l['q_w'].T, l['k_w'].T, l['v_w'].T], axis=1))),
        wo=gstack(lambda l: _bf(l['o_w'].T.reshape(T_HEADS, T_HEAD_DIM, T_HID))),
        post_norm=gstack(lambda l: row(l['post_norm'])),
        wgu=gstack(lambda l: _bf(jnp.concatenate([l['gate_w'].T, l['up_w'].T], axis=1))),
        wdown=gstack(lambda l: _bf(l['down_w'].T)),
        final_norm=row(raw['lm']['final_norm']),
    )
    return dict(vision=vision, proj=proj, lm=lm)


# ----------------------------- main -----------------------------------------------
if __name__ == "__main__":
    key = jax.random.PRNGKey(0)
    pkey, xkey, tkey = jax.random.split(key, 3)
    params = pack_params(init_params(pkey))

    pixel_values = jax.random.normal(xkey, (BATCH, V_CHANS, V_IMAGE, V_IMAGE), dtype=jnp.float32)

    # image tokens are a contiguous prefix, followed by text tokens (PaliGemma prompt format)
    text_ids = jax.random.randint(tkey, (BATCH, TEXT_TOKENS), 1, IMAGE_TOKEN_INDEX, dtype=jnp.int32)
    image_ids = jnp.full((BATCH, V_NUM_PATCHES), IMAGE_TOKEN_INDEX, dtype=jnp.int32)
    input_ids = jnp.concatenate([image_ids, text_ids], axis=1)          # [B, S]
    attention_mask = jnp.ones((BATCH, SEQ_LEN), dtype=jnp.int32)

    # assert torch.all(attention_mask == 1)  -- "input cannot be padded"
    assert bool(jnp.all(attention_mask == 1)), "input cannot be padded"

    fwd = jax.jit(paligemma_forward)
    logits = fwd(params, input_ids, pixel_values, attention_mask)
    jax.block_until_ready(logits)

    assert logits.shape == (BATCH, SEQ_LEN, T_VOCAB)
    assert bool(jnp.all(jnp.isfinite(logits)))
    print("KERNEL_OK")
</pallas_src>

<mosaic_0001>
module attributes {stable_mosaic.version = 11 : i64} {
  func.func @_patch_embed_kernel(%arg0: memref<8x192xf32, #tpu.memory_space<vmem>>, %arg1: memref<192x32xbf16, #tpu.memory_space<vmem>>, %arg2: memref<1x32xf32, #tpu.memory_space<vmem>>, %arg3: memref<8x32xf32, #tpu.memory_space<vmem>>, %arg4: memref<8x32xf32, #tpu.memory_space<vmem>>) attributes {dimension_semantics = [], scalar_prefetch = 0 : i64, scratch_operands = 0 : i64, tpu.core_type = #tpu.core_type<tc>} {
    %c0 = arith.constant 0 : index
    %c0_0 = arith.constant 0 : index
    %0 = vector.load %arg0[%c0, %c0_0] : memref<8x192xf32, #tpu.memory_space<vmem>>, vector<8x192xf32>
    %1 = arith.truncf %0 : vector<8x192xf32> to vector<8x192xbf16>
    %c0_1 = arith.constant 0 : index
    %c0_2 = arith.constant 0 : index
    %2 = vector.load %arg1[%c0_1, %c0_2] : memref<192x32xbf16, #tpu.memory_space<vmem>>, vector<192x32xbf16>
    %cst = arith.constant dense<0.000000e+00> : vector<8x32xf32>
    %3 = tpu.matmul %1, %2, %cst {dimension_numbers = #tpu.dot_dimension_numbers<[1], [0], [0], [1], [0, 0, 1, 1], [], []>} : vector<8x192xbf16>, vector<192x32xbf16>, vector<8x32xf32> -> vector<8x32xf32>
    %c0_3 = arith.constant 0 : index
    %c0_4 = arith.constant 0 : index
    %4 = vector.load %arg2[%c0_3, %c0_4] : memref<1x32xf32, #tpu.memory_space<vmem>>, vector<1x32xf32>
    %5 = vector.broadcast %4 : vector<1x32xf32> to vector<8x32xf32>
    %6 = arith.addf %3, %5 : vector<8x32xf32>
    %c0_5 = arith.constant 0 : index
    %c0_6 = arith.constant 0 : index
    %7 = vector.load %arg3[%c0_5, %c0_6] : memref<8x32xf32, #tpu.memory_space<vmem>>, vector<8x32xf32>
    %8 = arith.addf %6, %7 : vector<8x32xf32>
    %c0_7 = arith.constant 0 : index
    %c0_8 = arith.constant 0 : index
    %9 = vector.load %arg4[%c0_7, %c0_8] : memref<8x32xf32, #tpu.memory_space<vmem>>, vector<8x32xf32>
    tpu.vector_store %arg4[%c0_7, %c0_8], %8 {strides = array<i32>} : memref<8x32xf32, #tpu.memory_space<vmem>>, vector<8x32xf32>,
    return
  }
}

module attributes {stable_mosaic.version = 11 : i64} {
  func.func @_siglip_tower_kernel(%arg0: i32, %arg1: memref<8x32xf32, #tpu.memory_space<vmem>>, %arg2: memref<1x1x32xf32, #tpu.memory_space<vmem>>, %arg3: memref<1x1x32xf32, #tpu.memory_space<vmem>>, %arg4: memref<1x32x96xbf16, #tpu.memory_space<vmem>>, %arg5: memref<1x1x96xf32, #tpu.memory_space<vmem>>, %arg6: memref<1x4x8x32xbf16, #tpu.memory_space<vmem>>, %arg7: memref<1x1x32xf32, #tpu.memory_space<vmem>>, %arg8: memref<1x1x32xf32, #tpu.memory_space<vmem>>, %arg9: memref<1x1x32xf32, #tpu.memory_space<vmem>>, %arg10: memref<1x32x64xbf16, #tpu.memory_space<vmem>>, %arg11: memref<1x1x64xf32, #tpu.memory_space<vmem>>, %arg12: memref<1x64x32xbf16, #tpu.memory_space<vmem>>, %arg13: memref<1x1x32xf32, #tpu.memory_space<vmem>>, %arg14: memref<8x32xf32, #tpu.memory_space<vmem>>) attributes {dimension_semantics = [#tpu.dimension_semantics<arbitrary>], iteration_bounds = array<i64: 2>, scalar_prefetch = 0 : i64, scratch_operands = 0 : i64, tpu.core_type = #tpu.core_type<tc>, window_params = [{pipeline_mode = #tpu.pipeline_mode<synchronous>, transform_indices = @transform_0, window_bounds = array<i64: 8, 32>}, {transform_indices = @transform_1, window_bounds = array<i64: 1, 1, 32>}, {transform_indices = @transform_2, window_bounds = array<i64: 1, 1, 32>}, {transform_indices = @transform_3, window_bounds = array<i64: 1, 32, 96>}, {transform_indices = @transform_4, window_bounds = array<i64: 1, 1, 96>}, {transform_indices = @transform_5, window_bounds = array<i64: 1, 4, 8, 32>}, {transform_indices = @transform_6, window_bounds = array<i64: 1, 1, 32>}, {transform_indices = @transform_7, window_bounds = array<i64: 1, 1, 32>}, {transform_indices = @transform_8, window_bounds = array<i64: 1, 1, 32>}, {transform_indices = @transform_9, window_bounds = array<i64: 1, 32, 64>}, {transform_indices = @transform_10, window_bounds = array<i64: 1, 1, 64>}, {transform_indices = @transform_11, window_bounds = array<i64: 1, 64, 32>}, {transform_indices = @transform_12, window_bounds = array<i64: 1, 1, 32>}, {pipeline_mode = #tpu.pipeline_mode<synchronous>, transform_indices = @transform_13, window_bounds = array<i64: 8, 32>}]} {
    %c0_i32 = arith.constant 0 : i32
    %0 = arith.cmpi eq, %arg0, %c0_i32 : i32
    %1 = arith.extui %0 : i1 to i32
    %c0_i32_0 = arith.constant 0 : i32
    %2 = arith.cmpi ne, %1, %c0_i32_0 : i32
    scf.if %2 {
      %c0_90 = arith.constant 0 : index
      %c0_91 = arith.constant 0 : index
      %219 = vector.load %arg1[%c0_90, %c0_91] : memref<8x32xf32, #tpu.memory_space<vmem>>, vector<8x32xf32>
      %c0_92 = arith.constant 0 : index
      %c0_93 = arith.constant 0 : index
      %220 = vector.load %arg14[%c0_92, %c0_93] : memref<8x32xf32, #tpu.memory_space<vmem>>, vector<8x32xf32>
      tpu.vector_store %arg14[%c0_92, %c0_93], %219 {strides = array<i32>} : memref<8x32xf32, #tpu.memory_space<vmem>>, vector<8x32xf32>,
    } else {
    }
    %c0 = arith.constant 0 : index
    %c0_1 = arith.constant 0 : index
    %3 = vector.load %arg14[%c0, %c0_1] : memref<8x32xf32, #tpu.memory_space<vmem>>, vector<8x32xf32>
    %c0_2 = arith.constant 0 : index
    %c0_3 = arith.constant 0 : index
    %c0_4 = arith.constant 0 : index
    %4 = vector.load %arg2[%c0_2, %c0_3, %c0_4] : memref<1x1x32xf32, #tpu.memory_space<vmem>>, vector<1x1x32xf32>
    %5 = vector.shape_cast %4 : vector<1x1x32xf32> to vector<1x32xf32>
    %c0_5 = arith.constant 0 : index
    %c0_6 = arith.constant 0 : index
    %c0_7 = arith.constant 0 : index
    %6 = vector.load %arg3[%c0_5, %c0_6, %c0_7] : memref<1x1x32xf32, #tpu.memory_space<vmem>>, vector<1x1x32xf32>
    %7 = vector.shape_cast %6 : vector<1x1x32xf32> to vector<1x32xf32>
    %cst = arith.constant dense<0.000000e+00> : vector<8xf32>
    %8 = vector.multi_reduction <add>, %3, %cst [1] : vector<8x32xf32> to vector<8xf32>
    %9 = vector.shape_cast %8 : vector<8xf32> to vector<8x1xf32>
    %cst_8 = arith.constant 3.200000e+01 : f32
    %10 = vector.broadcast %cst_8 : f32 to vector<8x1xf32>
    %11 = arith.divf %9, %10 : vector<8x1xf32>
    %12 = vector.broadcast %11 : vector<8x1xf32> to vector<8x32xf32>
    %13 = arith.subf %3, %12 : vector<8x32xf32>
    %14 = arith.mulf %13, %13 : vector<8x32xf32>
    %cst_9 = arith.constant dense<0.000000e+00> : vector<8xf32>
    %15 = vector.multi_reduction <add>, %14, %cst_9 [1] : vector<8x32xf32> to vector<8xf32>
    %16 = vector.shape_cast %15 : vector<8xf32> to vector<8x1xf32>
    %cst_10 = arith.constant 3.200000e+01 : f32
    %17 = vector.broadcast %cst_10 : f32 to vector<8x1xf32>
    %18 = arith.divf %16, %17 : vector<8x1xf32>
    %19 = vector.broadcast %11 : vector<8x1xf32> to vector<8x32xf32>
    %20 = arith.subf %3, %19 : vector<8x32xf32>
    %cst_11 = arith.constant 9.99999997E-7 : f32
    %21 = vector.broadcast %cst_11 : f32 to vector<8x1xf32>
    %22 = arith.addf %18, %21 : vector<8x1xf32>
    %23 = math.rsqrt %22 : vector<8x1xf32>
    %24 = vector.broadcast %23 : vector<8x1xf32> to vector<8x32xf32>
    %25 = arith.mulf %20, %24 : vector<8x32xf32>
    %26 = vector.broadcast %5 : vector<1x32xf32> to vector<8x32xf32>
    %27 = arith.mulf %25, %26 : vector<8x32xf32>
    %28 = vector.broadcast %7 : vector<1x32xf32> to vector<8x32xf32>
    %29 = arith.addf %27, %28 : vector<8x32xf32>
    %30 = arith.truncf %29 : vector<8x32xf32> to vector<8x32xbf16>
    %c0_12 = arith.constant 0 : index
    %c0_13 = arith.constant 0 : index
    %c0_14 = arith.constant 0 : index
    %31 = vector.load %arg4[%c0_12, %c0_13, %c0_14] : memref<1x32x96xbf16, #tpu.memory_space<vmem>>, vector<1x32x96xbf16>
    %32 = vector.shape_cast %31 : vector<1x32x96xbf16> to vector<32x96xbf16>
    %cst_15 = arith.constant dense<0.000000e+00> : vector<8x96xf32>
    %33 = tpu.matmul %30, %32, %cst_15 {dimension_numbers = #tpu.dot_dimension_numbers<[1], [0], [0], [1], [0, 0, 1, 1], [], []>} : vector<8x32xbf16>, vector<32x96xbf16>, vector<8x96xf32> -> vector<8x96xf32>
    %c0_16 = arith.constant 0 : index
    %c0_17 = arith.constant 0 : index
    %c0_18 = arith.constant 0 : index
    %34 = vector.load %arg5[%c0_16, %c0_17, %c0_18] : memref<1x1x96xf32, #tpu.memory_space<vmem>>, vector<1x1x96xf32>
    %35 = vector.shape_cast %34 : vector<1x1x96xf32> to vector<1x96xf32>
    %36 = vector.broadcast %35 : vector<1x96xf32> to vector<8x96xf32>
    %37 = arith.addf %33, %36 : vector<8x96xf32>
    %c0_19 = arith.constant 0 : index
    %c0_20 = arith.constant 0 : index
    %c0_21 = arith.constant 0 : index
    %38 = vector.load %arg7[%c0_19, %c0_20, %c0_21] : memref<1x1x32xf32, #tpu.memory_space<vmem>>, vector<1x1x32xf32>
    %39 = vector.shape_cast %38 : vector<1x1x32xf32> to vector<1x32xf32>
    %40 = vector.broadcast %39 : vector<1x32xf32> to vector<8x32xf32>
    %41 = arith.addf %3, %40 : vector<8x32xf32>
    %42 = vector.extract_strided_slice %37 {offsets = [0, 0], sizes = [8, 8], strides = [1, 1]} : vector<8x96xf32> to vector<8x8xf32>
    %43 = vector.extract_strided_slice %37 {offsets = [0, 32], sizes = [8, 8], strides = [1, 1]} : vector<8x96xf32> to vector<8x8xf32>
    %44 = vector.extract_strided_slice %37 {offsets = [0, 64], sizes = [8, 8], strides = [1, 1]} : vector<8x96xf32> to vector<8x8xf32>
    %45 = vector.shape_cast %42 : vector<8x8xf32> to vector<2x4x8xf32>
    %46 = arith.truncf %45 : vector<2x4x8xf32> to vector<2x4x8xbf16>
    %47 = vector.shape_cast %43 : vector<8x8xf32> to vector<2x4x8xf32>
    %48 = arith.truncf %47 : vector<2x4x8xf32> to vector<2x4x8xbf16>
    %49 = vector.shape_cast %44 : vector<8x8xf32> to vector<2x4x8xf32>
    %50 = arith.truncf %49 : vector<2x4x8xf32> to vector<2x4x8xbf16>
    "tpu.trace_start"() <{level = 10 : i32, message = "bqd,bkd->bqk"}> : () -> ()
    %cst_22 = arith.constant dense<0.000000e+00> : vector<2x4x4xf32>
    %51 = tpu.matmul %46, %48, %cst_22 {dimension_numbers = #tpu.dot_dimension_numbers<[2], [2], [1], [1], [0, 0, 0, 1, 1, 1], [0], [0]>} : vector<2x4x8xbf16>, vector<2x4x8xbf16>, vector<2x4x4xf32> -> vector<2x4x4xf32>
    "tpu.trace_stop"() : () -> ()
    %cst_23 = arith.constant 0.353553385 : f32
    %52 = vector.broadcast %cst_23 : f32 to vector<2x4x4xf32>
    %53 = arith.mulf %51, %52 : vector<2x4x4xf32>
    %cst_24 = arith.constant dense<0xFF800000> : vector<2x4xf32>
    %54 = vector.multi_reduction <maximumf>, %53, %cst_24 [2] : vector<2x4x4xf32> to vector<2x4xf32>
    %55 = vector.shape_cast %54 : vector<2x4xf32> to vector<2x4x1xf32>
    %56 = vector.broadcast %55 : vector<2x4x1xf32> to vector<2x4x4xf32>
    %57 = arith.subf %53, %56 : vector<2x4x4xf32>
    %58 = math.exp %57 : vector<2x4x4xf32>
    %cst_25 = arith.constant dense<0.000000e+00> : vector<2x4xf32>
    %59 = vector.multi_reduction <add>, %58, %cst_25 [2] : vector<2x4x4xf32> to vector<2x4xf32>
    %60 = vector.shape_cast %59 : vector<2x4xf32> to vector<2x4x1xf32>
    %61 = tpu.reciprocal %60 {approx = true} : vector<2x4x1xf32> -> vector<2x4x1xf32>
    %62 = vector.broadcast %61 : vector<2x4x1xf32> to vector<2x4x4xf32>
    %63 = arith.mulf %58, %62 : vector<2x4x4xf32>
    %64 = arith.truncf %63 : vector<2x4x4xf32> to vector<2x4x4xbf16>
    "tpu.trace_start"() <{level = 10 : i32, message = "bqk,bkd->bqd"}> : () -> ()
    %cst_26 = arith.constant dense<0.000000e+00> : vector<2x4x8xf32>
    %65 = tpu.matmul %64, %50, %cst_26 {dimension_numbers = #tpu.dot_dimension_numbers<[2], [1], [1], [2], [0, 0, 0, 1, 1, 2], [0], [0]>} : vector<2x4x4xbf16>, vector<2x4x8xbf16>, vector<2x4x8xf32> -> vector<2x4x8xf32>
    "tpu.trace_stop"() : () -> ()
    %66 = vector.shape_cast %65 : vector<2x4x8xf32> to vector<8x8xf32>
    %67 = arith.truncf %66 : vector<8x8xf32> to vector<8x8xbf16>
    %c0_27 = arith.constant 0 : index
    %c0_28 = arith.constant 0 : index
    %c0_29 = arith.constant 0 : index
    %c0_30 = arith.constant 0 : index
    %68 = vector.load %arg6[%c0_27, %c0_28, %c0_29, %c0_30] : memref<1x4x8x32xbf16, #tpu.memory_space<vmem>>, vector<1x1x8x32xbf16>
    %69 = vector.shape_cast %68 : vector<1x1x8x32xbf16> to vector<8x32xbf16>
    %cst_31 = arith.constant dense<0.000000e+00> : vector<8x32xf32>
    %70 = tpu.matmul %67, %69, %cst_31 {dimension_numbers = #tpu.dot_dimension_numbers<[1], [0], [0], [1], [0, 0, 1, 1], [], []>} : vector<8x8xbf16>, vector<8x32xbf16>, vector<8x32xf32> -> vector<8x32xf32>
    %71 = arith.addf %41, %70 : vector<8x32xf32>
    %72 = vector.extract_strided_slice %37 {offsets = [0, 8], sizes = [8, 8], strides = [1, 1]} : vector<8x96xf32> to vector<8x8xf32>
    %73 = vector.extract_strided_slice %37 {offsets = [0, 40], sizes = [8, 8], strides = [1, 1]} : vector<8x96xf32> to vector<8x8xf32>
    %74 = vector.extract_strided_slice %37 {offsets = [0, 72], sizes = [8, 8], strides = [1, 1]} : vector<8x96xf32> to vector<8x8xf32>
    %75 = vector.shape_cast %72 : vector<8x8xf32> to vector<2x4x8xf32>
    %76 = arith.truncf %75 : vector<2x4x8xf32> to vector<2x4x8xbf16>
    %77 = vector.shape_cast %73 : vector<8x8xf32> to vector<2x4x8xf32>
    %78 = arith.truncf %77 : vector<2x4x8xf32> to vector<2x4x8xbf16>
    %79 = vector.shape_cast %74 : vector<8x8xf32> to vector<2x4x8xf32>
    %80 = arith.truncf %79 : vector<2x4x8xf32> to vector<2x4x8xbf16>
    "tpu.trace_start"() <{level = 10 : i32, message = "bqd,bkd->bqk"}> : () -> ()
    %cst_32 = arith.constant dense<0.000000e+00> : vector<2x4x4xf32>
    %81 = tpu.matmul %76, %78, %cst_32 {dimension_numbers = #tpu.dot_dimension_numbers<[2], [2], [1], [1], [0, 0, 0, 1, 1, 1], [0], [0]>} : vector<2x4x8xbf16>, vector<2x4x8xbf16>, vector<2x4x4xf32> -> vector<2x4x4xf32>
    "tpu.trace_stop"() : () -> ()
    %cst_33 = arith.constant 0.353553385 : f32
    %82 = vector.broadcast %cst_33 : f32 to vector<2x4x4xf32>
    %83 = arith.mulf %81, %82 : vector<2x4x4xf32>
    %cst_34 = arith.constant dense<0xFF800000> : vector<2x4xf32>
    %84 = vector.multi_reduction <maximumf>, %83, %cst_34 [2] : vector<2x4x4xf32> to vector<2x4xf32>
    %85 = vector.shape_cast %84 : vector<2x4xf32> to vector<2x4x1xf32>
    %86 = vector.broadcast %85 : vector<2x4x1xf32> to vector<2x4x4xf32>
    %87 = arith.subf %83, %86 : vector<2x4x4xf32>
    %88 = math.exp %87 : vector<2x4x4xf32>
    %cst_35 = arith.constant dense<0.000000e+00> : vector<2x4xf32>
    %89 = vector.multi_reduction <add>, %88, %cst_35 [2] : vector<2x4x4xf32> to vector<2x4xf32>
    %90 = vector.shape_cast %89 : vector<2x4xf32> to vector<2x4x1xf32>
    %91 = tpu.reciprocal %90 {approx = true} : vector<2x4x1xf32> -> vector<2x4x1xf32>
    %92 = vector.broadcast %91 : vector<2x4x1xf32> to vector<2x4x4xf32>
    %93 = arith.mulf %88, %92 : vector<2x4x4xf32>
    %94 = arith.truncf %93 : vector<2x4x4xf32> to vector<2x4x4xbf16>
    "tpu.trace_start"() <{level = 10 : i32, message = "bqk,bkd->bqd"}> : () -> ()
    %cst_36 = arith.constant dense<0.000000e+00> : vector<2x4x8xf32>
    %95 = tpu.matmul %94, %80, %cst_36 {dimension_numbers = #tpu.dot_dimension_numbers<[2], [1], [1], [2], [0, 0, 0, 1, 1, 2], [0], [0]>} : vector<2x4x4xbf16>, vector<2x4x8xbf16>, vector<2x4x8xf32> -> vector<2x4x8xf32>
    "tpu.trace_stop"() : () -> ()
    %96 = vector.shape_cast %95 : vector<2x4x8xf32> to vector<8x8xf32>
    %97 = arith.truncf %96 : vector<8x8xf32> to vector<8x8xbf16>
    %c0_37 = arith.constant 0 : index
    %c1 = arith.constant 1 : index
    %c0_38 = arith.constant 0 : index
    %c0_39 = arith.constant 0 : index
    %98 = vector.load %arg6[%c0_37, %c1, %c0_38, %c0_39] : memref<1x4x8x32xbf16, #tpu.memory_space<vmem>>, vector<1x1x8x32xbf16>
    %99 = vector.shape_cast %98 : vector<1x1x8x32xbf16> to vector<8x32xbf16>
    %cst_40 = arith.constant dense<0.000000e+00> : vector<8x32xf32>
    %100 = tpu.matmul %97, %99, %cst_40 {dimension_numbers = #tpu.dot_dimension_numbers<[1], [0], [0], [1], [0, 0, 1, 1], [], []>} : vector<8x8xbf16>, vector<8x32xbf16>, vector<8x32xf32> -> vector<8x32xf32>
    %101 = arith.addf %71, %100 : vector<8x32xf32>
    %102 = vector.extract_strided_slice %37 {offsets = [0, 16], sizes = [8, 8], strides = [1, 1]} : vector<8x96xf32> to vector<8x8xf32>
    %103 = vector.extract_strided_slice %37 {offsets = [0, 48], sizes = [8, 8], strides = [1, 1]} : vector<8x96xf32> to vector<8x8xf32>
    %104 = vector.extract_strided_slice %37 {offsets = [0, 80], sizes = [8, 8], strides = [1, 1]} : vector<8x96xf32> to vector<8x8xf32>
    %105 = vector.shape_cast %102 : vector<8x8xf32> to vector<2x4x8xf32>
    %106 = arith.truncf %105 : vector<2x4x8xf32> to vector<2x4x8xbf16>
    %107 = vector.shape_cast %103 : vector<8x8xf32> to vector<2x4x8xf32>
    %108 = arith.truncf %107 : vector<2x4x8xf32> to vector<2x4x8xbf16>
    %109 = vector.shape_cast %104 : vector<8x8xf32> to vector<2x4x8xf32>
    %110 = arith.truncf %109 : vector<2x4x8xf32> to vector<2x4x8xbf16>
    "tpu.trace_start"() <{level = 10 : i32, message = "bqd,bkd->bqk"}> : () -> ()
    %cst_41 = arith.constant dense<0.000000e+00> : vector<2x4x4xf32>
    %111 = tpu.matmul %106, %108, %cst_41 {dimension_numbers = #tpu.dot_dimension_numbers<[2], [2], [1], [1], [0, 0, 0, 1, 1, 1], [0], [0]>} : vector<2x4x8xbf16>, vector<2x4x8xbf16>, vector<2x4x4xf32> -> vector<2x4x4xf32>
    "tpu.trace_stop"() : () -> ()
    %cst_42 = arith.constant 0.353553385 : f32
    %112 = vector.broadcast %cst_42 : f32 to vector<2x4x4xf32>
    %113 = arith.mulf %111, %112 : vector<2x4x4xf32>
    %cst_43 = arith.constant dense<0xFF800000> : vector<2x4xf32>
    %114 = vector.multi_reduction <maximumf>, %113, %cst_43 [2] : vector<2x4x4xf32> to vector<2x4xf32>
    %115 = vector.shape_cast %114 : vector<2x4xf32> to vector<2x4x1xf32>
    %116 = vector.broadcast %115 : vector<2x4x1xf32> to vector<2x4x4xf32>
    %117 = arith.subf %113, %116 : vector<2x4x4xf32>
    %118 = math.exp %117 : vector<2x4x4xf32>
    %cst_44 = arith.constant dense<0.000000e+00> : vector<2x4xf32>
    %119 = vector.multi_reduction <add>, %118, %cst_44 [2] : vector<2x4x4xf32> to vector<2x4xf32>
    %120 = vector.shape_cast %119 : vector<2x4xf32> to vector<2x4x1xf32>
    %121 = tpu.reciprocal %120 {approx = true} : vector<2x4x1xf32> -> vector<2x4x1xf32>
    %122 = vector.broadcast %121 : vector<2x4x1xf32> to vector<2x4x4xf32>
    %123 = arith.mulf %118, %122 : vector<2x4x4xf32>
    %124 = arith.truncf %123 : vector<2x4x4xf32> to vector<2x4x4xbf16>
    "tpu.trace_start"() <{level = 10 : i32, message = "bqk,bkd->bqd"}> : () -> ()
    %cst_45 = arith.constant dense<0.000000e+00> : vector<2x4x8xf32>
    %125 = tpu.matmul %124, %110, %cst_45 {dimension_numbers = #tpu.dot_dimension_numbers<[2], [1], [1], [2], [0, 0, 0, 1, 1, 2], [0], [0]>} : vector<2x4x4xbf16>, vector<2x4x8xbf16>, vector<2x4x8xf32> -> vector<2x4x8xf32>
    "tpu.trace_stop"() : () -> ()
    %126 = vector.shape_cast %125 : vector<2x4x8xf32> to vector<8x8xf32>
    %127 = arith.truncf %126 : vector<8x8xf32> to vector<8x8xbf16>
    %c0_46 = arith.constant 0 : index
    %c2 = arith.constant 2 : index
    %c0_47 = arith.constant 0 : index
    %c0_48 = arith.constant 0 : index
    %128 = vector.load %arg6[%c0_46, %c2, %c0_47, %c0_48] : memref<1x4x8x32xbf16, #tpu.memory_space<vmem>>, vector<1x1x8x32xbf16>
    %129 = vector.shape_cast %128 : vector<1x1x8x32xbf16> to vector<8x32xbf16>
    %cst_49 = arith.constant dense<0.000000e+00> : vector<8x32xf32>
    %130 = tpu.matmul %127, %129, %cst_49 {dimension_numbers = #tpu.dot_dimension_numbers<[1], [0], [0], [1], [0, 0, 1, 1], [], []>} : vector<8x8xbf16>, vector<8x32xbf16>, vector<8x32xf32> -> vector<8x32xf32>
    %131 = arith.addf %101, %130 : vector<8x32xf32>
    %132 = vector.extract_strided_slice %37 {offsets = [0, 24], sizes = [8, 8], strides = [1, 1]} : vector<8x96xf32> to vector<8x8xf32>
    %133 = vector.extract_strided_slice %37 {offsets = [0, 56], sizes = [8, 8], strides = [1, 1]} : vector<8x96xf32> to vector<8x8xf32>
    %134 = vector.extract_strided_slice %37 {offsets = [0, 88], sizes = [8, 8], strides = [1, 1]} : vector<8x96xf32> to vector<8x8xf32>
    %135 = vector.shape_cast %132 : vector<8x8xf32> to vector<2x4x8xf32>
    %136 = arith.truncf %135 : vector<2x4x8xf32> to vector<2x4x8xbf16>
    %137 = vector.shape_cast %133 : vector<8x8xf32> to vector<2x4x8xf32>
    %138 = arith.truncf %137 : vector<2x4x8xf32> to vector<2x4x8xbf16>
    %139 = vector.shape_cast %134 : vector<8x8xf32> to vector<2x4x8xf32>
    %140 = arith.truncf %139 : vector<2x4x8xf32> to vector<2x4x8xbf16>
    "tpu.trace_start"() <{level = 10 : i32, message = "bqd,bkd->bqk"}> : () -> ()
    %cst_50 = arith.constant dense<0.000000e+00> : vector<2x4x4xf32>
    %141 = tpu.matmul %136, %138, %cst_50 {dimension_numbers = #tpu.dot_dimension_numbers<[2], [2], [1], [1], [0, 0, 0, 1, 1, 1], [0], [0]>} : vector<2x4x8xbf16>, vector<2x4x8xbf16>, vector<2x4x4xf32> -> vector<2x4x4xf32>
    "tpu.trace_stop"() : () -> ()
    %cst_51 = arith.constant 0.353553385 : f32
    %142 = vector.broadcast %cst_51 : f32 to vector<2x4x4xf32>
    %143 = arith.mulf %141, %142 : vector<2x4x4xf32>
    %cst_52 = arith.constant dense<0xFF800000> : vector<2x4xf32>
    %144 = vector.multi_reduction <maximumf>, %143, %cst_52 [2] : vector<2x4x4xf32> to vector<2x4xf32>
    %145 = vector.shape_cast %144 : vector<2x4xf32> to vector<2x4x1xf32>
    %146 = vector.broadcast %145 : vector<2x4x1xf32> to vector<2x4x4xf32>
    %147 = arith.subf %143, %146 : vector<2x4x4xf32>
    %148 = math.exp %147 : vector<2x4x4xf32>
    %cst_53 = arith.constant dense<0.000000e+00> : vector<2x4xf32>
    %149 = vector.multi_reduction <add>, %148, %cst_53 [2] : vector<2x4x4xf32> to vector<2x4xf32>
    %150 = vector.shape_cast %149 : vector<2x4xf32> to vector<2x4x1xf32>
    %151 = tpu.reciprocal %150 {approx = true} : vector<2x4x1xf32> -> vector<2x4x1xf32>
    %152 = vector.broadcast %151 : vector<2x4x1xf32> to vector<2x4x4xf32>
    %153 = arith.mulf %148, %152 : vector<2x4x4xf32>
    %154 = arith.truncf %153 : vector<2x4x4xf32> to vector<2x4x4xbf16>
    "tpu.trace_start"() <{level = 10 : i32, message = "bqk,bkd->bqd"}> : () -> ()
    %cst_54 = arith.constant dense<0.000000e+00> : vector<2x4x8xf32>
    %155 = tpu.matmul %154, %140, %cst_54 {dimension_numbers = #tpu.dot_dimension_numbers<[2], [1], [1], [2], [0, 0, 0, 1, 1, 2], [0], [0]>} : vector<2x4x4xbf16>, vector<2x4x8xbf16>, vector<2x4x8xf32> -> vector<2x4x8xf32>
    "tpu.trace_stop"() : () -> ()
    %156 = vector.shape_cast %155 : vector<2x4x8xf32> to vector<8x8xf32>
    %157 = arith.truncf %156 : vector<8x8xf32> to vector<8x8xbf16>
    %c0_55 = arith.constant 0 : index
    %c3 = arith.constant 3 : index
    %c0_56 = arith.constant 0 : index
    %c0_57 = arith.constant 0 : index
    %158 = vector.load %arg6[%c0_55, %c3, %c0_56, %c0_57] : memref<1x4x8x32xbf16, #tpu.memory_space<vmem>>, vector<1x1x8x32xbf16>
    %159 = vector.shape_cast %158 : vector<1x1x8x32xbf16> to vector<8x32xbf16>
    %cst_58 = arith.constant dense<0.000000e+00> : vector<8x32xf32>
    %160 = tpu.matmul %157, %159, %cst_58 {dimension_numbers = #tpu.dot_dimension_numbers<[1], [0], [0], [1], [0, 0, 1, 1], [], []>} : vector<8x8xbf16>, vector<8x32xbf16>, vector<8x32xf32> -> vector<8x32xf32>
    %161 = arith.addf %131, %160 : vector<8x32xf32>
    %c0_59 = arith.constant 0 : index
    %c0_60 = arith.constant 0 : index
    %c0_61 = arith.constant 0 : index
    %162 = vector.load %arg8[%c0_59, %c0_60, %c0_61] : memref<1x1x32xf32, #tpu.memory_space<vmem>>, vector<1x1x32xf32>
    %163 = vector.shape_cast %162 : vector<1x1x32xf32> to vector<1x32xf32>
    %c0_62 = arith.constant 0 : index
    %c0_63 = arith.constant 0 : index
    %c0_64 = arith.constant 0 : index
    %164 = vector.load %arg9[%c0_62, %c0_63, %c0_64] : memref<1x1x32xf32, #tpu.memory_space<vmem>>, vector<1x1x32xf32>
    %165 = vector.shape_cast %164 : vector<1x1x32xf32> to vector<1x32xf32>
    %cst_65 = arith.constant dense<0.000000e+00> : vector<8xf32>
    %166 = vector.multi_reduction <add>, %161, %cst_65 [1] : vector<8x32xf32> to vector<8xf32>
    %167 = vector.shape_cast %166 : vector<8xf32> to vector<8x1xf32>
    %cst_66 = arith.constant 3.200000e+01 : f32
    %168 = vector.broadcast %cst_66 : f32 to vector<8x1xf32>
    %169 = arith.divf %167, %168 : vector<8x1xf32>
    %170 = vector.broadcast %169 : vector<8x1xf32> to vector<8x32xf32>
    %171 = arith.subf %161, %170 : vector<8x32xf32>
    %172 = arith.mulf %171, %171 : vector<8x32xf32>
    %cst_67 = arith.constant dense<0.000000e+00> : vector<8xf32>
    %173 = vector.multi_reduction <add>, %172, %cst_67 [1] : vector<8x32xf32> to vector<8xf32>
    %174 = vector.shape_cast %173 : vector<8xf32> to vector<8x1xf32>
    %cst_68 = arith.constant 3.200000e+01 : f32
    %175 = vector.broadcast %cst_68 : f32 to vector<8x1xf32>
    %176 = arith.divf %174, %175 : vector<8x1xf32>
    %177 = vector.broadcast %169 : vector<8x1xf32> to vector<8x32xf32>
    %178 = arith.subf %161, %177 : vector<8x32xf32>
    %cst_69 = arith.constant 9.99999997E-7 : f32
    %179 = vector.broadcast %cst_69 : f32 to vector<8x1xf32>
    %180 = arith.addf %176, %179 : vector<8x1xf32>
    %181 = math.rsqrt %180 : vector<8x1xf32>
    %182 = vector.broadcast %181 : vector<8x1xf32> to vector<8x32xf32>
    %183 = arith.mulf %178, %182 : vector<8x32xf32>
    %184 = vector.broadcast %163 : vector<1x32xf32> to vector<8x32xf32>
    %185 = arith.mulf %183, %184 : vector<8x32xf32>
    %186 = vector.broadcast %165 : vector<1x32xf32> to vector<8x32xf32>
    %187 = arith.addf %185, %186 : vector<8x32xf32>
    %188 = arith.truncf %187 : vector<8x32xf32> to vector<8x32xbf16>
    %c0_70 = arith.constant 0 : index
    %c0_71 = arith.constant 0 : index
    %c0_72 = arith.constant 0 : index
    %189 = vector.load %arg10[%c0_70, %c0_71, %c0_72] : memref<1x32x64xbf16, #tpu.memory_space<vmem>>, vector<1x32x64xbf16>
    %190 = vector.shape_cast %189 : vector<1x32x64xbf16> to vector<32x64xbf16>
    %cst_73 = arith.constant dense<0.000000e+00> : vector<8x64xf32>
    %191 = tpu.matmul %188, %190, %cst_73 {dimension_numbers = #tpu.dot_dimension_numbers<[1], [0], [0], [1], [0, 0, 1, 1], [], []>} : vector<8x32xbf16>, vector<32x64xbf16>, vector<8x64xf32> -> vector<8x64xf32>
    %c0_74 = arith.constant 0 : index
    %c0_75 = arith.constant 0 : index
    %c0_76 = arith.constant 0 : index
    %192 = vector.load %arg11[%c0_74, %c0_75, %c0_76] : memref<1x1x64xf32, #tpu.memory_space<vmem>>, vector<1x1x64xf32>
    %193 = vector.shape_cast %192 : vector<1x1x64xf32> to vector<1x64xf32>
    %194 = vector.broadcast %193 : vector<1x64xf32> to vector<8x64xf32>
    %195 = arith.addf %191, %194 : vector<8x64xf32>
    %196 = arith.mulf %195, %195 : vector<8x64xf32>
    %197 = arith.mulf %195, %196 : vector<8x64xf32>
    %cst_77 = arith.constant 4.471500e-02 : f32
    %198 = vector.broadcast %cst_77 : f32 to vector<8x64xf32>
    %199 = arith.mulf %198, %197 : vector<8x64xf32>
    %200 = arith.addf %195, %199 : vector<8x64xf32>
    %cst_78 = arith.constant 0.797884583 : f32
    %201 = vector.broadcast %cst_78 : f32 to vector<8x64xf32>
    %202 = arith.mulf %201, %200 : vector<8x64xf32>
    %203 = math.tanh %202 : vector<8x64xf32>
    %cst_79 = arith.constant 1.000000e+00 : f32
    %204 = vector.broadcast %cst_79 : f32 to vector<8x64xf32>
    %205 = arith.addf %204, %203 : vector<8x64xf32>
    %cst_80 = arith.constant 5.000000e-01 : f32
    %206 = vector.broadcast %cst_80 : f32 to vector<8x64xf32>
    %207 = arith.mulf %206, %205 : vector<8x64xf32>
    %208 = arith.mulf %195, %207 : vector<8x64xf32>
    %209 = arith.truncf %208 : vector<8x64xf32> to vector<8x64xbf16>
    %c0_81 = arith.constant 0 : index
    %c0_82 = arith.constant 0 : index
    %c0_83 = arith.constant 0 : index
    %210 = vector.load %arg12[%c0_81, %c0_82, %c0_83] : memref<1x64x32xbf16, #tpu.memory_space<vmem>>, vector<1x64x32xbf16>
    %211 = vector.shape_cast %210 : vector<1x64x32xbf16> to vector<64x32xbf16>
    %cst_84 = arith.constant dense<0.000000e+00> : vector<8x32xf32>
    %212 = tpu.matmul %209, %211, %cst_84 {dimension_numbers = #tpu.dot_dimension_numbers<[1], [0], [0], [1], [0, 0, 1, 1], [], []>} : vector<8x64xbf16>, vector<64x32xbf16>, vector<8x32xf32> -> vector<8x32xf32>
    %213 = arith.addf %161, %212 : vector<8x32xf32>
    %c0_85 = arith.constant 0 : index
    %c0_86 = arith.constant 0 : index
    %c0_87 = arith.constant 0 : index
    %214 = vector.load %arg13[%c0_85, %c0_86, %c0_87] : memref<1x1x32xf32, #tpu.memory_space<vmem>>, vector<1x1x32xf32>
    %215 = vector.shape_cast %214 : vector<1x1x32xf32> to vector<1x32xf32>
    %216 = vector.broadcast %215 : vector<1x32xf32> to vector<8x32xf32>
    %217 = arith.addf %213, %216 : vector<8x32xf32>
    %c0_88 = arith.constant 0 : index
    %c0_89 = arith.constant 0 : index
    %218 = vector.load %arg14[%c0_88, %c0_89] : memref<8x32xf32, #tpu.memory_space<vmem>>, vector<8x32xf32>
    tpu.vector_store %arg14[%c0_88, %c0_89], %217 {strides = array<i32>} : memref<8x32xf32, #tpu.memory_space<vmem>>, vector<8x32xf32>,
    return
  }
  func.func @transform_0(%arg0: i32) -> (i32, i32) {
    %c0_i32 = arith.constant 0 : i32
    %c0_i32_0 = arith.constant 0 : i32
    %c0_i32_1 = arith.constant 0 : i32
    return %c0_i32, %c0_i32_0 : i32, i32
  }
  func.func @transform_1(%arg0: i32) -> (i32, i32, i32) {
    %c0_i32 = arith.constant 0 : i32
    %c0_i32_0 = arith.constant 0 : i32
    %c0_i32_1 = arith.constant 0 : i32
    return %arg0, %c0_i32, %c0_i32_0 : i32, i32, i32
  }
  func.func @transform_2(%arg0: i32) -> (i32, i32, i32) {
    %c0_i32 = arith.constant 0 : i32
    %c0_i32_0 = arith.constant 0 : i32
    %c0_i32_1 = arith.constant 0 : i32
    return %arg0, %c0_i32, %c0_i32_0 : i32, i32, i32
  }
  func.func @transform_3(%arg0: i32) -> (i32, i32, i32) {
    %c0_i32 = arith.constant 0 : i32
    %c0_i32_0 = arith.constant 0 : i32
    %c0_i32_1 = arith.constant 0 : i32
    return %arg0, %c0_i32, %c0_i32_0 : i32, i32, i32
  }
  func.func @transform_4(%arg0: i32) -> (i32, i32, i32) {
    %c0_i32 = arith.constant 0 : i32
    %c0_i32_0 = arith.constant 0 : i32
    %c0_i32_1 = arith.constant 0 : i32
    return %arg0, %c0_i32, %c0_i32_0 : i32, i32, i32
  }
  func.func @transform_5(%arg0: i32) -> (i32, i32, i32, i32) {
    %c0_i32 = arith.constant 0 : i32
    %c0_i32_0 = arith.constant 0 : i32
    %c0_i32_1 = arith.constant 0 : i32
    %c0_i32_2 = arith.constant 0 : i32
    return %arg0, %c0_i32, %c0_i32_0, %c0_i32_1 : i32, i32, i32, i32
  }
  func.func @transform_6(%arg0: i32) -> (i32, i32, i32) {
    %c0_i32 = arith.constant 0 : i32
    %c0_i32_0 = arith.constant 0 : i32
    %c0_i32_1 = arith.constant 0 : i32
    return %arg0, %c0_i32, %c0_i32_0 : i32, i32, i32
  }
  func.func @transform_7(%arg0: i32) -> (i32, i32, i32) {
    %c0_i32 = arith.constant 0 : i32
    %c0_i32_0 = arith.constant 0 : i32
    %c0_i32_1 = arith.constant 0 : i32
    return %arg0, %c0_i32, %c0_i32_0 : i32, i32, i32
  }
  func.func @transform_8(%arg0: i32) -> (i32, i32, i32) {
    %c0_i32 = arith.constant 0 : i32
    %c0_i32_0 = arith.constant 0 : i32
    %c0_i32_1 = arith.constant 0 : i32
    return %arg0, %c0_i32, %c0_i32_0 : i32, i32, i32
  }
  func.func @transform_9(%arg0: i32) -> (i32, i32, i32) {
    %c0_i32 = arith.constant 0 : i32
    %c0_i32_0 = arith.constant 0 : i32
    %c0_i32_1 = arith.constant 0 : i32
    return %arg0, %c0_i32, %c0_i32_0 : i32, i32, i32
  }
  func.func @transform_10(%arg0: i32) -> (i32, i32, i32) {
    %c0_i32 = arith.constant 0 : i32
    %c0_i32_0 = arith.constant 0 : i32
    %c0_i32_1 = arith.constant 0 : i32
    return %arg0, %c0_i32, %c0_i32_0 : i32, i32, i32
  }
  func.func @transform_11(%arg0: i32) -> (i32, i32, i32) {
    %c0_i32 = arith.constant 0 : i32
    %c0_i32_0 = arith.constant 0 : i32
    %c0_i32_1 = arith.constant 0 : i32
    return %arg0, %c0_i32, %c0_i32_0 : i32, i32, i32
  }
  func.func @transform_12(%arg0: i32) -> (i32, i32, i32) {
    %c0_i32 = arith.constant 0 : i32
    %c0_i32_0 = arith.constant 0 : i32
    %c0_i32_1 = arith.constant 0 : i32
    return %arg0, %c0_i32, %c0_i32_0 : i32, i32, i32
  }
  func.func @transform_13(%arg0: i32) -> (i32, i32) {
    %c0_i32 = arith.constant 0 : i32
    %c0_i32_0 = arith.constant 0 : i32
    %c0_i32_1 = arith.constant 0 : i32
    return %c0_i32, %c0_i32_0 : i32, i32
  }
}

module attributes {stable_mosaic.version = 11 : i64} {
  func.func @_postln_proj_kernel(%arg0: memref<8x32xf32, #tpu.memory_space<vmem>>, %arg1: memref<1x32xf32, #tpu.memory_space<vmem>>, %arg2: memref<1x32xf32, #tpu.memory_space<vmem>>, %arg3: memref<32x32xbf16, #tpu.memory_space<vmem>>, %arg4: memref<1x32xf32, #tpu.memory_space<vmem>>, %arg5: memref<8x32xf32, #tpu.memory_space<vmem>>) attributes {dimension_semantics = [], scalar_prefetch = 0 : i64, scratch_operands = 0 : i64, tpu.core_type = #tpu.core_type<tc>} {
    %c0 = arith.constant 0 : index
    %c0_0 = arith.constant 0 : index
    %0 = vector.load %arg0[%c0, %c0_0] : memref<8x32xf32, #tpu.memory_space<vmem>>, vector<8x32xf32>
    %c0_1 = arith.constant 0 : index
    %c0_2 = arith.constant 0 : index
    %1 = vector.load %arg1[%c0_1, %c0_2] : memref<1x32xf32, #tpu.memory_space<vmem>>, vector<1x32xf32>
    %c0_3 = arith.constant 0 : index
    %c0_4 = arith.constant 0 : index
    %2 = vector.load %arg2[%c0_3, %c0_4] : memref<1x32xf32, #tpu.memory_space<vmem>>, vector<1x32xf32>
    %cst = arith.constant dense<0.000000e+00> : vector<8xf32>
    %3 = vector.multi_reduction <add>, %0, %cst [1] : vector<8x32xf32> to vector<8xf32>
    %4 = vector.shape_cast %3 : vector<8xf32> to vector<8x1xf32>
    %cst_5 = arith.constant 3.200000e+01 : f32
    %5 = vector.broadcast %cst_5 : f32 to vector<8x1xf32>
    %6 = arith.divf %4, %5 : vector<8x1xf32>
    %7 = vector.broadcast %6 : vector<8x1xf32> to vector<8x32xf32>
    %8 = arith.subf %0, %7 : vector<8x32xf32>
    %9 = arith.mulf %8, %8 : vector<8x32xf32>
    %cst_6 = arith.constant dense<0.000000e+00> : vector<8xf32>
    %10 = vector.multi_reduction <add>, %9, %cst_6 [1] : vector<8x32xf32> to vector<8xf32>
    %11 = vector.shape_cast %10 : vector<8xf32> to vector<8x1xf32>
    %cst_7 = arith.constant 3.200000e+01 : f32
    %12 = vector.broadcast %cst_7 : f32 to vector<8x1xf32>
    %13 = arith.divf %11, %12 : vector<8x1xf32>
    %14 = vector.broadcast %6 : vector<8x1xf32> to vector<8x32xf32>
    %15 = arith.subf %0, %14 : vector<8x32xf32>
    %cst_8 = arith.constant 9.99999997E-7 : f32
    %16 = vector.broadcast %cst_8 : f32 to vector<8x1xf32>
    %17 = arith.addf %13, %16 : vector<8x1xf32>
    %18 = math.rsqrt %17 : vector<8x1xf32>
    %19 = vector.broadcast %18 : vector<8x1xf32> to vector<8x32xf32>
    %20 = arith.mulf %15, %19 : vector<8x32xf32>
    %21 = vector.broadcast %1 : vector<1x32xf32> to vector<8x32xf32>
    %22 = arith.mulf %20, %21 : vector<8x32xf32>
    %23 = vector.broadcast %2 : vector<1x32xf32> to vector<8x32xf32>
    %24 = arith.addf %22, %23 : vector<8x32xf32>
    %25 = arith.truncf %24 : vector<8x32xf32> to vector<8x32xbf16>
    %c0_9 = arith.constant 0 : index
    %c0_10 = arith.constant 0 : index
    %26 = vector.load %arg3[%c0_9, %c0_10] : memref<32x32xbf16, #tpu.memory_space<vmem>>, vector<32x32xbf16>
    %cst_11 = arith.constant dense<0.000000e+00> : vector<8x32xf32>
    %27 = tpu.matmul %25, %26, %cst_11 {dimension_numbers = #tpu.dot_dimension_numbers<[1], [0], [0], [1], [0, 0, 1, 1], [], []>} : vector<8x32xbf16>, vector<32x32xbf16>, vector<8x32xf32> -> vector<8x32xf32>
    %c0_12 = arith.constant 0 : index
    %c0_13 = arith.constant 0 : index
    %28 = vector.load %arg4[%c0_12, %c0_13] : memref<1x32xf32, #tpu.memory_space<vmem>>, vector<1x32xf32>
    %29 = vector.broadcast %28 : vector<1x32xf32> to vector<8x32xf32>
    %30 = arith.addf %27, %29 : vector<8x32xf32>
    %c0_14 = arith.constant 0 : index
    %c0_15 = arith.constant 0 : index
    %31 = vector.load %arg5[%c0_14, %c0_15] : memref<8x32xf32, #tpu.memory_space<vmem>>, vector<8x32xf32>
    tpu.vector_store %arg5[%c0_14, %c0_15], %30 {strides = array<i32>} : memref<8x32xf32, #tpu.memory_space<vmem>>, vector<8x32xf32>,
    return
  }
}

module attributes {stable_mosaic.version = 11 : i64} {
  func.func @_final_lmhead_kernel(%arg0: memref<16x32xf32, #tpu.memory_space<vmem>>, %arg1: memref<1x32xf32, #tpu.memory_space<vmem>>, %arg2: memref<32x64xbf16, #tpu.memory_space<vmem>>, %arg3: memref<16x64xf32, #tpu.memory_space<vmem>>) attributes {dimension_semantics = [], scalar_prefetch = 0 : i64, scratch_operands = 0 : i64, tpu.core_type = #tpu.core_type<tc>} {
    %c0 = arith.constant 0 : index
    %c0_0 = arith.constant 0 : index
    %0 = vector.load %arg0[%c0, %c0_0] : memref<16x32xf32, #tpu.memory_space<vmem>>, vector<16x32xf32>
    %c0_1 = arith.constant 0 : index
    %c0_2 = arith.constant 0 : index
    %1 = vector.load %arg1[%c0_1, %c0_2] : memref<1x32xf32, #tpu.memory_space<vmem>>, vector<1x32xf32>
    %2 = arith.mulf %0, %0 : vector<16x32xf32>
    %cst = arith.constant dense<0.000000e+00> : vector<16xf32>
    %3 = vector.multi_reduction <add>, %2, %cst [1] : vector<16x32xf32> to vector<16xf32>
    %4 = vector.shape_cast %3 : vector<16xf32> to vector<16x1xf32>
    %cst_3 = arith.constant 3.200000e+01 : f32
    %5 = vector.broadcast %cst_3 : f32 to vector<16x1xf32>
    %6 = arith.divf %4, %5 : vector<16x1xf32>
    %cst_4 = arith.constant 9.99999997E-7 : f32
    %7 = vector.broadcast %cst_4 : f32 to vector<16x1xf32>
    %8 = arith.addf %6, %7 : vector<16x1xf32>
    %9 = math.rsqrt %8 : vector<16x1xf32>
    %10 = vector.broadcast %9 : vector<16x1xf32> to vector<16x32xf32>
    %11 = arith.mulf %0, %10 : vector<16x32xf32>
    %cst_5 = arith.constant 1.000000e+00 : f32
    %12 = vector.broadcast %cst_5 : f32 to vector<1x32xf32>
    %13 = arith.addf %12, %1 : vector<1x32xf32>
    %14 = vector.broadcast %13 : vector<1x32xf32> to vector<16x32xf32>
    %15 = arith.mulf %11, %14 : vector<16x32xf32>
    %16 = arith.truncf %15 : vector<16x32xf32> to vector<16x32xbf16>
    %c0_6 = arith.constant 0 : index
    %c0_7 = arith.constant 0 : index
    %17 = vector.load %arg2[%c0_6, %c0_7] : memref<32x64xbf16, #tpu.memory_space<vmem>>, vector<32x64xbf16>
    %cst_8 = arith.constant dense<0.000000e+00> : vector<16x64xf32>
    %18 = tpu.matmul %16, %17, %cst_8 {dimension_numbers = #tpu.dot_dimension_numbers<[1], [0], [0], [1], [0, 0, 1, 1], [], []>} : vector<16x32xbf16>, vector<32x64xbf16>, vector<16x64xf32> -> vector<16x64xf32>
    %c0_9 = arith.constant 0 : index
    %c0_10 = arith.constant 0 : index
    %19 = vector.load %arg3[%c0_9, %c0_10] : memref<16x64xf32, #tpu.memory_space<vmem>>, vector<16x64xf32>
    tpu.vector_store %arg3[%c0_9, %c0_10], %18 {strides = array<i32>} : memref<16x64xf32, #tpu.memory_space<vmem>>, vector<16x64xf32>,
    return
  }
}

module attributes {stable_mosaic.version = 11 : i64} {
  func.func @_gemma_tower_kernel(%arg0: i32, %arg1: memref<16x32xf32, #tpu.memory_space<vmem>>, %arg2: memref<16x8xf32, #tpu.memory_space<vmem>>, %arg3: memref<16x8xf32, #tpu.memory_space<vmem>>, %arg4: memref<1x1x32xf32, #tpu.memory_space<vmem>>, %arg5: memref<1x32x96xbf16, #tpu.memory_space<vmem>>, %arg6: memref<1x4x8x32xbf16, #tpu.memory_space<vmem>>, %arg7: memref<1x1x32xf32, #tpu.memory_space<vmem>>, %arg8: memref<1x32x128xbf16, #tpu.memory_space<vmem>>, %arg9: memref<1x64x32xbf16, #tpu.memory_space<vmem>>, %arg10: memref<16x32xf32, #tpu.memory_space<vmem>>) attributes {dimension_semantics = [#tpu.dimension_semantics<arbitrary>], iteration_bounds = array<i64: 2>, scalar_prefetch = 0 : i64, scratch_operands = 0 : i64, tpu.core_type = #tpu.core_type<tc>, window_params = [{pipeline_mode = #tpu.pipeline_mode<synchronous>, transform_indices = @transform_0, window_bounds = array<i64: 16, 32>}, {pipeline_mode = #tpu.pipeline_mode<synchronous>, transform_indices = @transform_1, window_bounds = array<i64: 16, 8>}, {pipeline_mode = #tpu.pipeline_mode<synchronous>, transform_indices = @transform_2, window_bounds = array<i64: 16, 8>}, {transform_indices = @transform_3, window_bounds = array<i64: 1, 1, 32>}, {transform_indices = @transform_4, window_bounds = array<i64: 1, 32, 96>}, {transform_indices = @transform_5, window_bounds = array<i64: 1, 4, 8, 32>}, {transform_indices = @transform_6, window_bounds = array<i64: 1, 1, 32>}, {transform_indices = @transform_7, window_bounds = array<i64: 1, 32, 128>}, {transform_indices = @transform_8, window_bounds = array<i64: 1, 64, 32>}, {pipeline_mode = #tpu.pipeline_mode<synchronous>, transform_indices = @transform_9, window_bounds = array<i64: 16, 32>}]} {
    %c0_i32 = arith.constant 0 : i32
    %0 = arith.cmpi eq, %arg0, %c0_i32 : i32
    %1 = arith.extui %0 : i1 to i32
    %c0_i32_0 = arith.constant 0 : i32
    %2 = arith.cmpi ne, %1, %c0_i32_0 : i32
    scf.if %2 {
      %c0_74 = arith.constant 0 : index
      %c0_75 = arith.constant 0 : index
      %236 = vector.load %arg1[%c0_74, %c0_75] : memref<16x32xf32, #tpu.memory_space<vmem>>, vector<16x32xf32>
      %c0_76 = arith.constant 0 : index
      %c0_77 = arith.constant 0 : index
      %237 = vector.load %arg10[%c0_76, %c0_77] : memref<16x32xf32, #tpu.memory_space<vmem>>, vector<16x32xf32>
      tpu.vector_store %arg10[%c0_76, %c0_77], %236 {strides = array<i32>} : memref<16x32xf32, #tpu.memory_space<vmem>>, vector<16x32xf32>,
    } else {
    }
    %c0 = arith.constant 0 : index
    %c0_1 = arith.constant 0 : index
    %3 = vector.load %arg10[%c0, %c0_1] : memref<16x32xf32, #tpu.memory_space<vmem>>, vector<16x32xf32>
    %c0_2 = arith.constant 0 : index
    %c0_3 = arith.constant 0 : index
    %c0_4 = arith.constant 0 : index
    %4 = vector.load %arg4[%c0_2, %c0_3, %c0_4] : memref<1x1x32xf32, #tpu.memory_space<vmem>>, vector<1x1x32xf32>
    %5 = vector.shape_cast %4 : vector<1x1x32xf32> to vector<1x32xf32>
    %6 = arith.mulf %3, %3 : vector<16x32xf32>
    %cst = arith.constant dense<0.000000e+00> : vector<16xf32>
    %7 = vector.multi_reduction <add>, %6, %cst [1] : vector<16x32xf32> to vector<16xf32>
    %8 = vector.shape_cast %7 : vector<16xf32> to vector<16x1xf32>
    %cst_5 = arith.constant 3.200000e+01 : f32
    %9 = vector.broadcast %cst_5 : f32 to vector<16x1xf32>
    %10 = arith.divf %8, %9 : vector<16x1xf32>
    %cst_6 = arith.constant 9.99999997E-7 : f32
    %11 = vector.broadcast %cst_6 : f32 to vector<16x1xf32>
    %12 = arith.addf %10, %11 : vector<16x1xf32>
    %13 = math.rsqrt %12 : vector<16x1xf32>
    %14 = vector.broadcast %13 : vector<16x1xf32> to vector<16x32xf32>
    %15 = arith.mulf %3, %14 : vector<16x32xf32>
    %cst_7 = arith.constant 1.000000e+00 : f32
    %16 = vector.broadcast %cst_7 : f32 to vector<1x32xf32>
    %17 = arith.addf %16, %5 : vector<1x32xf32>
    %18 = vector.broadcast %17 : vector<1x32xf32> to vector<16x32xf32>
    %19 = arith.mulf %15, %18 : vector<16x32xf32>
    %20 = arith.truncf %19 : vector<16x32xf32> to vector<16x32xbf16>
    %c0_8 = arith.constant 0 : index
    %c0_9 = arith.constant 0 : index
    %c0_10 = arith.constant 0 : index
    %21 = vector.load %arg5[%c0_8, %c0_9, %c0_10] : memref<1x32x96xbf16, #tpu.memory_space<vmem>>, vector<1x32x96xbf16>
    %22 = vector.shape_cast %21 : vector<1x32x96xbf16> to vector<32x96xbf16>
    %cst_11 = arith.constant dense<0.000000e+00> : vector<16x96xf32>
    %23 = tpu.matmul %20, %22, %cst_11 {dimension_numbers = #tpu.dot_dimension_numbers<[1], [0], [0], [1], [0, 0, 1, 1], [], []>} : vector<16x32xbf16>, vector<32x96xbf16>, vector<16x96xf32> -> vector<16x96xf32>
    %c0_12 = arith.constant 0 : index
    %c0_13 = arith.constant 0 : index
    %24 = vector.load %arg2[%c0_12, %c0_13] : memref<16x8xf32, #tpu.memory_space<vmem>>, vector<16x8xf32>
    %c0_14 = arith.constant 0 : index
    %c0_15 = arith.constant 0 : index
    %25 = vector.load %arg3[%c0_14, %c0_15] : memref<16x8xf32, #tpu.memory_space<vmem>>, vector<16x8xf32>
    %26 = vector.extract_strided_slice %23 {offsets = [0, 0], sizes = [16, 8], strides = [1, 1]} : vector<16x96xf32> to vector<16x8xf32>
    %27 = vector.extract_strided_slice %23 {offsets = [0, 32], sizes = [16, 8], strides = [1, 1]} : vector<16x96xf32> to vector<16x8xf32>
    %28 = vector.extract_strided_slice %23 {offsets = [0, 64], sizes = [16, 8], strides = [1, 1]} : vector<16x96xf32> to vector<16x8xf32>
    %29 = arith.mulf %26, %24 : vector<16x8xf32>
    %30 = vector.extract_strided_slice %26 {offsets = [0, 4], sizes = [16, 4], strides = [1, 1]} : vector<16x8xf32> to vector<16x4xf32>
    %31 = vector.extract_strided_slice %26 {offsets = [0, 0], sizes = [16, 4], strides = [1, 1]} : vector<16x8xf32> to vector<16x4xf32>
    %32 = tpu.concatenate %30, %31 in 1 : vector<16x4xf32>, vector<16x4xf32> -> vector<16x8xf32>
    %33 = arith.mulf %32, %25 : vector<16x8xf32>
    %34 = arith.addf %29, %33 : vector<16x8xf32>
    %35 = arith.mulf %27, %24 : vector<16x8xf32>
    %36 = vector.extract_strided_slice %27 {offsets = [0, 4], sizes = [16, 4], strides = [1, 1]} : vector<16x8xf32> to vector<16x4xf32>
    %37 = vector.extract_strided_slice %27 {offsets = [0, 0], sizes = [16, 4], strides = [1, 1]} : vector<16x8xf32> to vector<16x4xf32>
    %38 = tpu.concatenate %36, %37 in 1 : vector<16x4xf32>, vector<16x4xf32> -> vector<16x8xf32>
    %39 = arith.mulf %38, %25 : vector<16x8xf32>
    %40 = arith.addf %35, %39 : vector<16x8xf32>
    %41 = vector.shape_cast %34 : vector<16x8xf32> to vector<2x8x8xf32>
    %42 = arith.truncf %41 : vector<2x8x8xf32> to vector<2x8x8xbf16>
    %43 = vector.shape_cast %40 : vector<16x8xf32> to vector<2x8x8xf32>
    %44 = arith.truncf %43 : vector<2x8x8xf32> to vector<2x8x8xbf16>
    %45 = vector.shape_cast %28 : vector<16x8xf32> to vector<2x8x8xf32>
    %46 = arith.truncf %45 : vector<2x8x8xf32> to vector<2x8x8xbf16>
    "tpu.trace_start"() <{level = 10 : i32, message = "bqd,bkd->bqk"}> : () -> ()
    %cst_16 = arith.constant dense<0.000000e+00> : vector<2x8x8xf32>
    %47 = tpu.matmul %42, %44, %cst_16 {dimension_numbers = #tpu.dot_dimension_numbers<[2], [2], [1], [1], [0, 0, 0, 1, 1, 1], [0], [0]>} : vector<2x8x8xbf16>, vector<2x8x8xbf16>, vector<2x8x8xf32> -> vector<2x8x8xf32>
    "tpu.trace_stop"() : () -> ()
    %cst_17 = arith.constant 0.353553385 : f32
    %48 = vector.broadcast %cst_17 : f32 to vector<2x8x8xf32>
    %49 = arith.mulf %47, %48 : vector<2x8x8xf32>
    %cst_18 = arith.constant dense<0xFF800000> : vector<2x8xf32>
    %50 = vector.multi_reduction <maximumf>, %49, %cst_18 [2] : vector<2x8x8xf32> to vector<2x8xf32>
    %51 = vector.shape_cast %50 : vector<2x8xf32> to vector<2x8x1xf32>
    %52 = vector.broadcast %51 : vector<2x8x1xf32> to vector<2x8x8xf32>
    %53 = arith.subf %49, %52 : vector<2x8x8xf32>
    %54 = math.exp %53 : vector<2x8x8xf32>
    %cst_19 = arith.constant dense<0.000000e+00> : vector<2x8xf32>
    %55 = vector.multi_reduction <add>, %54, %cst_19 [2] : vector<2x8x8xf32> to vector<2x8xf32>
    %56 = vector.shape_cast %55 : vector<2x8xf32> to vector<2x8x1xf32>
    %57 = tpu.reciprocal %56 {approx = true} : vector<2x8x1xf32> -> vector<2x8x1xf32>
    %58 = vector.broadcast %57 : vector<2x8x1xf32> to vector<2x8x8xf32>
    %59 = arith.mulf %54, %58 : vector<2x8x8xf32>
    %60 = arith.truncf %59 : vector<2x8x8xf32> to vector<2x8x8xbf16>
    "tpu.trace_start"() <{level = 10 : i32, message = "bqk,bkd->bqd"}> : () -> ()
    %cst_20 = arith.constant dense<0.000000e+00> : vector<2x8x8xf32>
    %61 = tpu.matmul %60, %46, %cst_20 {dimension_numbers = #tpu.dot_dimension_numbers<[2], [1], [1], [2], [0, 0, 0, 1, 1, 2], [0], [0]>} : vector<2x8x8xbf16>, vector<2x8x8xbf16>, vector<2x8x8xf32> -> vector<2x8x8xf32>
    "tpu.trace_stop"() : () -> ()
    %62 = vector.shape_cast %61 : vector<2x8x8xf32> to vector<16x8xf32>
    %63 = arith.truncf %62 : vector<16x8xf32> to vector<16x8xbf16>
    %c0_21 = arith.constant 0 : index
    %c0_22 = arith.constant 0 : index
    %c0_23 = arith.constant 0 : index
    %c0_24 = arith.constant 0 : index
    %64 = vector.load %arg6[%c0_21, %c0_22, %c0_23, %c0_24] : memref<1x4x8x32xbf16, #tpu.memory_space<vmem>>, vector<1x1x8x32xbf16>
    %65 = vector.shape_cast %64 : vector<1x1x8x32xbf16> to vector<8x32xbf16>
    %cst_25 = arith.constant dense<0.000000e+00> : vector<16x32xf32>
    %66 = tpu.matmul %63, %65, %cst_25 {dimension_numbers = #tpu.dot_dimension_numbers<[1], [0], [0], [1], [0, 0, 1, 1], [], []>} : vector<16x8xbf16>, vector<8x32xbf16>, vector<16x32xf32> -> vector<16x32xf32>
    %67 = arith.addf %3, %66 : vector<16x32xf32>
    %68 = vector.extract_strided_slice %23 {offsets = [0, 8], sizes = [16, 8], strides = [1, 1]} : vector<16x96xf32> to vector<16x8xf32>
    %69 = vector.extract_strided_slice %23 {offsets = [0, 40], sizes = [16, 8], strides = [1, 1]} : vector<16x96xf32> to vector<16x8xf32>
    %70 = vector.extract_strided_slice %23 {offsets = [0, 72], sizes = [16, 8], strides = [1, 1]} : vector<16x96xf32> to vector<16x8xf32>
    %71 = arith.mulf %68, %24 : vector<16x8xf32>
    %72 = vector.extract_strided_slice %68 {offsets = [0, 4], sizes = [16, 4], strides = [1, 1]} : vector<16x8xf32> to vector<16x4xf32>
    %73 = vector.extract_strided_slice %68 {offsets = [0, 0], sizes = [16, 4], strides = [1, 1]} : vector<16x8xf32> to vector<16x4xf32>
    %74 = tpu.concatenate %72, %73 in 1 : vector<16x4xf32>, vector<16x4xf32> -> vector<16x8xf32>
    %75 = arith.mulf %74, %25 : vector<16x8xf32>
    %76 = arith.addf %71, %75 : vector<16x8xf32>
    %77 = arith.mulf %69, %24 : vector<16x8xf32>
    %78 = vector.extract_strided_slice %69 {offsets = [0, 4], sizes = [16, 4], strides = [1, 1]} : vector<16x8xf32> to vector<16x4xf32>
    %79 = vector.extract_strided_slice %69 {offsets = [0, 0], sizes = [16, 4], strides = [1, 1]} : vector<16x8xf32> to vector<16x4xf32>
    %80 = tpu.concatenate %78, %79 in 1 : vector<16x4xf32>, vector<16x4xf32> -> vector<16x8xf32>
    %81 = arith.mulf %80, %25 : vector<16x8xf32>
    %82 = arith.addf %77, %81 : vector<16x8xf32>
    %83 = vector.shape_cast %76 : vector<16x8xf32> to vector<2x8x8xf32>
    %84 = arith.truncf %83 : vector<2x8x8xf32> to vector<2x8x8xbf16>
    %85 = vector.shape_cast %82 : vector<16x8xf32> to vector<2x8x8xf32>
    %86 = arith.truncf %85 : vector<2x8x8xf32> to vector<2x8x8xbf16>
    %87 = vector.shape_cast %70 : vector<16x8xf32> to vector<2x8x8xf32>
    %88 = arith.truncf %87 : vector<2x8x8xf32> to vector<2x8x8xbf16>
    "tpu.trace_start"() <{level = 10 : i32, message = "bqd,bkd->bqk"}> : () -> ()
    %cst_26 = arith.constant dense<0.000000e+00> : vector<2x8x8xf32>
    %89 = tpu.matmul %84, %86, %cst_26 {dimension_numbers = #tpu.dot_dimension_numbers<[2], [2], [1], [1], [0, 0, 0, 1, 1, 1], [0], [0]>} : vector<2x8x8xbf16>, vector<2x8x8xbf16>, vector<2x8x8xf32> -> vector<2x8x8xf32>
    "tpu.trace_stop"() : () -> ()
    %cst_27 = arith.constant 0.353553385 : f32
    %90 = vector.broadcast %cst_27 : f32 to vector<2x8x8xf32>
    %91 = arith.mulf %89, %90 : vector<2x8x8xf32>
    %cst_28 = arith.constant dense<0xFF800000> : vector<2x8xf32>
    %92 = vector.multi_reduction <maximumf>, %91, %cst_28 [2] : vector<2x8x8xf32> to vector<2x8xf32>
    %93 = vector.shape_cast %92 : vector<2x8xf32> to vector<2x8x1xf32>
    %94 = vector.broadcast %93 : vector<2x8x1xf32> to vector<2x8x8xf32>
    %95 = arith.subf %91, %94 : vector<2x8x8xf32>
    %96 = math.exp %95 : vector<2x8x8xf32>
    %cst_29 = arith.constant dense<0.000000e+00> : vector<2x8xf32>
    %97 = vector.multi_reduction <add>, %96, %cst_29 [2] : vector<2x8x8xf32> to vector<2x8xf32>
    %98 = vector.shape_cast %97 : vector<2x8xf32> to vector<2x8x1xf32>
    %99 = tpu.reciprocal %98 {approx = true} : vector<2x8x1xf32> -> vector<2x8x1xf32>
    %100 = vector.broadcast %99 : vector<2x8x1xf32> to vector<2x8x8xf32>
    %101 = arith.mulf %96, %100 : vector<2x8x8xf32>
    %102 = arith.truncf %101 : vector<2x8x8xf32> to vector<2x8x8xbf16>
    "tpu.trace_start"() <{level = 10 : i32, message = "bqk,bkd->bqd"}> : () -> ()
    %cst_30 = arith.constant dense<0.000000e+00> : vector<2x8x8xf32>
    %103 = tpu.matmul %102, %88, %cst_30 {dimension_numbers = #tpu.dot_dimension_numbers<[2], [1], [1], [2], [0, 0, 0, 1, 1, 2], [0], [0]>} : vector<2x8x8xbf16>, vector<2x8x8xbf16>, vector<2x8x8xf32> -> vector<2x8x8xf32>
    "tpu.trace_stop"() : () -> ()
    %104 = vector.shape_cast %103 : vector<2x8x8xf32> to vector<16x8xf32>
    %105 = arith.truncf %104 : vector<16x8xf32> to vector<16x8xbf16>
    %c0_31 = arith.constant 0 : index
    %c1 = arith.constant 1 : index
    %c0_32 = arith.constant 0 : index
    %c0_33 = arith.constant 0 : index
    %106 = vector.load %arg6[%c0_31, %c1, %c0_32, %c0_33] : memref<1x4x8x32xbf16, #tpu.memory_space<vmem>>, vector<1x1x8x32xbf16>
    %107 = vector.shape_cast %106 : vector<1x1x8x32xbf16> to vector<8x32xbf16>
    %cst_34 = arith.constant dense<0.000000e+00> : vector<16x32xf32>
    %108 = tpu.matmul %105, %107, %cst_34 {dimension_numbers = #tpu.dot_dimension_numbers<[1], [0], [0], [1], [0, 0, 1, 1], [], []>} : vector<16x8xbf16>, vector<8x32xbf16>, vector<16x32xf32> -> vector<16x32xf32>
    %109 = arith.addf %67, %108 : vector<16x32xf32>
    %110 = vector.extract_strided_slice %23 {offsets = [0, 16], sizes = [16, 8], strides = [1, 1]} : vector<16x96xf32> to vector<16x8xf32>
    %111 = vector.extract_strided_slice %23 {offsets = [0, 48], sizes = [16, 8], strides = [1, 1]} : vector<16x96xf32> to vector<16x8xf32>
    %112 = vector.extract_strided_slice %23 {offsets = [0, 80], sizes = [16, 8], strides = [1, 1]} : vector<16x96xf32> to vector<16x8xf32>
    %113 = arith.mulf %110, %24 : vector<16x8xf32>
    %114 = vector.extract_strided_slice %110 {offsets = [0, 4], sizes = [16, 4], strides = [1, 1]} : vector<16x8xf32> to vector<16x4xf32>
    %115 = vector.extract_strided_slice %110 {offsets = [0, 0], sizes = [16, 4], strides = [1, 1]} : vector<16x8xf32> to vector<16x4xf32>
    %116 = tpu.concatenate %114, %115 in 1 : vector<16x4xf32>, vector<16x4xf32> -> vector<16x8xf32>
    %117 = arith.mulf %116, %25 : vector<16x8xf32>
    %118 = arith.addf %113, %117 : vector<16x8xf32>
    %119 = arith.mulf %111, %24 : vector<16x8xf32>
    %120 = vector.extract_strided_slice %111 {offsets = [0, 4], sizes = [16, 4], strides = [1, 1]} : vector<16x8xf32> to vector<16x4xf32>
    %121 = vector.extract_strided_slice %111 {offsets = [0, 0], sizes = [16, 4], strides = [1, 1]} : vector<16x8xf32> to vector<16x4xf32>
    %122 = tpu.concatenate %120, %121 in 1 : vector<16x4xf32>, vector<16x4xf32> -> vector<16x8xf32>
    %123 = arith.mulf %122, %25 : vector<16x8xf32>
    %124 = arith.addf %119, %123 : vector<16x8xf32>
    %125 = vector.shape_cast %118 : vector<16x8xf32> to vector<2x8x8xf32>
    %126 = arith.truncf %125 : vector<2x8x8xf32> to vector<2x8x8xbf16>
    %127 = vector.shape_cast %124 : vector<16x8xf32> to vector<2x8x8xf32>
    %128 = arith.truncf %127 : vector<2x8x8xf32> to vector<2x8x8xbf16>
    %129 = vector.shape_cast %112 : vector<16x8xf32> to vector<2x8x8xf32>
    %130 = arith.truncf %129 : vector<2x8x8xf32> to vector<2x8x8xbf16>
    "tpu.trace_start"() <{level = 10 : i32, message = "bqd,bkd->bqk"}> : () -> ()
    %cst_35 = arith.constant dense<0.000000e+00> : vector<2x8x8xf32>
    %131 = tpu.matmul %126, %128, %cst_35 {dimension_numbers = #tpu.dot_dimension_numbers<[2], [2], [1], [1], [0, 0, 0, 1, 1, 1], [0], [0]>} : vector<2x8x8xbf16>, vector<2x8x8xbf16>, vector<2x8x8xf32> -> vector<2x8x8xf32>
    "tpu.trace_stop"() : () -> ()
    %cst_36 = arith.constant 0.353553385 : f32
    %132 = vector.broadcast %cst_36 : f32 to vector<2x8x8xf32>
    %133 = arith.mulf %131, %132 : vector<2x8x8xf32>
    %cst_37 = arith.constant dense<0xFF800000> : vector<2x8xf32>
    %134 = vector.multi_reduction <maximumf>, %133, %cst_37 [2] : vector<2x8x8xf32> to vector<2x8xf32>
    %135 = vector.shape_cast %134 : vector<2x8xf32> to vector<2x8x1xf32>
    %136 = vector.broadcast %135 : vector<2x8x1xf32> to vector<2x8x8xf32>
    %137 = arith.subf %133, %136 : vector<2x8x8xf32>
    %138 = math.exp %137 : vector<2x8x8xf32>
    %cst_38 = arith.constant dense<0.000000e+00> : vector<2x8xf32>
    %139 = vector.multi_reduction <add>, %138, %cst_38 [2] : vector<2x8x8xf32> to vector<2x8xf32>
    %140 = vector.shape_cast %139 : vector<2x8xf32> to vector<2x8x1xf32>
    %141 = tpu.reciprocal %140 {approx = true} : vector<2x8x1xf32> -> vector<2x8x1xf32>
    %142 = vector.broadcast %141 : vector<2x8x1xf32> to vector<2x8x8xf32>
    %143 = arith.mulf %138, %142 : vector<2x8x8xf32>
    %144 = arith.truncf %143 : vector<2x8x8xf32> to vector<2x8x8xbf16>
    "tpu.trace_start"() <{level = 10 : i32, message = "bqk,bkd->bqd"}> : () -> ()
    %cst_39 = arith.constant dense<0.000000e+00> : vector<2x8x8xf32>
    %145 = tpu.matmul %144, %130, %cst_39 {dimension_numbers = #tpu.dot_dimension_numbers<[2], [1], [1], [2], [0, 0, 0, 1, 1, 2], [0], [0]>} : vector<2x8x8xbf16>, vector<2x8x8xbf16>, vector<2x8x8xf32> -> vector<2x8x8xf32>
    "tpu.trace_stop"() : () -> ()
    %146 = vector.shape_cast %145 : vector<2x8x8xf32> to vector<16x8xf32>
    %147 = arith.truncf %146 : vector<16x8xf32> to vector<16x8xbf16>
    %c0_40 = arith.constant 0 : index
    %c2 = arith.constant 2 : index
    %c0_41 = arith.constant 0 : index
    %c0_42 = arith.constant 0 : index
    %148 = vector.load %arg6[%c0_40, %c2, %c0_41, %c0_42] : memref<1x4x8x32xbf16, #tpu.memory_space<vmem>>, vector<1x1x8x32xbf16>
    %149 = vector.shape_cast %148 : vector<1x1x8x32xbf16> to vector<8x32xbf16>
    %cst_43 = arith.constant dense<0.000000e+00> : vector<16x32xf32>
    %150 = tpu.matmul %147, %149, %cst_43 {dimension_numbers = #tpu.dot_dimension_numbers<[1], [0], [0], [1], [0, 0, 1, 1], [], []>} : vector<16x8xbf16>, vector<8x32xbf16>, vector<16x32xf32> -> vector<16x32xf32>
    %151 = arith.addf %109, %150 : vector<16x32xf32>
    %152 = vector.extract_strided_slice %23 {offsets = [0, 24], sizes = [16, 8], strides = [1, 1]} : vector<16x96xf32> to vector<16x8xf32>
    %153 = vector.extract_strided_slice %23 {offsets = [0, 56], sizes = [16, 8], strides = [1, 1]} : vector<16x96xf32> to vector<16x8xf32>
    %154 = vector.extract_strided_slice %23 {offsets = [0, 88], sizes = [16, 8], strides = [1, 1]} : vector<16x96xf32> to vector<16x8xf32>
    %155 = arith.mulf %152, %24 : vector<16x8xf32>
    %156 = vector.extract_strided_slice %152 {offsets = [0, 4], sizes = [16, 4], strides = [1, 1]} : vector<16x8xf32> to vector<16x4xf32>
    %157 = vector.extract_strided_slice %152 {offsets = [0, 0], sizes = [16, 4], strides = [1, 1]} : vector<16x8xf32> to vector<16x4xf32>
    %158 = tpu.concatenate %156, %157 in 1 : vector<16x4xf32>, vector<16x4xf32> -> vector<16x8xf32>
    %159 = arith.mulf %158, %25 : vector<16x8xf32>
    %160 = arith.addf %155, %159 : vector<16x8xf32>
    %161 = arith.mulf %153, %24 : vector<16x8xf32>
    %162 = vector.extract_strided_slice %153 {offsets = [0, 4], sizes = [16, 4], strides = [1, 1]} : vector<16x8xf32> to vector<16x4xf32>
    %163 = vector.extract_strided_slice %153 {offsets = [0, 0], sizes = [16, 4], strides = [1, 1]} : vector<16x8xf32> to vector<16x4xf32>
    %164 = tpu.concatenate %162, %163 in 1 : vector<16x4xf32>, vector<16x4xf32> -> vector<16x8xf32>
    %165 = arith.mulf %164, %25 : vector<16x8xf32>
    %166 = arith.addf %161, %165 : vector<16x8xf32>
    %167 = vector.shape_cast %160 : vector<16x8xf32> to vector<2x8x8xf32>
    %168 = arith.truncf %167 : vector<2x8x8xf32> to vector<2x8x8xbf16>
    %169 = vector.shape_cast %166 : vector<16x8xf32> to vector<2x8x8xf32>
    %170 = arith.truncf %169 : vector<2x8x8xf32> to vector<2x8x8xbf16>
    %171 = vector.shape_cast %154 : vector<16x8xf32> to vector<2x8x8xf32>
    %172 = arith.truncf %171 : vector<2x8x8xf32> to vector<2x8x8xbf16>
    "tpu.trace_start"() <{level = 10 : i32, message = "bqd,bkd->bqk"}> : () -> ()
    %cst_44 = arith.constant dense<0.000000e+00> : vector<2x8x8xf32>
    %173 = tpu.matmul %168, %170, %cst_44 {dimension_numbers = #tpu.dot_dimension_numbers<[2], [2], [1], [1], [0, 0, 0, 1, 1, 1], [0], [0]>} : vector<2x8x8xbf16>, vector<2x8x8xbf16>, vector<2x8x8xf32> -> vector<2x8x8xf32>
    "tpu.trace_stop"() : () -> ()
    %cst_45 = arith.constant 0.353553385 : f32
    %174 = vector.broadcast %cst_45 : f32 to vector<2x8x8xf32>
    %175 = arith.mulf %173, %174 : vector<2x8x8xf32>
    %cst_46 = arith.constant dense<0xFF800000> : vector<2x8xf32>
    %176 = vector.multi_reduction <maximumf>, %175, %cst_46 [2] : vector<2x8x8xf32> to vector<2x8xf32>
    %177 = vector.shape_cast %176 : vector<2x8xf32> to vector<2x8x1xf32>
    %178 = vector.broadcast %177 : vector<2x8x1xf32> to vector<2x8x8xf32>
    %179 = arith.subf %175, %178 : vector<2x8x8xf32>
    %180 = math.exp %179 : vector<2x8x8xf32>
    %cst_47 = arith.constant dense<0.000000e+00> : vector<2x8xf32>
    %181 = vector.multi_reduction <add>, %180, %cst_47 [2] : vector<2x8x8xf32> to vector<2x8xf32>
    %182 = vector.shape_cast %181 : vector<2x8xf32> to vector<2x8x1xf32>
    %183 = tpu.reciprocal %182 {approx = true} : vector<2x8x1xf32> -> vector<2x8x1xf32>
    %184 = vector.broadcast %183 : vector<2x8x1xf32> to vector<2x8x8xf32>
    %185 = arith.mulf %180, %184 : vector<2x8x8xf32>
    %186 = arith.truncf %185 : vector<2x8x8xf32> to vector<2x8x8xbf16>
    "tpu.trace_start"() <{level = 10 : i32, message = "bqk,bkd->bqd"}> : () -> ()
    %cst_48 = arith.constant dense<0.000000e+00> : vector<2x8x8xf32>
    %187 = tpu.matmul %186, %172, %cst_48 {dimension_numbers = #tpu.dot_dimension_numbers<[2], [1], [1], [2], [0, 0, 0, 1, 1, 2], [0], [0]>} : vector<2x8x8xbf16>, vector<2x8x8xbf16>, vector<2x8x8xf32> -> vector<2x8x8xf32>
    "tpu.trace_stop"() : () -> ()
    %188 = vector.shape_cast %187 : vector<2x8x8xf32> to vector<16x8xf32>
    %189 = arith.truncf %188 : vector<16x8xf32> to vector<16x8xbf16>
    %c0_49 = arith.constant 0 : index
    %c3 = arith.constant 3 : index
    %c0_50 = arith.constant 0 : index
    %c0_51 = arith.constant 0 : index
    %190 = vector.load %arg6[%c0_49, %c3, %c0_50, %c0_51] : memref<1x4x8x32xbf16, #tpu.memory_space<vmem>>, vector<1x1x8x32xbf16>
    %191 = vector.shape_cast %190 : vector<1x1x8x32xbf16> to vector<8x32xbf16>
    %cst_52 = arith.constant dense<0.000000e+00> : vector<16x32xf32>
    %192 = tpu.matmul %189, %191, %cst_52 {dimension_numbers = #tpu.dot_dimension_numbers<[1], [0], [0], [1], [0, 0, 1, 1], [], []>} : vector<16x8xbf16>, vector<8x32xbf16>, vector<16x32xf32> -> vector<16x32xf32>
    %193 = arith.addf %151, %192 : vector<16x32xf32>
    %c0_53 = arith.constant 0 : index
    %c0_54 = arith.constant 0 : index
    %c0_55 = arith.constant 0 : index
    %194 = vector.load %arg7[%c0_53, %c0_54, %c0_55] : memref<1x1x32xf32, #tpu.memory_space<vmem>>, vector<1x1x32xf32>
    %195 = vector.shape_cast %194 : vector<1x1x32xf32> to vector<1x32xf32>
    %196 = arith.mulf %193, %193 : vector<16x32xf32>
    %cst_56 = arith.constant dense<0.000000e+00> : vector<16xf32>
    %197 = vector.multi_reduction <add>, %196, %cst_56 [1] : vector<16x32xf32> to vector<16xf32>
    %198 = vector.shape_cast %197 : vector<16xf32> to vector<16x1xf32>
    %cst_57 = arith.constant 3.200000e+01 : f32
    %199 = vector.broadcast %cst_57 : f32 to vector<16x1xf32>
    %200 = arith.divf %198, %199 : vector<16x1xf32>
    %cst_58 = arith.constant 9.99999997E-7 : f32
    %201 = vector.broadcast %cst_58 : f32 to vector<16x1xf32>
    %202 = arith.addf %200, %201 : vector<16x1xf32>
    %203 = math.rsqrt %202 : vector<16x1xf32>
    %204 = vector.broadcast %203 : vector<16x1xf32> to vector<16x32xf32>
    %205 = arith.mulf %193, %204 : vector<16x32xf32>
    %cst_59 = arith.constant 1.000000e+00 : f32
    %206 = vector.broadcast %cst_59 : f32 to vector<1x32xf32>
    %207 = arith.addf %206, %195 : vector<1x32xf32>
    %208 = vector.broadcast %207 : vector<1x32xf32> to vector<16x32xf32>
    %209 = arith.mulf %205, %208 : vector<16x32xf32>
    %210 = arith.truncf %209 : vector<16x32xf32> to vector<16x32xbf16>
    %c0_60 = arith.constant 0 : index
    %c0_61 = arith.constant 0 : index
    %c0_62 = arith.constant 0 : index
    %211 = vector.load %arg8[%c0_60, %c0_61, %c0_62] : memref<1x32x128xbf16, #tpu.memory_space<vmem>>, vector<1x32x128xbf16>
    %212 = vector.shape_cast %211 : vector<1x32x128xbf16> to vector<32x128xbf16>
    %cst_63 = arith.constant dense<0.000000e+00> : vector<16x128xf32>
    %213 = tpu.matmul %210, %212, %cst_63 {dimension_numbers = #tpu.dot_dimension_numbers<[1], [0], [0], [1], [0, 0, 1, 1], [], []>} : vector<16x32xbf16>, vector<32x128xbf16>, vector<16x128xf32> -> vector<16x128xf32>
    %214 = vector.extract_strided_slice %213 {offsets = [0, 0], sizes = [16, 64], strides = [1, 1]} : vector<16x128xf32> to vector<16x64xf32>
    %215 = arith.mulf %214, %214 : vector<16x64xf32>
    %216 = arith.mulf %214, %215 : vector<16x64xf32>
    %cst_64 = arith.constant 4.471500e-02 : f32
    %217 = vector.broadcast %cst_64 : f32 to vector<16x64xf32>
    %218 = arith.mulf %217, %216 : vector<16x64xf32>
    %219 = arith.addf %214, %218 : vector<16x64xf32>
    %cst_65 = arith.constant 0.797884583 : f32
    %220 = vector.broadcast %cst_65 : f32 to vector<16x64xf32>
    %221 = arith.mulf %220, %219 : vector<16x64xf32>
    %222 = math.tanh %221 : vector<16x64xf32>
    %cst_66 = arith.constant 1.000000e+00 : f32
    %223 = vector.broadcast %cst_66 : f32 to vector<16x64xf32>
    %224 = arith.addf %223, %222 : vector<16x64xf32>
    %cst_67 = arith.constant 5.000000e-01 : f32
    %225 = vector.broadcast %cst_67 : f32 to vector<16x64xf32>
    %226 = arith.mulf %225, %224 : vector<16x64xf32>
    %227 = arith.mulf %214, %226 : vector<16x64xf32>
    %228 = vector.extract_strided_slice %213 {offsets = [0, 64], sizes = [16, 64], strides = [1, 1]} : vector<16x128xf32> to vector<16x64xf32>
    %229 = arith.mulf %227, %228 : vector<16x64xf32>
    %230 = arith.truncf %229 : vector<16x64xf32> to vector<16x64xbf16>
    %c0_68 = arith.constant 0 : index
    %c0_69 = arith.constant 0 : index
    %c0_70 = arith.constant 0 : index
    %231 = vector.load %arg9[%c0_68, %c0_69, %c0_70] : memref<1x64x32xbf16, #tpu.memory_space<vmem>>, vector<1x64x32xbf16>
    %232 = vector.shape_cast %231 : vector<1x64x32xbf16> to vector<64x32xbf16>
    %cst_71 = arith.constant dense<0.000000e+00> : vector<16x32xf32>
    %233 = tpu.matmul %230, %232, %cst_71 {dimension_numbers = #tpu.dot_dimension_numbers<[1], [0], [0], [1], [0, 0, 1, 1], [], []>} : vector<16x64xbf16>, vector<64x32xbf16>, vector<16x32xf32> -> vector<16x32xf32>
    %234 = arith.addf %193, %233 : vector<16x32xf32>
    %c0_72 = arith.constant 0 : index
    %c0_73 = arith.constant 0 : index
    %235 = vector.load %arg10[%c0_72, %c0_73] : memref<16x32xf32, #tpu.memory_space<vmem>>, vector<16x32xf32>
    tpu.vector_store %arg10[%c0_72, %c0_73], %234 {strides = array<i32>} : memref<16x32xf32, #tpu.memory_space<vmem>>, vector<16x32xf32>,
    return
  }
  func.func @transform_0(%arg0: i32) -> (i32, i32) {
    %c0_i32 = arith.constant 0 : i32
    %c0_i32_0 = arith.constant 0 : i32
    %c0_i32_1 = arith.constant 0 : i32
    return %c0_i32, %c0_i32_0 : i32, i32
  }
  func.func @transform_1(%arg0: i32) -> (i32, i32) {
    %c0_i32 = arith.constant 0 : i32
    %c0_i32_0 = arith.constant 0 : i32
    %c0_i32_1 = arith.constant 0 : i32
    return %c0_i32, %c0_i32_0 : i32, i32
  }
  func.func @transform_2(%arg0: i32) -> (i32, i32) {
    %c0_i32 = arith.constant 0 : i32
    %c0_i32_0 = arith.constant 0 : i32
    %c0_i32_1 = arith.constant 0 : i32
    return %c0_i32, %c0_i32_0 : i32, i32
  }
  func.func @transform_3(%arg0: i32) -> (i32, i32, i32) {
    %c0_i32 = arith.constant 0 : i32
    %c0_i32_0 = arith.constant 0 : i32
    %c0_i32_1 = arith.constant 0 : i32
    return %arg0, %c0_i32, %c0_i32_0 : i32, i32, i32
  }
  func.func @transform_4(%arg0: i32) -> (i32, i32, i32) {
    %c0_i32 = arith.constant 0 : i32
    %c0_i32_0 = arith.constant 0 : i32
    %c0_i32_1 = arith.constant 0 : i32
    return %arg0, %c0_i32, %c0_i32_0 : i32, i32, i32
  }
  func.func @transform_5(%arg0: i32) -> (i32, i32, i32, i32) {
    %c0_i32 = arith.constant 0 : i32
    %c0_i32_0 = arith.constant 0 : i32
    %c0_i32_1 = arith.constant 0 : i32
    %c0_i32_2 = arith.constant 0 : i32
    return %arg0, %c0_i32, %c0_i32_0, %c0_i32_1 : i32, i32, i32, i32
  }
  func.func @transform_6(%arg0: i32) -> (i32, i32, i32) {
    %c0_i32 = arith.constant 0 : i32
    %c0_i32_0 = arith.constant 0 : i32
    %c0_i32_1 = arith.constant 0 : i32
    return %arg0, %c0_i32, %c0_i32_0 : i32, i32, i32
  }
  func.func @transform_7(%arg0: i32) -> (i32, i32, i32) {
    %c0_i32 = arith.constant 0 : i32
    %c0_i32_0 = arith.constant 0 : i32
    %c0_i32_1 = arith.constant 0 : i32
    return %arg0, %c0_i32, %c0_i32_0 : i32, i32, i32
  }
  func.func @transform_8(%arg0: i32) -> (i32, i32, i32) {
    %c0_i32 = arith.constant 0 : i32
    %c0_i32_0 = arith.constant 0 : i32
    %c0_i32_1 = arith.constant 0 : i32
    return %arg0, %c0_i32, %c0_i32_0 : i32, i32, i32
  }
  func.func @transform_9(%arg0: i32) -> (i32, i32) {
    %c0_i32 = arith.constant 0 : i32
    %c0_i32_0 = arith.constant 0 : i32
    %c0_i32_1 = arith.constant 0 : i32
    return %c0_i32, %c0_i32_0 : i32, i32
  }
}

</mosaic_0001>

<bundles_post_ra>
// kernel: paligemma_forward.5
= control target key start
LH: loop header
LB: loop body
LE: loop exit
PB: predicated region body
PF: predicated region fallthrough
CT: control target
= control target key end

     0   :  { %v204_v0 = vmov 0   ;;  %vm125_vm0 = vcmask 523264   ;;  %vm171_vm1 = vcmask 261120   ;;  %s281_s1 = inlined_call_operand.vmem [shape: bf16[192,32], index: 1, kind: input, shape index: {}]   ;;  %s282_s0 = inlined_call_operand.vmem [shape: f32[8,192], index: 0, kind: input, shape index: {}]   ;;  %s283_s2 = inlined_call_operand.vmem [shape: f32[1,32], index: 2, kind: input, shape index: {}]   ;;  %s284_s3 = inlined_call_operand.vmem [shape: f32[8,32], index: 3, kind: input, shape index: {}]   ;;  %s285_s4 = inlined_call_operand.vmem [shape: f32[8,32], index: 4, kind: output, shape index: {}]  }
   0x1   :  { %129 = vmatprep.subr.bf16.mxu0 %v204_v0  ;;  %v192_v1 = vld [vmem:[%s281_s1 + $0x38] sm:$0xff]   ;;  %v193_v2 = vld [vmem:[%s281_s1 + $0x30] sm:$0xff]   ;;  %v194_v3 = vld [vmem:[%s281_s1 + $0x28] sm:$0xff]  }
   0x2   :  { %130 = vmatpush1.bf16.msra.mxu0 %v192_v1  ;;  %v195_v4 = vld [vmem:[%s281_s1 + $0x20] sm:$0xff]   ;;  %v19_v5 = vld [vmem:[%s282_s0 + $0x8] sm:$0xff]  ;;  %v196_v7 = vld [vmem:[%s281_s1 + $0x18] sm:$0xff]  }
   0x3   :  { %131 = vmatprep.subr.bf16.mxu0 %v204_v0  ;;  %v21_v6 = vpack.c.bf16 %v19_v5, %v19_v5  ;;  %v197_v8 = vld [vmem:[%s281_s1 + $0x10] sm:$0xff]   ;;  %v198_v9 = vld [vmem:[%s281_s1 + $0x8] sm:$0xff]   ;;  %v199_v10 = vld [vmem:[%s281_s1] sm:$0xff]  }
   0x4   :  { %v200_v11 = vld [vmem:[%s281_s1 + $0x58] sm:$0xff]   ;;  %v201_v12 = vld [vmem:[%s281_s1 + $0x50] sm:$0xff]   ;;  %v202_v13 = vld [vmem:[%s281_s1 + $0x48] sm:$0xff]  }
   0x5   :  { %190 = vmatprep.mubr.msk.bf16.mxu0 %vm125_vm0, %v21_v6  ;;  %v203_v14 = vld [vmem:[%s281_s1 + $0x40] sm:$0xff]  }
   0x6   :  { %132 = vmatpush1.bf16.msra.mxu0 %v193_v2  ;;  %v18_v15 = vld [vmem:[%s282_s0] sm:$0xff] }
   0x7   :  { %133 = vmatprep.subr.bf16.mxu0 %v204_v0  ;;  %v20_v16 = vpack.c.bf16 %v18_v15, %v18_v15  ;;  %v177_v17 = vld [vmem:[%s283_s2] ss:$0 sm:$0xff] }
   0x8   :  { %v169_v19 = vld [vmem:[%s284_s3] sm:$0xff] }
   0xa   :  { %134 = vmatpush1.bf16.msra.mxu0 %v194_v3 }
   0xb   :  { %135 = vmatprep.subr.bf16.mxu0 %v204_v0 }
   0xe   :  { %136 = vmatpush1.bf16.msra.mxu0 %v195_v4 }
   0xf   :  { %137 = vmatprep.subr.bf16.mxu0 %v204_v0 }
  0x12   :  { %138 = vmatpush1.bf16.msra.mxu0 %v196_v7 }
  0x13   :  { %139 = vmatprep.subr.bf16.mxu0 %v204_v0 }
  0x16   :  { %140 = vmatpush1.bf16.msra.mxu0 %v197_v8 }
  0x17   :  { %141 = vmatprep.subr.bf16.mxu0 %v204_v0 }
  0x1a   :  { %142 = vmatpush1.bf16.msra.mxu0 %v198_v9 }
  0x1b   :  { %143 = vmatprep.subr.bf16.mxu0 %v204_v0 }
  0x1e   :  { %144 = vmatpush1.bf16.msra.mxu0 %v199_v10 }
  0x1f   :  { %153 = vmatprep.subr.bf16.mxu0 %v204_v0 }
  0x22   :  { %154 = vmatpush2.bf16.msra.mxu0 %v200_v11 }
  0x23   :  { %155 = vmatprep.subr.bf16.mxu0 %v204_v0 }
  0x26   :  { %156 = vmatpush2.bf16.msra.mxu0 %v201_v12 }
  0x27   :  { %157 = vmatprep.subr.bf16.mxu0 %v204_v0 }
  0x2a   :  { %158 = vmatpush2.bf16.msra.mxu0 %v202_v13 }
  0x2b   :  { %159 = vmatprep.subr.bf16.mxu0 %v204_v0 }
  0x2e   :  { %160 = vmatpush2.bf16.msra.mxu0 %v203_v14 }
  0x31   :  { %162 = vmatmul.mubr.bf16.vlgmr.msra.gmra.mxu0 %v20_v16 }
  0xf1   :  { %v163_v18 = vpop.f32.mrf.mxu0 }
  0xf2   :  { %v164_v20 = vadd.f32 %v177_v17, %v163_v18 }
  0xf3   :  { %v165_v21 = vpop.f32.mrf.mxu0 }
  0xf4   :  { %v170_v22 = vadd.f32 %v169_v19, %v164_v20 }
  0xf5   :  { %v166_v23 = vpop.f32.mrf.mxu0 }
  0xf6   :  { %172 = vst.msk [vmem:[%s285_s4] sm:$0xff] %vm171_vm1, %v170_v22 }
  0xf7   :  { %v167_v24 = vpop.f32.mrf.mxu0 }

// kernel: paligemma_forward.7
= control target key start
LH: loop header
LB: loop body
LE: loop exit
PB: predicated region body
PF: predicated region fallthrough
CT: control target
= control target key end

     0   :  { %vm24_vm0 = vcmask 261120   ;;  %v148_v7 = vmov 0.0   ;;  %vm149_vm1 = vmmov 0   ;;  %s205_s0 = inlined_call_operand.vmem [shape: f32[8,32], index: 0, kind: input, shape index: {}]   ;;  %s206_s3 = inlined_call_operand.vmem [shape: bf16[32,32], index: 3, kind: input, shape index: {}]   ;;  %s207_s1 = inlined_call_operand.vmem [shape: f32[1,32], index: 1, kind: input, shape index: {}]   ;;  %s208_s2 = inlined_call_operand.vmem [shape: f32[1,32], index: 2, kind: input, shape index: {}]   ;;  %s209_s4 = inlined_call_operand.vmem [shape: f32[1,32], index: 4, kind: input, shape index: {}]   ;;  %s210_s5 = inlined_call_operand.vmem [shape: f32[8,32], index: 5, kind: output, shape index: {}]  }
   0x1   :  { %v21_v0 = vld [vmem:[%s205_s0] sm:$0xff]  ;;  %134 = vmatprep.subr.bf16.mxu0 %v148_v7  ;;  %v144_v8 = vld [vmem:[%s206_s3 + $0x8] sm:$0xff]   ;;  %138 = vmatprep.mubr.msk.bf16.mxu0 %vm149_vm1, %v148_v7 }
   0x2   :  { %v25_v1 = vsel %vm24_vm0, %v21_v0, 0.0  ;;  %135 = vmatpush3.bf16.msra.mxu0 %v144_v8  ;;  %v145_v9 = vld [vmem:[%s206_s3] sm:$0xff]  }
   0x3   :  { %26 = vadd.xlane.f32.xlu0 %v25_v1  ;;  %136 = vmatprep.subr.bf16.mxu0 %v148_v7  ;;  %v125_v14 = vld [vmem:[%s207_s1] ss:$0 sm:$0xff] }
   0x4   :  { %v126_v16 = vld [vmem:[%s208_s2] ss:$0 sm:$0xff] }
   0x5   :  { %v127_v20 = vld [vmem:[%s209_s4] ss:$0 sm:$0xff] }
   0x6   :  { %137 = vmatpush3.bf16.msra.mxu0 %v145_v9 }
  0x8c   :  { %v27_v2 = vpop.xlane.xlu0 %26 }
  0x8d   :  { %v29_v3 = vmul.f32 0.03125, %v27_v2 }
  0x8f   :  { %v30_v4 = vsub.f32 %v21_v0, %v29_v3 }
  0x91   :  { %v31_v5 = vmul.f32 %v30_v4, %v30_v4 }
  0x93   :  { %v32_v6 = vsel %vm24_vm0, %v31_v5, 0.0 }
  0x94   :  { %33 = vadd.xlane.f32.xlu0 %v32_v6 }
 0x11d   :  { %v34_v10 = vpop.xlane.xlu0 %33 }
 0x11e   :  { %v35_v11 = vmul.f32 0.03125, %v34_v10 }
 0x120   :  { %v36_v12 = vadd.f32 1e-06, %v35_v11 }
 0x122   :  { %146 = vrsqrt.f32 %v36_v12 }
 0x12f   :  { %v147_v13 = vpop.eup %146 }
 0x130   :  { %v38_v15 = vmul.f32 %v147_v13, %v30_v4 }
 0x132   :  { %v45_v17 = vmul.f32 %v125_v14, %v38_v15 }
 0x134   :  { %v52_v18 = vadd.f32 %v126_v16, %v45_v17 }
 0x136   :  { %v53_v19 = vpack.c.bf16 %v52_v18, %v52_v18 }
 0x138   :  { %139 = vmatmul.mubr.msk.bf16.vlgmr.msra.gmra.mxu0 %vm24_vm0, %v53_v19 }
 0x1f8   :  { %v114_v21 = vpop.f32.mrf.mxu0 }
 0x1f9   :  { %v115_v22 = vadd.f32 %v127_v20, %v114_v21 }
 0x1fa   :  { %v140_v23 = vpop.f32.mrf.mxu0 }
 0x1fb   :  { %120 = vst.msk [vmem:[%s210_s5] sm:$0xff] %vm24_vm0, %v115_v22 }
 0x1fc   :  { %v117_v24 = vpop.f32.mrf.mxu0 }
 0x1fe   :  { %v141_v25 = vpop.f32.mrf.mxu0 }

// kernel: paligemma_forward.9
= control target key start
LH: loop header
LB: loop body
LE: loop exit
PB: predicated region body
PF: predicated region fallthrough
CT: control target
= control target key end

     0   :  { %vm21_vm0 = vcmask 261120   ;;  %s219_s0 = inlined_call_operand.vmem [shape: f32[16,32], index: 0, kind: input, shape index: {}]   ;;  %s220_s1 = inlined_call_operand.vmem [shape: f32[1,32], index: 1, kind: input, shape index: {}]   ;;  %s221_s2 = inlined_call_operand.vmem [shape: bf16[32,64], index: 2, kind: input, shape index: {}]   ;;  %s222_s3 = inlined_call_operand.hbm [shape: f32[16,64], index: 3, kind: output, shape index: {}]  }
   0x1   :  { %v16_v0 = vld [vmem:[%s219_s0] sm:$0xff]  ;;  %v17_v1 = vld [vmem:[%s219_s0 + $0x8] sm:$0xff] }
   0x2   :  { %v19_v2 = vmul.f32 %v16_v0, %v16_v0  ;;  %v20_v3 = vmul.f32 %v17_v1, %v17_v1 }
   0x3   :  { %8 = vsyncpa [#allocation3], 0  ;;  %v145_v6 = vld [vmem:[%s221_s2 + $0x8] sm:$0xff]   ;;  %v173_v7 = vmov 0.0   ;;  %vm174_vm1 = vmmov 0   ;;  %v146_v8 = vld [vmem:[%s221_s2] sm:$0xff]   ;;  %v39_v15 = vlaneseq }
   0x4   :  { %v22_v4 = vsel %vm21_vm0, %v19_v2, 0.0  ;;  %v25_v5 = vsel %vm21_vm0, %v20_v3, 0.0  ;;  %132 = vmatprep.subr.bf16.mxu0 %v173_v7  ;;  %136 = vmatprep.mubr.msk.bf16.mxu0 %vm174_vm1, %v173_v7  ;;  %v18_v17 = vld [vmem:[%s220_s1] sm:$0x1]  ;;  %vm107_vm2 = vcmask 523264   ;;  %s175_s2 = smov [#allocation2]  }
   0x5   :  { %23 = vadd.xlane.f32.xlu0 %v22_v4  ;;  %133 = vmatpush3.bf16.msra.mxu0 %v145_v6  ;;  %v40_v16 = vshrl.u32 %v39_v15, 7  ;;  %v37_v18 = vadd.f32 1.0, %v18_v17  ;;  %s115_s21 = sshll.u32 %s175_s2, 4  ;;  %s116_s21 = int_to_ptr.vmem [resolvable:$true] %s115_s21 }
   0x6   :  { %134 = vmatprep.subr.bf16.mxu0 %v173_v7  ;;  %s151_s1 = scalar_lea.vmem %s116_s21, 256  ;;  %p156_p1 = scmp.lt.s32.totalorder %s116_s21, %s116_s21 }
   0x7   :  { %v41_v19 = vsub.s32 0, %v40_v16  ;;  %p152_p0 = scmp.ne.s32.totalorder %s116_s21, %s151_s1  ;;  %p157_p2 = scmp.lt.s32.totalorder %s151_s1, %s151_s1 }
   0x9   :  { %26 = vadd.xlane.f32.xlu0 %v25_v5  ;;  %135 = vmatpush3.bf16.msra.mxu0 %v146_v8  ;;  %v42_v22 = vrot.slane %v37_v18, %v41_v19  ;;  %p158_p3 = por %p157_p2, %p156_p1 }
   0xb   :  { %p159_p4 = pnand %p158_p3, %p152_p0 }
  0x8e   :  { %v24_v9 = vpop.xlane.xlu0 %23 }
  0x8f   :  { %v29_v10 = vmul.f32 0.03125, %v24_v9 }
  0x91   :  { %v31_v11 = vadd.f32 1e-06, %v29_v10 }
  0x92   :  { %v27_v12 = vpop.xlane.xlu0 %26 }
  0x93   :  { %147 = vrsqrt.f32 %v31_v11  ;;  %v30_v13 = vmul.f32 0.03125, %v27_v12 }
  0x95   :  { %v32_v14 = vadd.f32 1e-06, %v30_v13 }
  0x97   :  { %149 = vrsqrt.f32 %v32_v14 }
  0xa0   :  { %v148_v20 = vpop.eup %147 }
  0xa1   :  { %v35_v21 = vmul.f32 %v148_v20, %v16_v0 }
  0xa3   :  { %v44_v25 = vmul.f32 %v42_v22, %v35_v21 }
  0xa4   :  { %v150_v23 = vpop.eup %149 }
  0xa5   :  { %v36_v24 = vmul.f32 %v150_v23, %v17_v1 }
  0xa7   :  { %v45_v26 = vmul.f32 %v42_v22, %v36_v24 }
  0xa9   :  { %v46_v27 = vpack.c.bf16 %v45_v26, %v44_v25 }
  0xab   :  { %137 = vmatmul.mubr.msk.bf16.vlgmr.msra.gmra.mxu0 %vm21_vm0, %v46_v27 }
 0x16b   :  { %v100_v28 = vpop.f32.mrf.mxu0 }
 0x16c   :  { %108 = vst.msk [vmem:[#allocation2] sm:$0xff] %vm107_vm2, %v100_v28 }
 0x16d   :  { %v138_v29 = vpop.f32.mrf.mxu0 }
 0x16f   :  { %v103_v30 = vpop.f32.mrf.mxu0 }
 0x170   :  { %109 = vst.msk [vmem:[#allocation2 + $0x8] sm:$0xff] %vm107_vm2, %v103_v30 }
 0x171   :  { %v139_v31 = vpop.f32.mrf.mxu0 }
 0x172   :  { %162 = shalt.err (!%p159_p4)
}
 0x173   :  { %s176_s22 = smov 128   ;;  %s177_s23 = smov 8  }
 0x174   :  { %121 = dma.vmem_to_hbm [thread:$0]  %s116_s21, 256, %s222_s3, [#allocation3], %s176_s22, %s176_s22, %s177_s23  }
 0x175   :  { %171 = dma.done.wait [#allocation3], 256  }
 0x176   :  { %172 = vsyncadd [#allocation3], 4294967040 }
 0x177   :  { %125 = vsyncpa [#allocation3], 1 }

// kernel: paligemma_forward.6
= control target key start
LH: loop header
LB: loop body
LE: loop exit
PB: predicated region body
PF: predicated region fallthrough
CT: control target
= control target key end

     0   :  { %s2570_s25 = smov 0   ;;  %s2877_s0 = inlined_call_operand.vmem [shape: f32[8,32], index: 0, kind: input, shape index: {}]   ;;  %s2878_s1 = inlined_call_operand.vmem [shape: f32[2,1,32], index: 1, kind: input, shape index: {}]   ;;  %s2879_s2 = inlined_call_operand.vmem [shape: f32[2,1,32], index: 2, kind: input, shape index: {}]   ;;  %s2880_s3 = inlined_call_operand.vmem [shape: bf16[2,32,96], index: 3, kind: input, shape index: {}]   ;;  %s2881_s4 = inlined_call_operand.vmem [shape: f32[2,1,96], index: 4, kind: input, shape index: {}]   ;;  %s2882_s5 = inlined_call_operand.vmem [shape: bf16[2,4,8,32], index: 5, kind: input, shape index: {}]   ;;  %s2883_s6 = inlined_call_operand.vmem [shape: f32[2,1,32], index: 6, kind: input, shape index: {}]   ;;  %s2884_s7 = inlined_call_operand.vmem [shape: f32[2,1,32], index: 7, kind: input, shape index: {}]   ;;  %s2885_s8 = inlined_call_operand.vmem [shape: f32[2,1,32], index: 8, kind: input, shape index: {}]   ;;  %s2886_s9 = inlined_call_operand.vmem [shape: bf16[2,32,64], index: 9, kind: input, shape index: {}]   ;;  %s2887_s10 = inlined_call_operand.vmem [shape: f32[2,1,64], index: 10, kind: input, shape index: {}]   ;;  %s2888_s11 = inlined_call_operand.vmem [shape: bf16[2,64,32], index: 11, kind: input, shape index: {}]   ;;  %s2889_s12 = inlined_call_operand.vmem [shape: f32[2,1,32], index: 12, kind: input, shape index: {}]   ;;  %s2890_s13 = inlined_call_operand.vmem [shape: f32[8,32], index: 13, kind: output, shape index: {}]  }
   0x1   :  { %2893 = sst [smem:[#allocation4_spill]] %s2879_s2 }
   0x2   :  { %2894 = sst [smem:[#allocation5_spill]] %s2880_s3 }
   0x3   :  { %2895 = sst [smem:[#allocation6_spill]] %s2882_s5 }
   0x4 LB: > { %2896 = sst [smem:[#allocation2_spill]] %s2485_s25  ;;  %s2152_s26 = sadd.s32 4294967295, %s2485_s25   ;;  %s2485_s25 = sphi %s2570_s25, %s23_s25  }
   0x5   : > { %p2155_p0 = scmp.ge.s32.totalorder %s2485_s25, 1  ;;  %p476_p1 = scmp.lt.s32.totalorder %s2485_s25, 3 }
   0x7   : > { %p477_p2 = pnand %p2155_p0, %p476_p1 }
   0x9   : > { %480 = sbr.rel (%p477_p2) target bundleno = 4450 (0x1162), region = 72 }
   0xe   : > { %p554_p3 = scmp.lt.s32.totalorder %s2152_s26, 1  ;;  %s2898_s3 = sld [smem:[#allocation5_spill]] }
   0xf   : > { %s2899_s5 = sld [smem:[#allocation6_spill]]  ;;  %p2164_p4 = scmp.ne.s32.totalorder %s2152_s26, 0 }
  0x10   : > { %s2578_s27 = scalar_select %p554_p3, %s2152_s26, 1 }
  0x12   : > { %s2209_s17 = sshll.u32 %s2578_s27, 4  ;;  %s578_s2 = scalar_lea.vmem %s2884_s7, %s2578_s27 }
  0x13   : > { %s581_s20 = scalar_lea.vmem %s2885_s8, %s2578_s27  ;;  %s597_s18 = scalar_lea.vmem %s2889_s12, %s2578_s27 }
  0x14   : > { %s2596_s23 = scalar_lea.vmem %s2898_s3, %s2209_s17  ;;  %s2618_s3 = scalar_lea.vmem %s2886_s9, %s2209_s17 }
  0x15   : > { %s2601_s29 = scalar_lea.vmem %s2899_s5, %s2209_s17  ;;  %s589_s5 = scalar_lea.vmem %s2887_s10, %s2578_s27 }
  0x16   : > { %2900 = sst [smem:[#allocation3_spill]] %s2601_s29  ;;  %s2212_s29 = sshll.u32 %s2578_s27, 5 }
  0x17   : > { %s2628_s14 = scalar_lea.vmem %s2888_s11, %s2212_s29  ;;  %602 = sbr.rel (%p2164_p4) target bundleno = 30 (0x1e), region = 76 }
  0x1c   : > { %v603_v0 = vld [vmem:[%s2877_s0] sm:$0xff]  ;;  %vm604_vm0 = vcmask 261120  }
  0x1d   : > { %605 = vst.msk [vmem:[%s2890_s13] sm:$0xff] %vm604_vm0, %v603_v0 }
  0x1e PF: > { %vm609_vm1 = vcmask 261120   ;;  %v2433_v8 = vld [vmem:[%s2596_s23 + $0x8] sm:$0xff]   ;;  %v2487_v9 = vmov 0.0   ;;  %vm2488_vm2 = vmmov 0   ;;  %v2434_v10 = vld [vmem:[%s2596_s23] sm:$0xff]   ;;  %s2901_s23 = scalar_lea.vmem %s2878_s1, %s2578_s27  ;;  %s2902_s16 = sld [smem:[#allocation4_spill]] }
  0x1f   : > { %2264 = vmatprep.subr.bf16.mxu1 %v2487_v9  ;;  %2268 = vmatprep.mubr.msk.bf16.mxu1 %vm2488_vm2, %v2487_v9  ;;  %v2165_v15 = vld [vmem:[%s2901_s23] ss:$0 sm:$0xff]  ;;  %s2904_s17 = scalar_lea.vmem %s2881_s4, %s2578_s27  ;;  %s2489_s22 = smov 96   ;;  %vm721_vm3 = vcmask 64512   ;;  %vm819_vm4 = vcmask 27648   ;;  %vm850_vm5 = vcmask 1041408  }
  0x20   : > { %2265 = vmatpush3.bf16.msra.mxu1 %v2433_v8  ;;  %2278 = vmatprep.subr.bf16.mxu0 %v2487_v9  ;;  %v2167_v21 = vld [vmem:[%s2904_s17] ss:$0 sm:$0xff]  ;;  %s2490_s24 = smov 88   ;;  %s2491_s28 = smov 64   ;;  %vm846_vm6 = vcmask 31744   ;;  %vm951_vm7 = vcmask 1043456  }
  0x21   : > { %2266 = vmatprep.subr.bf16.mxu1 %v2487_v9  ;;  %2280 = vmatprep.mubr.msk.bf16.mxu0 %vm2488_vm2, %v2487_v9  ;;  %s2492_s26 = smov 120   ;;  %s2905_s29 = sld [smem:[#allocation3_spill]]  ;;  %vm1962_vm8 = vcmask 523264  }
  0x22   : > { %s2493_s23 = smov 56   ;;  %s2494_s25 = smov 80  }
  0x23   : > { %s2495_s30 = smov 112   ;;  %s2906_s19 = scalar_lea.vmem %s2883_s6, %s2578_s27 }
  0x24   : > { %v2643_v1 = vld [vmem:[%s2890_s13] sm:$0xff]  ;;  %2267 = vmatpush3.bf16.msra.mxu1 %v2434_v10  ;;  %s2903_s15 = scalar_lea.vmem %s2902_s16, %s2578_s27  ;;  %s2496_s21 = smov 48  }
  0x25   : > { %v610_v2 = vsel %vm609_vm1, %v2643_v1, 0.0  ;;  %2272 = vmatprep.subr.bf16.mxu1 %v2487_v9  ;;  %v2166_v17 = vld [vmem:[%s2903_s15] ss:$0 sm:$0xff]  ;;  %s2497_s17 = smov 72  }
  0x26   : > { %611 = vadd.xlane.f32.xlu0 %v610_v2 }
  0x27   : > { %v947_v10 = vld [vmem:[%s2905_s29] sm:$0xf] }
  0xaf   : > { %v612_v3 = vpop.xlane.xlu0 %611 }
  0xb0   : > { %v614_v4 = vmul.f32 0.03125, %v612_v3 }
  0xb2   : > { %v615_v5 = vsub.f32 %v2643_v1, %v614_v4 }
  0xb4   : > { %v616_v6 = vmul.f32 %v615_v5, %v615_v5 }
  0xb6   : > { %v617_v7 = vsel %vm609_vm1, %v616_v6, 0.0 }
  0xb7   : > { %618 = vadd.xlane.f32.xlu0 %v617_v7 }
 0x140   : > { %v619_v11 = vpop.xlane.xlu0 %618 }
 0x141   : > { %v620_v12 = vmul.f32 0.03125, %v619_v11  ;;  %v953_v11 = vsel %vm951_vm7, %v947_v10, 0 }
 0x143   : > { %v621_v13 = vadd.f32 1e-06, %v620_v12 }
 0x145   : > { %2441 = vrsqrt.f32 %v621_v13 }
 0x152   : > { %v2442_v14 = vpop.eup %2441 }
 0x153   : > { %v623_v16 = vmul.f32 %v2442_v14, %v615_v5 }
 0x155   : > { %v630_v18 = vmul.f32 %v2165_v15, %v623_v16 }
 0x157   : > { %v637_v19 = vadd.f32 %v2166_v17, %v630_v18 }
 0x159   : > { %v638_v20 = vpack.c.bf16 %v637_v19, %v637_v19 }
 0x15b   : > { %2269 = vmatmul.mubr.msk.bf16.vlgmr.msra.gmra.mxu1 %vm609_vm1, %v638_v20 }
 0x15c   : > { %2274 = vmatprep.mubr.msk.bf16.mxu1 %vm2488_vm2, %v2487_v9 }
 0x21b   : > { %v699_v22 = vpop.f32.mrf.mxu1 }
 0x21c   : > { %v700_v23 = vadd.f32 %v2167_v21, %v699_v22 }
 0x21d   : > { %v2270_v24 = vpop.f32.mrf.mxu1 }
 0x21e   : > { %v714_v25 = vcombine.high %v700_v23, %v700_v23  ;;  %v2677_v26 = vpack.c.bf16 %v700_v23, %v700_v23 }
 0x21f   : > { %v702_v27 = vpop.f32.mrf.mxu1 }
 0x220   : > { %719 = vrot.lane.b32.xlu1 %v2677_v26, %s2489_s22  ;;  %v2680_v29 = vpack.c.bf16 %v714_v25, %v714_v25 }
 0x221   : > { %v2271_v28 = vpop.f32.mrf.mxu1 }
 0x224   : > { %769 = vrot.lane.b32.xlu1 %v2680_v29, %s2489_s22  ;;  %s2498_s22 = smov 104  }
 0x292   : > { %v720_v30 = vpop.permute.xlu1 %719 }
 0x293   : > { %v726_v31 = vsel %vm721_vm3, %v720_v30, 0 }
 0x294   : > { %2273 = vmatpush3.bf16.xpose.msra.mxu1 %v726_v31 }
 0x295   : > { %2284 = vmatprep.subr.bf16.mxu1 %v2487_v9 }
 0x296   : > { %v770_v32 = vpop.permute.xlu1 %769 }
 0x297   : > { %v775_v33 = vsel %vm721_vm3, %v770_v32, 0 }
 0x298   : > { %2279 = vmatpush3.bf16.xpose.msra.mxu0 %v775_v33 }
 0x299   : > { %2290 = vmatprep.subr.bf16.mxu0 %v2487_v9 }
 0x29b   : > { %2275 = vmatmul.mubr.msk.bf16.vlgmr.msra.gmra.mxu1 %vm721_vm3, %v2677_v26 }
 0x29c   : > { %2286 = vmatprep.mubr.msk.bf16.mxu1 %vm2488_vm2, %v2487_v9 }
 0x29f   : > { %2281 = vmatmul.mubr.msk.bf16.vlgmr.msra.gmra.mxu0 %vm721_vm3, %v2680_v29 }
 0x2a0   : > { %2292 = vmatprep.mubr.msk.bf16.mxu0 %vm2488_vm2, %v2487_v9 }
 0x35b   : > { %v762_v34 = vpop.f32.mrf.mxu1 }
 0x35c   : > { %v817_v35 = vmul.f32 0.35355338, %v762_v34 }
 0x35d   : > { %v2276_v36 = vpop.f32.mrf.mxu1 }
 0x35e   : > { %v820_v37 = vsel %vm819_vm4, %v817_v35, -inf }
 0x35f   : > { %v811_v38 = vpop.f32.mrf.mxu0  ;;  %821 = vmax.xlane.f32.xlu0 %v820_v37  ;;  %v765_v39 = vpop.f32.mrf.mxu1 }
 0x360   : > { %v818_v40 = vmul.f32 0.35355338, %v811_v38 }
 0x361   : > { %v2277_v41 = vpop.f32.mrf.mxu1  ;;  %v2282_v42 = vpop.f32.mrf.mxu0 }
 0x362   : > { %v823_v43 = vsel %vm819_vm4, %v818_v40, -inf }
 0x363   : > { %824 = vmax.xlane.f32.xlu1 %v823_v43  ;;  %v814_v44 = vpop.f32.mrf.mxu0 }
 0x365   : > { %v2283_v45 = vpop.f32.mrf.mxu0 }
 0x374   : > { %998 = vrot.lane.b32.xlu1 %v2677_v26, %s2490_s24 }
 0x375   : > { %844 = vrot.lane.b32.xlu0 %v2677_v26, %s2491_s28 }
 0x3e8   : > { %v822_v46 = vpop.xlane.xlu0 %821 }
 0x3e9   : > { %v826_v47 = vsub.f32 %v817_v35, %v822_v46 }
 0x3eb   : > { %v828_v48 = vmul.f32 1.442695, %v826_v47 }
 0x3ec   : > { %v825_v49 = vpop.xlane.xlu1 %824  ;;  %v845_v50 = vpop.permute.xlu0 %844 }
 0x3ed   : > { %2443 = vpow2.f32 %v828_v48  ;;  %v827_v51 = vsub.f32 %v818_v40, %v825_v49  ;;  %v852_v52 = vsel %vm850_vm5, %v845_v50, 0 }
 0x3ee   : > { %2285 = vmatpush3.bf16.msra.mxu1 %v852_v52 }
 0x3ef   : > { %v830_v53 = vmul.f32 1.442695, %v827_v51  ;;  %2296 = vmatprep.subr.bf16.mxu1 %v2487_v9 }
 0x3f0   : > { %v999_v4 = vpop.permute.xlu1 %998 }
 0x3f1   : > { %2445 = vpow2.f32 %v830_v53  ;;  %v1004_v6 = vsel %vm721_vm3, %v999_v4, 0  ;;  %v2181_v4 = vld [vmem:[%s2905_s29 + $0x4] sm:$0xf] }
 0x3fa   : > { %v2444_v54 = vpop.eup %2443 }
 0x3fb   : > { %v832_v55 = vsel %vm819_vm4, %v2444_v54, 0.0 }
 0x3fc   : > { %833 = vadd.xlane.f32.xlu0 %v832_v55 }
 0x3fe   : > { %v2446_v56 = vpop.eup %2445 }
 0x3ff   : > { %v835_v57 = vsel %vm819_vm4, %v2446_v56, 0.0 }
 0x400   : > { %836 = vadd.xlane.f32.xlu0 %v835_v57 }
 0x416   : > { %894 = vrot.lane.b32.xlu0 %v2680_v29, %s2491_s28 }
 0x41a   : > { %1048 = vrot.lane.b32.xlu0 %v2680_v29, %s2490_s24  ;;  %s2499_s24 = smov 40  }
 0x41e   : > { %996 = vrot.lane.b32.xlu0 %v2677_v26, %s2492_s26 }
 0x422   : > { %1046 = vrot.lane.b32.xlu0 %v2680_v29, %s2492_s26 }
 0x485   : > { %v834_v58 = vpop.xlane.xlu0 %833 }
 0x486   : > { %2447 = vrcp.f32 %v834_v58 }
 0x489   : > { %v837_v59 = vpop.xlane.xlu0 %836 }
 0x48a   : > { %2449 = vrcp.f32 %v837_v59 }
 0x48d   : > { %v895_v60 = vpop.permute.xlu0 %894 }
 0x48e   : > { %v900_v61 = vsel %vm850_vm5, %v895_v60, 0 }
 0x48f   : > { %2291 = vmatpush3.bf16.msra.mxu0 %v900_v61 }
 0x490   : > { %2302 = vmatprep.subr.bf16.mxu0 %v2487_v9 }
 0x491   : > { %v1049_v7 = vpop.permute.xlu0 %1048 }
 0x492   : > { %v1054_v21 = vsel %vm721_vm3, %v1049_v7, 0 }
 0x493   : > { %v2448_v62 = vpop.eup %2447 }
 0x494   : > { %v840_v63 = vmul.f32 %v2448_v62, %v2444_v54 }
 0x495   : > { %v997_v8 = vpop.permute.xlu0 %996 }
 0x496   : > { %v842_v0 = vpack.c.bf16 %v840_v63, %v840_v63 }
 0x497   : > { %v2450_v2 = vpop.eup %2449 }
 0x498   : > { %2287 = vmatmul.mubr.msk.bf16.vlgmr.msra.gmra.mxu1 %vm846_vm6, %v842_v0  ;;  %v841_v3 = vmul.f32 %v2450_v2, %v2446_v56 }
 0x499   : > { %2298 = vmatprep.mubr.msk.bf16.mxu1 %vm2488_vm2, %v2487_v9  ;;  %2297 = vmatpush3.bf16.msra.mxu1 %v953_v11  ;;  %v1047_v28 = vpop.permute.xlu0 %1046 }
 0x49a   : > { %v843_v5 = vpack.c.bf16 %v841_v3, %v841_v3  ;;  %2308 = vmatprep.subr.bf16.mxu1 %v2487_v9 }
 0x49c   : > { %2293 = vmatmul.mubr.msk.bf16.vlgmr.msra.gmra.mxu0 %vm846_vm6, %v843_v5  ;;  %v1229_v5 = vsel %vm951_vm7, %v2181_v4, 0 }
 0x49d   : > { %2303 = vmatpush3.bf16.xpose.msra.mxu0 %v1004_v6  ;;  %2304 = vmatprep.mubr.msk.bf16.mxu0 %vm2488_vm2, %v2487_v9 }
 0x49e   : > { %2314 = vmatprep.subr.bf16.mxu0 %v2487_v9 }
 0x4a4   : > { %2305 = vmatmul.mubr.msk.bf16.vlgmr.msra.gmra.mxu0 %vm721_vm3, %v997_v8 }
 0x4a5   : > { %2316 = vmatprep.mubr.msk.bf16.mxu0 %vm2488_vm2, %v2487_v9 }
 0x558   : > { %v888_v12 = vpop.f32.mrf.mxu1 }
 0x55a   : > { %v2288_v13 = vpop.f32.mrf.mxu1 }
 0x55c   : > { %v891_v14 = vpop.f32.mrf.mxu1  ;;  %v936_v15 = vpop.f32.mrf.mxu0 }
 0x55d   : > { %v944_v16 = vcombine.low %v888_v12, %v936_v15 }
 0x55e   : > { %v2289_v17 = vpop.f32.mrf.mxu1  ;;  %v2294_v18 = vpop.f32.mrf.mxu0 }
 0x55f   : > { %v946_v19 = vpack.c.bf16 %v944_v16, %v944_v16 }
 0x560   : > { %v939_v20 = vpop.f32.mrf.mxu0 }
 0x561   : > { %2299 = vmatmul.mubr.msk.bf16.vlgmr.msra.gmra.mxu1 %vm721_vm3, %v946_v19 }
 0x562   : > { %2309 = vmatpush3.bf16.xpose.msra.mxu1 %v1054_v21  ;;  %v2295_v22 = vpop.f32.mrf.mxu0  ;;  %2310 = vmatprep.mubr.msk.bf16.mxu1 %vm2488_vm2, %v2487_v9 }
 0x563   : > { %2320 = vmatprep.subr.bf16.mxu1 %v2487_v9 }
 0x564   : > { %v1040_v23 = vpop.f32.mrf.mxu0 }
 0x565   : > { %v1096_v24 = vmul.f32 0.35355338, %v1040_v23 }
 0x566   : > { %v2306_v25 = vpop.f32.mrf.mxu0 }
 0x567   : > { %v1098_v27 = vsel %vm819_vm4, %v1096_v24, -inf }
 0x568   : > { %1099 = vmax.xlane.f32.xlu0 %v1098_v27  ;;  %v1043_v30 = vpop.f32.mrf.mxu0 }
 0x569   : > { %2311 = vmatmul.mubr.msk.bf16.vlgmr.msra.gmra.mxu1 %vm721_vm3, %v1047_v28 }
 0x56a   : > { %v2307_v31 = vpop.f32.mrf.mxu0  ;;  %2322 = vmatprep.mubr.msk.bf16.mxu1 %vm2488_vm2, %v2487_v9 }
 0x5f1   : > { %v1100_v32 = vpop.xlane.xlu0 %1099 }
 0x5f2   : > { %v1104_v33 = vsub.f32 %v1096_v24, %v1100_v32 }
 0x5f4   : > { %v1106_v34 = vmul.f32 1.442695, %v1104_v33  ;;  %v2171_v33 = vld [vmem:[%s2906_s19] ss:$0 sm:$0xff] }
 0x5f6   : > { %2451 = vpow2.f32 %v1106_v34  ;;  %v712_v34 = vadd.f32 %v2171_v33, %v2643_v1 }
 0x603   : > { %v2452_v35 = vpop.eup %2451 }
 0x604   : > { %v1110_v36 = vsel %vm819_vm4, %v2452_v35, 0.0 }
 0x605   : > { %1111 = vadd.xlane.f32.xlu0 %v1110_v36 }
 0x621   : > { %v2733_v37 = vpop.f32.mrf.mxu1 }
 0x623   : > { %v2300_v38 = vpop.f32.mrf.mxu1 }
 0x625   : > { %v992_v39 = vpop.f32.mrf.mxu1 }
 0x627   : > { %v2301_v40 = vpop.f32.mrf.mxu1 }
 0x629   : > { %v1090_v41 = vpop.f32.mrf.mxu1 }
 0x62a   : > { %v1097_v42 = vmul.f32 0.35355338, %v1090_v41 }
 0x62b   : > { %v2312_v43 = vpop.f32.mrf.mxu1 }
 0x62c   : > { %v1101_v44 = vsel %vm819_vm4, %v1097_v42, -inf }
 0x62d   : > { %1102 = vmax.xlane.f32.xlu1 %v1101_v44  ;;  %v1093_v45 = vpop.f32.mrf.mxu1 }
 0x62f   : > { %v2313_v46 = vpop.f32.mrf.mxu1 }
 0x63e   : > { %1170 = vrot.lane.b32.xlu1 %v2680_v29, %s2493_s23 }
 0x642   : > { %1274 = vrot.lane.b32.xlu1 %v2677_v26, %s2494_s25 }
 0x646   : > { %1324 = vrot.lane.b32.xlu1 %v2680_v29, %s2494_s25 }
 0x64a   : > { %1322 = vrot.lane.b32.xlu1 %v2680_v29, %s2495_s30 }
 0x68e   : > { %v1112_v54 = vpop.xlane.xlu0 %1111 }
 0x6b6   : > { %v1103_v47 = vpop.xlane.xlu1 %1102 }
 0x6b7   : > { %v1105_v48 = vsub.f32 %v1097_v42, %v1103_v47 }
 0x6b9   : > { %v1108_v49 = vmul.f32 1.442695, %v1105_v48 }
 0x6ba   : > { %v1171_v50 = vpop.permute.xlu1 %1170 }
 0x6bb   : > { %2453 = vpow2.f32 %v1108_v49  ;;  %v1176_v51 = vsel %vm850_vm5, %v1171_v50, 0 }
 0x6bc   : > { %2321 = vmatpush3.bf16.msra.mxu1 %v1176_v51  ;;  %2455 = vrcp.f32 %v1112_v54 }
 0x6bd   : > { %2332 = vmatprep.subr.bf16.mxu1 %v2487_v9 }
 0x6be   : > { %v1275_v63 = vpop.permute.xlu1 %1274 }
 0x6bf   : > { %v1280_v2 = vsel %vm721_vm3, %v1275_v63, 0 }
 0x6c2   : > { %v1325_v13 = vpop.permute.xlu1 %1324 }
 0x6c3   : > { %v1330_v17 = vsel %vm721_vm3, %v1325_v13, 0 }
 0x6c6   : > { %v1323_v23 = vpop.permute.xlu1 %1322 }
 0x6c8   : > { %v2454_v52 = vpop.eup %2453 }
 0x6c9   : > { %v1113_v53 = vsel %vm819_vm4, %v2454_v52, 0.0  ;;  %v2456_v55 = vpop.eup %2455 }
 0x6ca   : > { %1114 = vadd.xlane.f32.xlu0 %v1113_v53  ;;  %v1118_v57 = vmul.f32 %v2456_v55, %v2452_v35  ;;  %v995_v35 = vadd.f32 %v2733_v37, %v712_v34 }
 0x6cc   : > { %v1120_v60 = vpack.c.bf16 %v1118_v57, %v1118_v57 }
 0x6e0   : > { %1122 = vrot.lane.b32.xlu0 %v2677_v26, %s2493_s23 }
 0x6e4   : > { %1272 = vrot.lane.b32.xlu0 %v2677_v26, %s2495_s30 }
 0x753   : > { %v1115_v56 = vpop.xlane.xlu0 %1114 }
 0x754   : > { %2457 = vrcp.f32 %v1115_v56 }
 0x757   : > { %v1123_v58 = vpop.permute.xlu0 %1122 }
 0x758   : > { %v1128_v59 = vsel %vm850_vm5, %v1123_v58, 0 }
 0x759   : > { %2315 = vmatpush3.bf16.msra.mxu0 %v1128_v59 }
 0x75a   : > { %2326 = vmatprep.subr.bf16.mxu0 %v2487_v9 }
 0x75b   : > { %v1273_v3 = vpop.permute.xlu0 %1272 }
 0x75c   : > { %2317 = vmatmul.mubr.msk.bf16.vlgmr.msra.gmra.mxu0 %vm846_vm6, %v1120_v60 }
 0x75d   : > { %2328 = vmatprep.mubr.msk.bf16.mxu0 %vm2488_vm2, %v2487_v9  ;;  %2327 = vmatpush3.bf16.msra.mxu0 %v1229_v5 }
 0x75e   : > { %2338 = vmatprep.subr.bf16.mxu0 %v2487_v9 }
 0x761   : > { %v2458_v61 = vpop.eup %2457 }
 0x762   : > { %v1119_v62 = vmul.f32 %v2458_v61, %v2454_v52 }
 0x764   : > { %v1121_v0 = vpack.c.bf16 %v1119_v62, %v1119_v62 }
 0x766   : > { %2323 = vmatmul.mubr.msk.bf16.vlgmr.msra.gmra.mxu1 %vm846_vm6, %v1121_v0 }
 0x767   : > { %2333 = vmatpush3.bf16.xpose.msra.mxu1 %v1280_v2  ;;  %2334 = vmatprep.mubr.msk.bf16.mxu1 %vm2488_vm2, %v2487_v9 }
 0x768   : > { %2344 = vmatprep.subr.bf16.mxu1 %v2487_v9 }
 0x76e   : > { %2335 = vmatmul.mubr.msk.bf16.vlgmr.msra.gmra.mxu1 %vm721_vm3, %v1273_v3  ;;  %v2187_v3 = vld [vmem:[%s2905_s29 + $0x8] sm:$0xf] }
 0x76f   : > { %2346 = vmatprep.mubr.msk.bf16.mxu1 %vm2488_vm2, %v2487_v9  ;;  %v1505_v4 = vsel %vm951_vm7, %v2187_v3, 0 }
 0x81c   : > { %v1164_v6 = vpop.f32.mrf.mxu0 }
 0x81e   : > { %v2318_v7 = vpop.f32.mrf.mxu0 }
 0x820   : > { %v1167_v8 = vpop.f32.mrf.mxu0 }
 0x822   : > { %v2319_v10 = vpop.f32.mrf.mxu0 }
 0x826   : > { %v1212_v11 = vpop.f32.mrf.mxu1 }
 0x827   : > { %v1220_v12 = vcombine.low %v1164_v6, %v1212_v11 }
 0x828   : > { %v2324_v14 = vpop.f32.mrf.mxu1 }
 0x829   : > { %v1222_v15 = vpack.c.bf16 %v1220_v12, %v1220_v12 }
 0x82a   : > { %v1215_v16 = vpop.f32.mrf.mxu1 }
 0x82b   : > { %2329 = vmatmul.mubr.msk.bf16.vlgmr.msra.gmra.mxu0 %vm721_vm3, %v1222_v15 }
 0x82c   : > { %2339 = vmatpush3.bf16.xpose.msra.mxu0 %v1330_v17  ;;  %v2325_v18 = vpop.f32.mrf.mxu1  ;;  %2340 = vmatprep.mubr.msk.bf16.mxu0 %vm2488_vm2, %v2487_v9 }
 0x82d   : > { %2350 = vmatprep.subr.bf16.mxu0 %v2487_v9 }
 0x82e   : > { %v1316_v19 = vpop.f32.mrf.mxu1 }
 0x82f   : > { %v1372_v20 = vmul.f32 0.35355338, %v1316_v19 }
 0x830   : > { %v2336_v21 = vpop.f32.mrf.mxu1 }
 0x831   : > { %v1374_v22 = vsel %vm819_vm4, %v1372_v20, -inf }
 0x832   : > { %1375 = vmax.xlane.f32.xlu0 %v1374_v22  ;;  %v1319_v24 = vpop.f32.mrf.mxu1 }
 0x833   : > { %2341 = vmatmul.mubr.msk.bf16.vlgmr.msra.gmra.mxu0 %vm721_vm3, %v1323_v23 }
 0x834   : > { %v2337_v25 = vpop.f32.mrf.mxu1  ;;  %2352 = vmatprep.mubr.msk.bf16.mxu0 %vm2488_vm2, %v2487_v9 }
 0x8bb   : > { %v1376_v27 = vpop.xlane.xlu0 %1375 }
 0x8bc   : > { %v1380_v28 = vsub.f32 %v1372_v20, %v1376_v27 }
 0x8be   : > { %v1382_v30 = vmul.f32 1.442695, %v1380_v28 }
 0x8c0   : > { %2459 = vpow2.f32 %v1382_v30 }
 0x8cd   : > { %v2460_v31 = vpop.eup %2459 }
 0x8ce   : > { %v1386_v32 = vsel %vm819_vm4, %v2460_v31, 0.0 }
 0x8cf   : > { %1387 = vadd.xlane.f32.xlu0 %v1386_v32 }
 0x8eb   : > { %v1265_v36 = vpop.f32.mrf.mxu0 }
 0x8ec   : > { %v2778_v38 = vadd.f32 %v1265_v36, %v995_v35 }
 0x8ed   : > { %v2330_v39 = vpop.f32.mrf.mxu0 }
 0x8ef   : > { %v1268_v40 = vpop.f32.mrf.mxu0 }
 0x8f1   : > { %v2331_v41 = vpop.f32.mrf.mxu0 }
 0x8f3   : > { %v1366_v42 = vpop.f32.mrf.mxu0 }
 0x8f4   : > { %v1373_v43 = vmul.f32 0.35355338, %v1366_v42 }
 0x8f5   : > { %v2342_v44 = vpop.f32.mrf.mxu0 }
 0x8f6   : > { %v1377_v45 = vsel %vm819_vm4, %v1373_v43, -inf }
 0x8f7   : > { %1378 = vmax.xlane.f32.xlu1 %v1377_v45  ;;  %v1369_v46 = vpop.f32.mrf.mxu0 }
 0x8f9   : > { %v2343_v47 = vpop.f32.mrf.mxu0 }
 0x908   : > { %1446 = vrot.lane.b32.xlu1 %v2680_v29, %s2496_s21 }
 0x90c   : > { %1550 = vrot.lane.b32.xlu1 %v2677_v26, %s2497_s17 }
 0x910   : > { %1600 = vrot.lane.b32.xlu1 %v2680_v29, %s2497_s17 }
 0x914   : > { %1598 = vrot.lane.b32.xlu1 %v2680_v29, %s2498_s22 }
 0x958   : > { %v1388_v53 = vpop.xlane.xlu0 %1387 }
 0x980   : > { %v1379_v1 = vpop.xlane.xlu1 %1378 }
 0x981   : > { %v1381_v37 = vsub.f32 %v1373_v43, %v1379_v1 }
 0x983   : > { %v1384_v48 = vmul.f32 1.442695, %v1381_v37 }
 0x984   : > { %v1447_v49 = vpop.permute.xlu1 %1446 }
 0x985   : > { %2461 = vpow2.f32 %v1384_v48  ;;  %v1452_v50 = vsel %vm850_vm5, %v1447_v49, 0 }
 0x986   : > { %2351 = vmatpush3.bf16.msra.mxu0 %v1452_v50  ;;  %2463 = vrcp.f32 %v1388_v53 }
 0x987   : > { %2362 = vmatprep.subr.bf16.mxu0 %v2487_v9 }
 0x988   : > { %v1551_v62 = vpop.permute.xlu1 %1550 }
 0x989   : > { %v1556_v0 = vsel %vm721_vm3, %v1551_v62, 0 }
 0x98c   : > { %v1601_v12 = vpop.permute.xlu1 %1600 }
 0x98d   : > { %v1606_v16 = vsel %vm721_vm3, %v1601_v12, 0 }
 0x990   : > { %v1599_v22 = vpop.permute.xlu1 %1598 }
 0x992   : > { %v2462_v51 = vpop.eup %2461 }
 0x993   : > { %v1389_v52 = vsel %vm819_vm4, %v2462_v51, 0.0  ;;  %v2464_v54 = vpop.eup %2463 }
 0x994   : > { %1390 = vadd.xlane.f32.xlu0 %v1389_v52  ;;  %v1394_v56 = vmul.f32 %v2464_v54, %v2460_v31 }
 0x996   : > { %v1396_v59 = vpack.c.bf16 %v1394_v56, %v1394_v56 }
 0x9aa   : > { %1398 = vrot.lane.b32.xlu0 %v2677_v26, %s2496_s21 }
 0x9ae   : > { %1548 = vrot.lane.b32.xlu0 %v2677_v26, %s2498_s22 }
 0xa1d   : > { %v1391_v55 = vpop.xlane.xlu0 %1390 }
 0xa1e   : > { %2465 = vrcp.f32 %v1391_v55 }
 0xa21   : > { %v1399_v57 = vpop.permute.xlu0 %1398 }
 0xa22   : > { %v1404_v58 = vsel %vm850_vm5, %v1399_v57, 0  ;;  %v2193_v57 = vld [vmem:[%s2905_s29 + $0xc] sm:$0xf] }
 0xa23   : > { %2345 = vmatpush3.bf16.msra.mxu1 %v1404_v58  ;;  %v1781_v58 = vsel %vm951_vm7, %v2193_v57, 0 }
 0xa24   : > { %2356 = vmatprep.subr.bf16.mxu1 %v2487_v9 }
 0xa25   : > { %v1549_v2 = vpop.permute.xlu0 %1548 }
 0xa26   : > { %2347 = vmatmul.mubr.msk.bf16.vlgmr.msra.gmra.mxu1 %vm846_vm6, %v1396_v59 }
 0xa27   : > { %2358 = vmatprep.mubr.msk.bf16.mxu1 %vm2488_vm2, %v2487_v9  ;;  %2357 = vmatpush3.bf16.msra.mxu1 %v1505_v4 }
 0xa28   : > { %2368 = vmatprep.subr.bf16.mxu1 %v2487_v9 }
 0xa2b   : > { %v2466_v60 = vpop.eup %2465 }
 0xa2c   : > { %v1395_v61 = vmul.f32 %v2466_v60, %v2462_v51 }
 0xa2e   : > { %v1397_v63 = vpack.c.bf16 %v1395_v61, %v1395_v61 }
 0xa30   : > { %2353 = vmatmul.mubr.msk.bf16.vlgmr.msra.gmra.mxu0 %vm846_vm6, %v1397_v63 }
 0xa31   : > { %2363 = vmatpush3.bf16.xpose.msra.mxu0 %v1556_v0  ;;  %2364 = vmatprep.mubr.msk.bf16.mxu0 %vm2488_vm2, %v2487_v9 }
 0xa32   : > { %2374 = vmatprep.subr.bf16.mxu0 %v2487_v9 }
 0xa38   : > { %2365 = vmatmul.mubr.msk.bf16.vlgmr.msra.gmra.mxu0 %vm721_vm3, %v1549_v2 }
 0xa39   : > { %2376 = vmatprep.mubr.msk.bf16.mxu0 %vm2488_vm2, %v2487_v9 }
 0xae6   : > { %v1440_v5 = vpop.f32.mrf.mxu1 }
 0xae8   : > { %v2348_v6 = vpop.f32.mrf.mxu1 }
 0xaea   : > { %v1443_v7 = vpop.f32.mrf.mxu1 }
 0xaec   : > { %v2349_v8 = vpop.f32.mrf.mxu1 }
 0xaf0   : > { %v1488_v10 = vpop.f32.mrf.mxu0 }
 0xaf1   : > { %v1496_v11 = vcombine.low %v1440_v5, %v1488_v10 }
 0xaf2   : > { %v2354_v13 = vpop.f32.mrf.mxu0 }
 0xaf3   : > { %v1498_v14 = vpack.c.bf16 %v1496_v11, %v1496_v11 }
 0xaf4   : > { %v1491_v15 = vpop.f32.mrf.mxu0 }
 0xaf5   : > { %2359 = vmatmul.mubr.msk.bf16.vlgmr.msra.gmra.mxu1 %vm721_vm3, %v1498_v14 }
 0xaf6   : > { %2369 = vmatpush3.bf16.xpose.msra.mxu1 %v1606_v16  ;;  %v2355_v17 = vpop.f32.mrf.mxu0  ;;  %2370 = vmatprep.mubr.msk.bf16.mxu1 %vm2488_vm2, %v2487_v9 }
 0xaf7   : > { %2380 = vmatprep.subr.bf16.mxu1 %v2487_v9 }
 0xaf8   : > { %v1592_v18 = vpop.f32.mrf.mxu0 }
 0xaf9   : > { %v1648_v19 = vmul.f32 0.35355338, %v1592_v18  ;;  %v2435_v18 = vld [vmem:[%s2618_s3 + $0x8] sm:$0xff]  }
 0xafa   : > { %v2366_v20 = vpop.f32.mrf.mxu0 }
 0xafb   : > { %v1650_v21 = vsel %vm819_vm4, %v1648_v19, -inf }
 0xafc   : > { %1651 = vmax.xlane.f32.xlu0 %v1650_v21  ;;  %v1595_v23 = vpop.f32.mrf.mxu0 }
 0xafd   : > { %2371 = vmatmul.mubr.msk.bf16.vlgmr.msra.gmra.mxu1 %vm721_vm3, %v1599_v22 }
 0xafe   : > { %v2367_v24 = vpop.f32.mrf.mxu0  ;;  %2382 = vmatprep.mubr.msk.bf16.mxu1 %vm2488_vm2, %v2487_v9 }
 0xaff   : > { %v2195_v24 = vld [vmem:[%s578_s2] ss:$0 sm:$0xff] }
 0xb85   : > { %v1652_v25 = vpop.xlane.xlu0 %1651 }
 0xb86   : > { %v1656_v27 = vsub.f32 %v1648_v19, %v1652_v25  ;;  %v2436_v19 = vld [vmem:[%s2618_s3] sm:$0xff]  }
 0xb88   : > { %v1658_v28 = vmul.f32 1.442695, %v1656_v27  ;;  %v2196_v27 = vld [vmem:[%s581_s20] ss:$0 sm:$0xff] }
 0xb8a   : > { %2467 = vpow2.f32 %v1658_v28 }
 0xb97   : > { %v2468_v30 = vpop.eup %2467 }
 0xb98   : > { %v1662_v31 = vsel %vm819_vm4, %v2468_v30, 0.0 }
 0xb99   : > { %1663 = vadd.xlane.f32.xlu0 %v1662_v31 }
 0xbb5   : > { %v1541_v32 = vpop.f32.mrf.mxu1 }
 0xbb6   : > { %v1547_v33 = vadd.f32 %v1541_v32, %v2778_v38  ;;  %v2437_v32 = vld [vmem:[%s2628_s14 + $0x18] sm:$0xff]  }
 0xbb7   : > { %v2360_v34 = vpop.f32.mrf.mxu1 }
 0xbb8   : > { %v2439_v34 = vld [vmem:[%s2628_s14 + $0x8] sm:$0xff]  }
 0xbb9   : > { %v1544_v35 = vpop.f32.mrf.mxu1 }
 0xbba   : > { %v2440_v35 = vld [vmem:[%s2628_s14] sm:$0xff]  }
 0xbbb   : > { %v2361_v36 = vpop.f32.mrf.mxu1 }
 0xbbc   : > { %v2197_v36 = vld [vmem:[%s589_s5] ss:$0 sm:$0xff] }
 0xbbd   : > { %v1642_v39 = vpop.f32.mrf.mxu1 }
 0xbbe   : > { %v1649_v40 = vmul.f32 0.35355338, %v1642_v39 }
 0xbbf   : > { %v2372_v41 = vpop.f32.mrf.mxu1 }
 0xbc0   : > { %v1653_v42 = vsel %vm819_vm4, %v1649_v40, -inf }
 0xbc1   : > { %1654 = vmax.xlane.f32.xlu1 %v1653_v42  ;;  %v1645_v43 = vpop.f32.mrf.mxu1 }
 0xbc3   : > { %v2373_v44 = vpop.f32.mrf.mxu1 }
 0xbd2   : > { %1722 = vrot.lane.b32.xlu1 %v2680_v29, %s2499_s24 }
 0xc22   : > { %v1664_v49 = vpop.xlane.xlu0 %1663 }
 0xc4a   : > { %v1655_v45 = vpop.xlane.xlu1 %1654 }
 0xc4b   : > { %v1657_v46 = vsub.f32 %v1649_v40, %v1655_v45 }
 0xc4d   : > { %v1660_v47 = vmul.f32 1.442695, %v1657_v46 }
 0xc4e   : > { %v1723_v1 = vpop.permute.xlu1 %1722 }
 0xc4f   : > { %2469 = vpow2.f32 %v1660_v47  ;;  %v1728_v38 = vsel %vm850_vm5, %v1723_v1, 0 }
 0xc50   : > { %2381 = vmatpush3.bf16.msra.mxu1 %v1728_v38  ;;  %2471 = vrcp.f32 %v1664_v49 }
 0xc51   : > { %2392 = vmatprep.subr.bf16.mxu1 %v2487_v9 }
 0xc5c   : > { %v2470_v37 = vpop.eup %2469 }
 0xc5d   : > { %v1665_v48 = vsel %vm819_vm4, %v2470_v37, 0.0  ;;  %v2472_v50 = vpop.eup %2471 }
 0xc5e   : > { %1666 = vadd.xlane.f32.xlu0 %v1665_v48  ;;  %v1670_v51 = vmul.f32 %v2472_v50, %v2468_v30 }
 0xc60   : > { %v1672_v54 = vpack.c.bf16 %v1670_v51, %v1670_v51 }
 0xc74   : > { %1674 = vrot.lane.b32.xlu0 %v2677_v26, %s2499_s24 }
 0xce7   : > { %v1667_v29 = vpop.xlane.xlu0 %1666 }
 0xce8   : > { %2473 = vrcp.f32 %v1667_v29  ;;  %v2206_v29 = vld [vmem:[%s597_s18] ss:$0 sm:$0xff] }
 0xceb   : > { %v1675_v52 = vpop.permute.xlu0 %1674 }
 0xcec   : > { %v1680_v53 = vsel %vm850_vm5, %v1675_v52, 0 }
 0xced   : > { %2375 = vmatpush3.bf16.msra.mxu0 %v1680_v53 }
 0xcee   : > { %2386 = vmatprep.subr.bf16.mxu0 %v2487_v9 }
 0xcf0   : > { %2377 = vmatmul.mubr.msk.bf16.vlgmr.msra.gmra.mxu0 %vm846_vm6, %v1672_v54 }
 0xcf1   : > { %2388 = vmatprep.mubr.msk.bf16.mxu0 %vm2488_vm2, %v2487_v9  ;;  %2387 = vmatpush3.bf16.msra.mxu0 %v1781_v58 }
 0xcf2   : > { %2400 = vmatprep.subr.bf16.mxu0 %v2487_v9 }
 0xcf5   : > { %v2474_v26 = vpop.eup %2473 }
 0xcf6   : > { %v1671_v55 = vmul.f32 %v2474_v26, %v2470_v37 }
 0xcf8   : > { %v1673_v56 = vpack.c.bf16 %v1671_v55, %v1671_v55 }
 0xcfa   : > { %2383 = vmatmul.mubr.msk.bf16.vlgmr.msra.gmra.mxu1 %vm846_vm6, %v1673_v56 }
 0xcfb   : > { %2396 = vmatprep.mubr.msk.bf16.mxu1 %vm2488_vm2, %v2487_v9  ;;  %2393 = vmatpush3.bf16.msra.mxu1 %v2435_v18 }
 0xcfc   : > { %2394 = vmatprep.subr.bf16.mxu1 %v2487_v9 }
 0xcff   : > { %2395 = vmatpush3.bf16.msra.mxu1 %v2436_v19 }
 0xdb0   : > { %v1716_v59 = vpop.f32.mrf.mxu0 }
 0xdb2   : > { %v2378_v60 = vpop.f32.mrf.mxu0 }
 0xdb4   : > { %v1719_v61 = vpop.f32.mrf.mxu0 }
 0xdb6   : > { %v2379_v62 = vpop.f32.mrf.mxu0 }
 0xdba   : > { %v1764_v63 = vpop.f32.mrf.mxu1 }
 0xdbb   : > { %v1772_v0 = vcombine.low %v1716_v59, %v1764_v63 }
 0xdbc   : > { %v2384_v2 = vpop.f32.mrf.mxu1 }
 0xdbd   : > { %v1774_v3 = vpack.c.bf16 %v1772_v0, %v1772_v0 }
 0xdbe   : > { %v1767_v4 = vpop.f32.mrf.mxu1 }
 0xdbf   : > { %2389 = vmatmul.mubr.msk.bf16.vlgmr.msra.gmra.mxu0 %vm721_vm3, %v1774_v3 }
 0xdc0   : > { %v2385_v5 = vpop.f32.mrf.mxu1  ;;  %2408 = vmatprep.mubr.msk.bf16.mxu0 %vm2488_vm2, %v2487_v9  ;;  %2401 = vmatpush3.bf16.msra.mxu0 %v2437_v32 }
 0xdc1   : > { %2402 = vmatprep.subr.bf16.mxu0 %v2487_v9 }
 0xe7f   : > { %v1817_v6 = vpop.f32.mrf.mxu0 }
 0xe80   : > { %v1823_v7 = vadd.f32 %v1817_v6, %v1547_v33  ;;  %v2438_v33 = vld [vmem:[%s2628_s14 + $0x10] sm:$0xff]  }
 0xe81   : > { %v2390_v8 = vpop.f32.mrf.mxu0  ;;  %2403 = vmatpush3.bf16.msra.mxu0 %v2438_v33 }
 0xe82   : > { %v1826_v10 = vsel %vm609_vm1, %v1823_v7, 0.0  ;;  %2404 = vmatprep.subr.bf16.mxu0 %v2487_v9 }
 0xe83   : > { %1827 = vadd.xlane.f32.xlu1 %v1826_v10  ;;  %v1820_v11 = vpop.f32.mrf.mxu0 }
 0xe85   : > { %v2391_v12 = vpop.f32.mrf.mxu0  ;;  %2405 = vmatpush3.bf16.msra.mxu0 %v2439_v34 }
 0xe86   : > { %2406 = vmatprep.subr.bf16.mxu0 %v2487_v9 }
 0xe89   : > { %2407 = vmatpush3.bf16.msra.mxu0 %v2440_v35 }
 0xf0c   : > { %v1828_v13 = vpop.xlane.xlu1 %1827 }
 0xf0d   : > { %v1829_v14 = vmul.f32 0.03125, %v1828_v13 }
 0xf0f   : > { %v1830_v15 = vsub.f32 %v1823_v7, %v1829_v14 }
 0xf11   : > { %v1831_v16 = vmul.f32 %v1830_v15, %v1830_v15 }
 0xf13   : > { %v1832_v17 = vsel %vm609_vm1, %v1831_v16, 0.0 }
 0xf14   : > { %1833 = vadd.xlane.f32.xlu0 %v1832_v17 }
 0xf9d   : > { %v1834_v20 = vpop.xlane.xlu0 %1833 }
 0xf9e   : > { %v1835_v21 = vmul.f32 0.03125, %v1834_v20 }
 0xfa0   : > { %v1836_v22 = vadd.f32 1e-06, %v1835_v21 }
 0xfa2   : > { %2475 = vrsqrt.f32 %v1836_v22 }
 0xfaf   : > { %v2476_v23 = vpop.eup %2475 }
 0xfb0   : > { %v1838_v25 = vmul.f32 %v2476_v23, %v1830_v15 }
 0xfb2   : > { %v1845_v28 = vmul.f32 %v2195_v24, %v1838_v25 }
 0xfb4   : > { %v1852_v30 = vadd.f32 %v2196_v27, %v1845_v28 }
 0xfb6   : > { %v1853_v31 = vpack.c.bf16 %v1852_v30, %v1852_v30 }
 0xfb8   : > { %2397 = vmatmul.mubr.msk.bf16.vlgmr.msra.gmra.mxu1 %vm609_vm1, %v1853_v31 }
0x1078   : > { %v1914_v39 = vpop.f32.mrf.mxu1 }
0x1079   : > { %v1915_v40 = vadd.f32 %v2197_v36, %v1914_v39 }
0x107a   : > { %v2398_v41 = vpop.f32.mrf.mxu1 }
0x107b   : > { %v1920_v42 = vmul.f32 %v1915_v40, %v1915_v40 }
0x107c   : > { %v1917_v43 = vpop.f32.mrf.mxu1 }
0x107d   : > { %v1921_v44 = vmul.f32 %v1920_v42, %v1915_v40 }
0x107e   : > { %v2399_v45 = vpop.f32.mrf.mxu1 }
0x107f   : > { %v1922_v46 = vmul.f32 0.044715, %v1921_v44 }
0x1081   : > { %v1923_v47 = vadd.f32 %v1922_v46, %v1915_v40 }
0x1083   : > { %v1924_v1 = vmul.f32 0.7978846, %v1923_v47 }
0x1085   : > { %2477 = vtanh.f32 %v1924_v1 }
0x1092   : > { %v2478_v9 = vpop.eup %2477 }
0x1093   : > { %v1926_v38 = vadd.f32 1.0, %v2478_v9 }
0x1095   : > { %v1927_v37 = vmul.f32 0.5, %v1926_v38 }
0x1097   : > { %v1928_v48 = vmul.f32 %v1927_v37, %v1915_v40 }
0x1099   : > { %v1929_v49 = vpack.c.bf16 %v1928_v48, %v1928_v48 }
0x109b   : > { %2409 = vmatmul.mubr.msk.bf16.vlgmr.msra.gmra.mxu0 %vm1962_vm8, %v1929_v49 }
0x115b   : > { %v2000_v50 = vpop.f32.mrf.mxu0 }
0x115c   : > { %v2006_v51 = vadd.f32 %v2000_v50, %v1823_v7 }
0x115d   : > { %v2410_v52 = vpop.f32.mrf.mxu0 }
0x115e   : > { %v2014_v53 = vadd.f32 %v2206_v29, %v2006_v51 }
0x115f   : > { %v2003_v54 = vpop.f32.mrf.mxu0 }
0x1160   : > { %2015 = vst.msk [vmem:[%s2890_s13] sm:$0xff] %vm609_vm1, %v2014_v53 }
0x1161   : > { %v2411_v26 = vpop.f32.mrf.mxu0 }
0x1162 PF: > { %s2907_s30 = sld [smem:[#allocation2_spill]] }
0x1168   : > { %s23_s25 = sadd.s32 1, %s2907_s30  }
0x1169   : > { %p20_p5 = scmp.ge.s32.totalorder %s23_s25, 4  }
0x116b   :  { %22 = sbr.rel (!%p20_p5) target bundleno = 4 (0x4), region = 138 }

// kernel: paligemma_forward.8
= control target key start
LH: loop header
LB: loop body
LE: loop exit
PB: predicated region body
PF: predicated region fallthrough
CT: control target
= control target key end

     0   :  { %s2560_s30 = smov 0   ;;  %s3032_s0 = inlined_call_operand.vmem [shape: f32[16,32], index: 0, kind: input, shape index: {}]   ;;  %s3033_s1 = inlined_call_operand.vmem [shape: f32[16,8], index: 1, kind: input, shape index: {}]   ;;  %s3034_s2 = inlined_call_operand.vmem [shape: f32[16,8], index: 2, kind: input, shape index: {}]   ;;  %s3035_s3 = inlined_call_operand.vmem [shape: f32[2,1,32], index: 3, kind: input, shape index: {}]   ;;  %s3036_s4 = inlined_call_operand.vmem [shape: bf16[2,32,96], index: 4, kind: input, shape index: {}]   ;;  %s3037_s5 = inlined_call_operand.vmem [shape: bf16[2,4,8,32], index: 5, kind: input, shape index: {}]   ;;  %s3038_s6 = inlined_call_operand.vmem [shape: f32[2,1,32], index: 6, kind: input, shape index: {}]   ;;  %s3039_s7 = inlined_call_operand.vmem [shape: bf16[2,32,128], index: 7, kind: input, shape index: {}]   ;;  %s3040_s8 = inlined_call_operand.vmem [shape: bf16[2,64,32], index: 8, kind: input, shape index: {}]   ;;  %s3041_s9 = inlined_call_operand.vmem [shape: f32[16,32], index: 9, kind: output, shape index: {}]  }
   0x1 LB: > { %s2138_s10 = sadd.s32 4294967295, %s2482_s30   ;;  %p2141_p0 = scmp.ge.s32.totalorder %s2482_s30, 1  ;;  %s2482_s30 = sphi %s2560_s30, %s19_s30  }
   0x2   : > { %p328_p1 = scmp.lt.s32.totalorder %s2482_s30, 3 }
   0x4   : > { %p329_p2 = pnand %p2141_p0, %p328_p1 }
   0x5   : > { %p380_p3 = scmp.lt.s32.totalorder (!%p329_p2), %s2138_s10, 1  ;;  %p2150_p4 = scmp.ne.s32.totalorder (!%p329_p2), %s2138_s10, 0 }
   0x6   : > { %332 = sbr.rel (%p329_p2) target bundleno = 4579 (0x11e3), region = 56 }
   0xb   : > { %s2568_s11 = scalar_select %p380_p3, %s2138_s10, 1 }
   0xd   : > { %s382_s14 = scalar_lea.vmem %s3035_s3, %s2568_s11  ;;  %s2187_s15 = sshll.u32 %s2568_s11, 4 }
   0xe   : > { %s387_s18 = scalar_lea.vmem %s3036_s4, %s2187_s15  ;;  %s2581_s21 = scalar_lea.vmem %s3037_s5, %s2187_s15 }
   0xf   : > { %s395_s24 = scalar_lea.vmem %s3038_s6, %s2568_s11  ;;  %s2590_s27 = scalar_lea.vmem %s3039_s7, %s2187_s15 }
  0x10   : > { %s2190_s28 = sshll.u32 %s2568_s11, 5  ;;  %410 = sbr.rel (%p2150_p4) target bundleno = 23 (0x17), region = 60 }
  0x11   : > { %s2596_s13 = scalar_lea.vmem %s3040_s8, %s2190_s28 }
  0x15   : > { %v411_v0 = vld [vmem:[%s3032_s0] sm:$0xff]  ;;  %vm413_vm0 = vcmask 261120   ;;  %v412_v1 = vld [vmem:[%s3032_s0 + $0x8] sm:$0xff] }
  0x16   : > { %414 = vst.msk [vmem:[%s3041_s9] sm:$0xff] %vm413_vm0, %v411_v0  ;;  %415 = vst.msk [vmem:[%s3041_s9 + $0x8] sm:$0xff] %vm413_vm0, %v412_v1 }
  0x17 PF: > { %vm421_vm1 = vcmask 261120   ;;  %v2424_v8 = vld [vmem:[%s387_s18 + $0x8] sm:$0xff]   ;;  %v2484_v9 = vmov 0.0   ;;  %vm2485_vm2 = vmmov 0   ;;  %v2425_v10 = vld [vmem:[%s387_s18] sm:$0xff]   ;;  %v439_v17 = vlaneseq  ;;  %s2487_s16 = smov 92  }
  0x18   : > { %2242 = vmatprep.subr.bf16.mxu1 %v2484_v9  ;;  %2246 = vmatprep.mubr.msk.bf16.mxu1 %vm2485_vm2, %v2484_v9  ;;  %v418_v19 = vld [vmem:[%s382_s14] sm:$0x1]  ;;  %s2486_s14 = smov 100   ;;  %s2488_s17 = smov 124   ;;  %v2667_v35 = vld [vmem:[%s3033_s1 + $0x8] sm:$0xff]  ;;  %vm527_vm3 = vcmask 31744  }
  0x19   : > { %2243 = vmatpush3.bf16.msra.mxu1 %v2424_v8  ;;  %2256 = vmatprep.subr.bf16.mxu0 %v2484_v9  ;;  %v2634_v18 = vshrl.u32 %v439_v17, 7  ;;  %v437_v20 = vadd.f32 1.0, %v418_v19  ;;  %v2661_v34 = vld [vmem:[%s3033_s1] sm:$0xff]  ;;  %s2489_s22 = smov 32   ;;  %v2688_v42 = vld [vmem:[%s3034_s2 + $0x8] sm:$0xff]  ;;  %s2490_s29 = smov 96  }
  0x1a   : > { %2244 = vmatprep.subr.bf16.mxu1 %v2484_v9  ;;  %2258 = vmatprep.mubr.msk.bf16.mxu0 %vm2485_vm2, %v2484_v9  ;;  %v2673_v36 = vld [vmem:[%s3034_s2] sm:$0xff]  ;;  %s2491_s18 = smov 4   ;;  %vm579_vm4 = vcmask 64512   ;;  %s2492_s12 = smov 64   ;;  %vm707_vm5 = vcmask 1043456   ;;  %vm2007_vm6 = vcmask 523264  }
  0x1b   : > { %v441_v21 = vsub.s32 0, %v2634_v18  ;;  %s2496_s19 = smov 8   ;;  %s2497_s20 = smov 88   ;;  %v2430_v18 = vld [vmem:[%s2596_s13 + $0x8] sm:$0xff]  }
  0x1c   : > { %s2499_s15 = smov 56   ;;  %s2500_s23 = smov 76  }
  0x1d   : > { %v2613_v2 = vld [vmem:[%s3041_s9] sm:$0xff]  ;;  %v2618_v3 = vld [vmem:[%s3041_s9 + $0x8] sm:$0xff]  ;;  %2245 = vmatpush3.bf16.msra.mxu1 %v2425_v10  ;;  %v442_v24 = vrot.slane %v437_v20, %v441_v21  ;;  %s2501_s25 = smov 108   ;;  %s2502_s10 = smov 48  }
  0x1e   : > { %v419_v4 = vmul.f32 %v2613_v2, %v2613_v2  ;;  %v420_v5 = vmul.f32 %v2618_v3, %v2618_v3  ;;  %2250 = vmatprep.subr.bf16.mxu1 %v2484_v9  ;;  %s2503_s26 = smov 16   ;;  %s2504_s28 = smov 80  }
  0x20   : > { %v422_v6 = vsel %vm421_vm1, %v419_v4, 0.0  ;;  %v425_v7 = vsel %vm421_vm1, %v420_v5, 0.0 }
  0x21   : > { %423 = vadd.xlane.f32.xlu0 %v422_v6 }
  0x25   : > { %426 = vadd.xlane.f32.xlu0 %v425_v7 }
  0xaa   : > { %v424_v11 = vpop.xlane.xlu0 %423 }
  0xab   : > { %v429_v12 = vmul.f32 0.03125, %v424_v11 }
  0xad   : > { %v431_v13 = vadd.f32 1e-06, %v429_v12 }
  0xae   : > { %v427_v14 = vpop.xlane.xlu0 %426 }
  0xaf   : > { %2432 = vrsqrt.f32 %v431_v13  ;;  %v430_v15 = vmul.f32 0.03125, %v427_v14 }
  0xb1   : > { %v432_v16 = vadd.f32 1e-06, %v430_v15 }
  0xb3   : > { %2434 = vrsqrt.f32 %v432_v16 }
  0xbc   : > { %v2433_v22 = vpop.eup %2432 }
  0xbd   : > { %v435_v23 = vmul.f32 %v2433_v22, %v2613_v2 }
  0xbf   : > { %v444_v27 = vmul.f32 %v442_v24, %v435_v23 }
  0xc0   : > { %v2435_v25 = vpop.eup %2434 }
  0xc1   : > { %v436_v26 = vmul.f32 %v2435_v25, %v2618_v3 }
  0xc3   : > { %v445_v28 = vmul.f32 %v442_v24, %v436_v26 }
  0xc5   : > { %v446_v29 = vpack.c.bf16 %v445_v28, %v444_v27 }
  0xc7   : > { %2247 = vmatmul.mubr.msk.bf16.vlgmr.msra.gmra.mxu1 %vm421_vm1, %v446_v29 }
  0xc8   : > { %2252 = vmatprep.mubr.msk.bf16.mxu1 %vm2485_vm2, %v2484_v9 }
 0x187   : > { %v2649_v30 = vpop.f32.mrf.mxu1 }
 0x188   : > { %550 = vrot.lane.b32.xlu0 %v2649_v30, %s2486_s14  ;;  %544 = vrot.lane.b32.xlu1 %v2649_v30, %s2487_s16  ;;  %v511_v62 = vmul.f32 %v2661_v34, %v2649_v30 }
 0x189   : > { %v2248_v31 = vpop.f32.mrf.mxu1 }
 0x18b   : > { %v2653_v32 = vpop.f32.mrf.mxu1 }
 0x18c   : > { %517 = vrot.lane.b32.xlu0 %v2653_v32, %s2488_s17  ;;  %546 = vrot.lane.b32.xlu1 %v2653_v32, %s2487_s16  ;;  %v512_v8 = vmul.f32 %v2667_v35, %v2653_v32  ;;  %s2494_s16 = smov 116  }
 0x18d   : > { %v2249_v33 = vpop.f32.mrf.mxu1 }
 0x190   : > { %552 = vrot.lane.b32.xlu1 %v2653_v32, %s2486_s14  ;;  %s2493_s14 = smov 84  }
 0x194   : > { %536 = vrot.lane.b32.xlu1 %v2661_v34, %s2489_s22 }
 0x198   : > { %538 = vrot.lane.b32.xlu1 %v2667_v35, %s2489_s22 }
 0x1fa   : > { %v2675_v37 = vpop.permute.xlu0 %550  ;;  %v2677_v38 = vpop.permute.xlu1 %544 }
 0x1fb   : > { %v556_v39 = vsel %vm527_vm3, %v2677_v38, %v2675_v37 }
 0x1fc   : > { %v558_v40 = vmul.f32 %v556_v39, %v2673_v36 }
 0x1fe   : > { %562 = vrot.lane.b32.xlu1 %v558_v40, %s2489_s22  ;;  %v2683_v41 = vpop.permute.xlu1 %546  ;;  %v2705_v59 = vpop.permute.xlu0 %517 }
 0x202   : > { %v2690_v43 = vpop.permute.xlu1 %552 }
 0x203   : > { %v557_v44 = vsel %vm527_vm3, %v2683_v41, %v2690_v43 }
 0x204   : > { %v559_v45 = vmul.f32 %v557_v44, %v2688_v42 }
 0x206   : > { %564 = vrot.lane.b32.xlu1 %v559_v45, %s2489_s22  ;;  %v537_v46 = vpop.permute.xlu1 %536  ;;  %s2498_s22 = smov 120  }
 0x207   : > { %v542_v48 = vmul.f32 %v537_v46, %v2649_v30 }
 0x20a   : > { %515 = vrot.lane.b32.xlu1 %v2649_v30, %s2488_s17  ;;  %v539_v47 = vpop.permute.xlu1 %538  ;;  %s2495_s17 = smov 40  }
 0x20b   : > { %v543_v52 = vmul.f32 %v539_v47, %v2653_v32  ;;  %v2731_v47 = vpack.c.bf16 %v2649_v30, %v2649_v30 }
 0x270   : > { %v563_v49 = vpop.permute.xlu1 %562 }
 0x271   : > { %v568_v50 = vadd.f32 %v563_v49, %v542_v48  ;;  %v2737_v48 = vpack.c.bf16 %v2653_v32, %v2653_v32 }
 0x273   : > { %v572_v51 = vpack.c.bf16 %v568_v50, %v568_v50 }
 0x275   : > { %577 = vrot.lane.b32.xlu1 %v572_v51, %s2490_s29 }
 0x278   : > { %v565_v53 = vpop.permute.xlu1 %564 }
 0x279   : > { %v569_v54 = vadd.f32 %v565_v53, %v543_v52  ;;  %521 = vrot.lane.b32.xlu1 %v2649_v30, %s2491_s18 }
 0x27b   : > { %v573_v55 = vpack.c.bf16 %v569_v54, %v569_v54 }
 0x27c   : > { %v2701_v56 = vpop.permute.xlu1 %515 }
 0x27d   : > { %627 = vrot.lane.b32.xlu0 %v573_v55, %s2490_s29  ;;  %s2505_s29 = smov 112  }
 0x281   : > { %523 = vrot.lane.b32.xlu0 %v2653_v32, %s2491_s18  ;;  %s2506_s18 = smov 68  }
 0x2e7   : > { %v578_v57 = vpop.permute.xlu1 %577 }
 0x2e8   : > { %v584_v58 = vsel %vm579_vm4, %v578_v57, 0 }
 0x2e9   : > { %2251 = vmatpush3.bf16.xpose.msra.mxu1 %v584_v58 }
 0x2ea   : > { %2262 = vmatprep.subr.bf16.mxu1 %v2484_v9 }
 0x2eb   : > { %v522_v60 = vpop.permute.xlu1 %521 }
 0x2ec   : > { %v528_v61 = vsel %vm527_vm3, %v2701_v56, %v522_v60 }
 0x2ed   : > { %v530_v63 = vmul.f32 %v528_v61, %v2673_v36 }
 0x2ef   : > { %v532_v0 = vadd.f32 %v530_v63, %v511_v62  ;;  %v628_v1 = vpop.permute.xlu0 %627 }
 0x2f0   : > { %v633_v4 = vsel %vm579_vm4, %v628_v1, 0 }
 0x2f1   : > { %v570_v5 = vpack.c.bf16 %v532_v0, %v532_v0  ;;  %2257 = vmatpush3.bf16.xpose.msra.mxu0 %v633_v4 }
 0x2f2   : > { %2268 = vmatprep.subr.bf16.mxu0 %v2484_v9 }
 0x2f3   : > { %v524_v6 = vpop.permute.xlu0 %523  ;;  %2253 = vmatmul.mubr.msk.bf16.vlgmr.msra.gmra.mxu1 %vm579_vm4, %v570_v5 }
 0x2f4   : > { %v529_v7 = vsel %vm527_vm3, %v2705_v59, %v524_v6  ;;  %2264 = vmatprep.mubr.msk.bf16.mxu1 %vm2485_vm2, %v2484_v9 }
 0x2f5   : > { %v531_v10 = vmul.f32 %v529_v7, %v2688_v42 }
 0x2f7   : > { %v533_v11 = vadd.f32 %v531_v10, %v512_v8 }
 0x2f9   : > { %v571_v12 = vpack.c.bf16 %v533_v11, %v533_v11  ;;  %v801_v11 = vld [vmem:[%s2581_s21] sm:$0xf] }
 0x2fb   : > { %2259 = vmatmul.mubr.msk.bf16.vlgmr.msra.gmra.mxu0 %vm579_vm4, %v571_v12  ;;  %v806_v12 = vsel %vm707_vm5, %v801_v11, 0 }
 0x2fc   : > { %2270 = vmatprep.mubr.msk.bf16.mxu0 %vm2485_vm2, %v2484_v9 }
 0x3b3   : > { %v620_v13 = vpop.f32.mrf.mxu1 }
 0x3b4   : > { %v675_v14 = vmul.f32 0.35355338, %v620_v13 }
 0x3b5   : > { %v2254_v15 = vpop.f32.mrf.mxu1 }
 0x3b6   : > { %v677_v16 = vsel %vm579_vm4, %v675_v14, -inf }
 0x3b7   : > { %678 = vmax.xlane.f32.xlu1 %v677_v16  ;;  %v623_v17 = vpop.f32.mrf.mxu1 }
 0x3b9   : > { %v2255_v19 = vpop.f32.mrf.mxu1 }
 0x3bb   : > { %v669_v20 = vpop.f32.mrf.mxu0 }
 0x3bc   : > { %v676_v22 = vmul.f32 0.35355338, %v669_v20 }
 0x3bd   : > { %v2260_v23 = vpop.f32.mrf.mxu0 }
 0x3be   : > { %v680_v24 = vsel %vm579_vm4, %v676_v22, -inf }
 0x3bf   : > { %681 = vmax.xlane.f32.xlu0 %v680_v24  ;;  %v672_v25 = vpop.f32.mrf.mxu0 }
 0x3c1   : > { %v2261_v26 = vpop.f32.mrf.mxu0 }
 0x440   : > { %v679_v27 = vpop.xlane.xlu1 %678 }
 0x441   : > { %v683_v28 = vsub.f32 %v675_v14, %v679_v27 }
 0x443   : > { %v685_v29 = vmul.f32 1.442695, %v683_v28 }
 0x445   : > { %2436 = vpow2.f32 %v685_v29 }
 0x448   : > { %v682_v31 = vpop.xlane.xlu0 %681 }
 0x449   : > { %v684_v33 = vsub.f32 %v676_v22, %v682_v31 }
 0x44b   : > { %v687_v39 = vmul.f32 1.442695, %v684_v33 }
 0x44d   : > { %2438 = vpow2.f32 %v687_v39 }
 0x452   : > { %v2437_v40 = vpop.eup %2436 }
 0x453   : > { %v689_v44 = vsel %vm579_vm4, %v2437_v40, 0.0 }
 0x454   : > { %690 = vadd.xlane.f32.xlu0 %v689_v44 }
 0x45a   : > { %v2439_v45 = vpop.eup %2438 }
 0x45b   : > { %v692_v46 = vsel %vm579_vm4, %v2439_v45, 0.0 }
 0x45c   : > { %693 = vadd.xlane.f32.xlu1 %v692_v46 }
 0x46a   : > { %702 = vrot.lane.b32.xlu0 %v2731_v47, %s2492_s12 }
 0x46d   : > { %752 = vrot.lane.b32.xlu1 %v2737_v48, %s2492_s12 }
 0x46e   : > { %889 = vrot.lane.b32.xlu0 %v2653_v32, %s2493_s14 }
 0x471   : > { %887 = vrot.lane.b32.xlu1 %v2649_v30, %s2493_s14  ;;  %s2507_s14 = smov 24  }
 0x472   : > { %861 = vrot.lane.b32.xlu0 %v2653_v32, %s2494_s16 }
 0x475   : > { %859 = vrot.lane.b32.xlu1 %v2649_v30, %s2494_s16  ;;  %s2508_s16 = smov 72  }
 0x476   : > { %881 = vrot.lane.b32.xlu0 %v2667_v35, %s2495_s17 }
 0x479   : > { %879 = vrot.lane.b32.xlu1 %v2661_v34, %s2495_s17 }
 0x4dd   : > { %v691_v49 = vpop.xlane.xlu0 %690 }
 0x4de   : > { %2440 = vrcp.f32 %v691_v49 }
 0x4e1   : > { %v703_v50 = vpop.permute.xlu0 %702 }
 0x4e2   : > { %v709_v51 = vsel %vm707_vm5, %v703_v50, 0 }
 0x4e3   : > { %2263 = vmatpush3.bf16.msra.mxu1 %v709_v51 }
 0x4e4   : > { %2274 = vmatprep.subr.bf16.mxu1 %v2484_v9 }
 0x4e5   : > { %v2751_v52 = vpop.permute.xlu0 %889  ;;  %v694_v53 = vpop.xlane.xlu1 %693 }
 0x4e6   : > { %v894_v54 = vsel %vm527_vm3, %v2751_v52, %v2683_v41  ;;  %2442 = vrcp.f32 %v694_v53 }
 0x4e7   : > { %v896_v55 = vmul.f32 %v894_v54, %v2688_v42 }
 0x4e9   : > { %901 = vrot.lane.b32.xlu0 %v896_v55, %s2495_s17  ;;  %v2758_v57 = vpop.permute.xlu0 %861  ;;  %v753_v58 = vpop.permute.xlu1 %752 }
 0x4ea   : > { %v758_v60 = vsel %vm707_vm5, %v753_v58, 0  ;;  %v866_v62 = vsel %vm527_vm3, %v2758_v57, %v2705_v59 }
 0x4eb   : > { %v2441_v61 = vpop.eup %2440  ;;  %2269 = vmatpush3.bf16.msra.mxu0 %v758_v60  ;;  %v868_v4 = vmul.f32 %v866_v62, %v2688_v42 }
 0x4ec   : > { %v697_v63 = vmul.f32 %v2441_v61, %v2437_v40  ;;  %2280 = vmatprep.subr.bf16.mxu0 %v2484_v9 }
 0x4ed   : > { %853 = vrot.lane.b32.xlu0 %v2667_v35, %s2496_s19  ;;  %v2766_v41 = vpop.permute.xlu1 %887  ;;  %v882_v13 = vpop.permute.xlu0 %881 }
 0x4ee   : > { %v893_v0 = vsel %vm527_vm3, %v2766_v41, %v2677_v38  ;;  %v699_v1 = vpack.c.bf16 %v697_v63, %v697_v63 }
 0x4ef   : > { %v895_v5 = vmul.f32 %v893_v0, %v2673_v36 }
 0x4f0   : > { %2265 = vmatmul.mubr.msk.bf16.vlgmr.msra.gmra.mxu1 %vm579_vm4, %v699_v1 }
 0x4f1   : > { %873 = vrot.lane.b32.xlu0 %v868_v4, %s2496_s19  ;;  %899 = vrot.lane.b32.xlu1 %v895_v5, %s2495_s17  ;;  %v2775_v59 = vpop.permute.xlu1 %859 }
 0x4f2   : > { %2276 = vmatprep.mubr.msk.bf16.mxu1 %vm2485_vm2, %v2484_v9  ;;  %v865_v38 = vsel %vm527_vm3, %v2775_v59, %v2701_v56  ;;  %2275 = vmatpush3.bf16.msra.mxu1 %v806_v12  ;;  %v886_v56 = vmul.f32 %v882_v13, %v2653_v32 }
 0x4f3   : > { %v2443_v6 = vpop.eup %2442  ;;  %v867_v10 = vmul.f32 %v865_v38, %v2673_v36  ;;  %2286 = vmatprep.subr.bf16.mxu1 %v2484_v9 }
 0x4f4   : > { %v698_v7 = vmul.f32 %v2443_v6, %v2439_v45 }
 0x4f5   : > { %851 = vrot.lane.b32.xlu1 %v2661_v34, %s2496_s19  ;;  %v880_v17 = vpop.permute.xlu1 %879 }
 0x4f6   : > { %v700_v8 = vpack.c.bf16 %v698_v7, %v698_v7  ;;  %v885_v20 = vmul.f32 %v880_v17, %v2649_v30 }
 0x4f8   : > { %2271 = vmatmul.mubr.msk.bf16.vlgmr.msra.gmra.mxu0 %vm579_vm4, %v700_v8 }
 0x4f9   : > { %871 = vrot.lane.b32.xlu1 %v867_v10, %s2496_s19  ;;  %2282 = vmatprep.mubr.msk.bf16.mxu0 %vm2485_vm2, %v2484_v9  ;;  %s2509_s19 = smov 104  }
 0x55b   : > { %v902_v14 = vpop.permute.xlu0 %901 }
 0x55c   : > { %v906_v15 = vadd.f32 %v902_v14, %v886_v56 }
 0x55e   : > { %v910_v16 = vpack.c.bf16 %v906_v15, %v906_v15 }
 0x55f   : > { %v854_v19 = vpop.permute.xlu0 %853 }
 0x560   : > { %967 = vrot.lane.b32.xlu0 %v910_v16, %s2497_s20  ;;  %v858_v22 = vmul.f32 %v854_v19, %v2653_v32 }
 0x563   : > { %v874_v23 = vpop.permute.xlu0 %873  ;;  %v900_v24 = vpop.permute.xlu1 %899 }
 0x564   : > { %v878_v25 = vadd.f32 %v874_v23, %v858_v22  ;;  %v905_v26 = vadd.f32 %v900_v24, %v885_v20 }
 0x566   : > { %v908_v27 = vpack.c.bf16 %v878_v25, %v878_v25  ;;  %v909_v28 = vpack.c.bf16 %v905_v26, %v905_v26 }
 0x567   : > { %v852_v29 = vpop.permute.xlu1 %851 }
 0x568   : > { %964 = vrot.lane.b32.xlu0 %v908_v27, %s2498_s22  ;;  %915 = vrot.lane.b32.xlu1 %v909_v28, %s2497_s20  ;;  %v857_v31 = vmul.f32 %v852_v29, %v2649_v30 }
 0x56b   : > { %v872_v33 = vpop.permute.xlu1 %871 }
 0x56c   : > { %v877_v39 = vadd.f32 %v872_v33, %v857_v31 }
 0x56e   : > { %v907_v40 = vpack.c.bf16 %v877_v39, %v877_v39 }
 0x570   : > { %912 = vrot.lane.b32.xlu1 %v907_v40, %s2498_s22 }
 0x5b0   : > { %v745_v44 = vpop.f32.mrf.mxu1 }
 0x5b2   : > { %v2266_v45 = vpop.f32.mrf.mxu1 }
 0x5b4   : > { %v748_v46 = vpop.f32.mrf.mxu1 }
 0x5b6   : > { %v2267_v49 = vpop.f32.mrf.mxu1 }
 0x5b8   : > { %v794_v50 = vpop.f32.mrf.mxu0 }
 0x5b9   : > { %v800_v51 = vpack.c.bf16 %v794_v50, %v745_v44 }
 0x5ba   : > { %v2272_v53 = vpop.f32.mrf.mxu0 }
 0x5bb   : > { %2277 = vmatmul.mubr.msk.bf16.vlgmr.msra.gmra.mxu1 %vm579_vm4, %v800_v51 }
 0x5bc   : > { %v797_v54 = vpop.f32.mrf.mxu0  ;;  %2288 = vmatprep.mubr.msk.bf16.mxu1 %vm2485_vm2, %v2484_v9 }
 0x5be   : > { %v2273_v55 = vpop.f32.mrf.mxu0 }
 0x5d2   : > { %v968_v58 = vpop.permute.xlu0 %967 }
 0x5d3   : > { %v973_v60 = vsel %vm579_vm4, %v968_v58, 0 }
 0x5d4   : > { %2287 = vmatpush3.bf16.xpose.msra.mxu1 %v973_v60 }
 0x5d5   : > { %2298 = vmatprep.subr.bf16.mxu1 %v2484_v9 }
 0x5da   : > { %v965_v61 = vpop.permute.xlu0 %964  ;;  %v916_v62 = vpop.permute.xlu1 %915 }
 0x5db   : > { %v921_v63 = vsel %vm579_vm4, %v916_v62, 0  ;;  %2289 = vmatmul.mubr.msk.bf16.vlgmr.msra.gmra.mxu1 %vm579_vm4, %v965_v61 }
 0x5dc   : > { %2281 = vmatpush3.bf16.xpose.msra.mxu0 %v921_v63  ;;  %2300 = vmatprep.mubr.msk.bf16.mxu1 %vm2485_vm2, %v2484_v9 }
 0x5dd   : > { %2292 = vmatprep.subr.bf16.mxu0 %v2484_v9 }
 0x5e2   : > { %v913_v0 = vpop.permute.xlu1 %912 }
 0x5e3   : > { %2283 = vmatmul.mubr.msk.bf16.vlgmr.msra.gmra.mxu0 %vm579_vm4, %v913_v0 }
 0x5e4   : > { %2294 = vmatprep.mubr.msk.bf16.mxu0 %vm2485_vm2, %v2484_v9 }
 0x67b   : > { %v2807_v1 = vpop.f32.mrf.mxu1 }
 0x67d   : > { %v2278_v4 = vpop.f32.mrf.mxu1 }
 0x67f   : > { %v2809_v5 = vpop.f32.mrf.mxu1 }
 0x681   : > { %v2279_v6 = vpop.f32.mrf.mxu1 }
 0x69b   : > { %v1009_v38 = vpop.f32.mrf.mxu1 }
 0x69c   : > { %v1016_v7 = vmul.f32 0.35355338, %v1009_v38  ;;  %v2163_v38 = vld [vmem:[%s2581_s21 + $0x4] sm:$0xf] }
 0x69d   : > { %v2290_v8 = vpop.f32.mrf.mxu1 }
 0x69e   : > { %v1020_v10 = vsel %vm579_vm4, %v1016_v7, -inf }
 0x69f   : > { %1021 = vmax.xlane.f32.xlu0 %v1020_v10  ;;  %v1012_v11 = vpop.f32.mrf.mxu1 }
 0x6a1   : > { %v2291_v12 = vpop.f32.mrf.mxu1 }
 0x6a3   : > { %v957_v13 = vpop.f32.mrf.mxu0 }
 0x6a4   : > { %v1015_v56 = vmul.f32 0.35355338, %v957_v13 }
 0x6a5   : > { %v2284_v14 = vpop.f32.mrf.mxu0 }
 0x6a6   : > { %v1017_v15 = vsel %vm579_vm4, %v1015_v56, -inf }
 0x6a7   : > { %1018 = vmax.xlane.f32.xlu1 %v1017_v15  ;;  %v960_v16 = vpop.f32.mrf.mxu0 }
 0x6a9   : > { %v2285_v17 = vpop.f32.mrf.mxu0 }
 0x728   : > { %v1022_v19 = vpop.xlane.xlu0 %1021 }
 0x729   : > { %v1024_v20 = vsub.f32 %v1016_v7, %v1022_v19  ;;  %v1144_v7 = vsel %vm707_vm5, %v2163_v38, 0 }
 0x72b   : > { %v1027_v22 = vmul.f32 1.442695, %v1024_v20 }
 0x72d   : > { %2444 = vpow2.f32 %v1027_v22 }
 0x730   : > { %v1019_v23 = vpop.xlane.xlu1 %1018 }
 0x731   : > { %v1023_v24 = vsub.f32 %v1015_v56, %v1019_v23 }
 0x733   : > { %v1025_v25 = vmul.f32 1.442695, %v1023_v24 }
 0x735   : > { %2446 = vpow2.f32 %v1025_v25 }
 0x73a   : > { %v2445_v26 = vpop.eup %2444 }
 0x73b   : > { %v1032_v27 = vsel %vm579_vm4, %v2445_v26, 0.0 }
 0x73c   : > { %1033 = vadd.xlane.f32.xlu1 %v1032_v27 }
 0x742   : > { %v2447_v28 = vpop.eup %2446 }
 0x743   : > { %v1029_v29 = vsel %vm579_vm4, %v2447_v28, 0.0 }
 0x744   : > { %1030 = vadd.xlane.f32.xlu0 %v1029_v29 }
 0x74d   : > { %1089 = vrot.lane.b32.xlu1 %v2737_v48, %s2499_s15 }
 0x751   : > { %1225 = vrot.lane.b32.xlu1 %v2649_v30, %s2500_s23 }
 0x755   : > { %1197 = vrot.lane.b32.xlu1 %v2649_v30, %s2501_s25 }
 0x759   : > { %1217 = vrot.lane.b32.xlu1 %v2661_v34, %s2502_s10 }
 0x75a   : > { %1041 = vrot.lane.b32.xlu0 %v2731_v47, %s2499_s15 }
 0x75e   : > { %1227 = vrot.lane.b32.xlu0 %v2653_v32, %s2500_s23 }
 0x762   : > { %1199 = vrot.lane.b32.xlu0 %v2653_v32, %s2501_s25 }
 0x766   : > { %1219 = vrot.lane.b32.xlu0 %v2667_v35, %s2502_s10 }
 0x7c5   : > { %v1034_v31 = vpop.xlane.xlu1 %1033 }
 0x7c6   : > { %2448 = vrcp.f32 %v1034_v31 }
 0x7c9   : > { %v1090_v33 = vpop.permute.xlu1 %1089 }
 0x7ca   : > { %v1095_v39 = vsel %vm707_vm5, %v1090_v33, 0 }
 0x7cb   : > { %2299 = vmatpush3.bf16.msra.mxu1 %v1095_v39 }
 0x7cc   : > { %2310 = vmatprep.subr.bf16.mxu1 %v2484_v9 }
 0x7cd   : > { %v2829_v40 = vpop.permute.xlu1 %1225  ;;  %v1031_v44 = vpop.xlane.xlu0 %1030 }
 0x7ce   : > { %v1231_v45 = vsel %vm527_vm3, %v2829_v40, %v2766_v41  ;;  %2450 = vrcp.f32 %v1031_v44 }
 0x7cf   : > { %v1233_v46 = vmul.f32 %v1231_v45, %v2673_v36 }
 0x7d1   : > { %1237 = vrot.lane.b32.xlu1 %v1233_v46, %s2502_s10  ;;  %v2836_v49 = vpop.permute.xlu1 %1197  ;;  %v1042_v50 = vpop.permute.xlu0 %1041 }
 0x7d2   : > { %v1047_v51 = vsel %vm707_vm5, %v1042_v50, 0  ;;  %v1203_v54 = vsel %vm527_vm3, %v2836_v49, %v2775_v59 }
 0x7d3   : > { %v2449_v53 = vpop.eup %2448  ;;  %2293 = vmatpush3.bf16.msra.mxu0 %v1047_v51  ;;  %v1205_v61 = vmul.f32 %v1203_v54, %v2673_v36 }
 0x7d4   : > { %v1038_v55 = vmul.f32 %v2449_v53, %v2445_v26  ;;  %2304 = vmatprep.subr.bf16.mxu0 %v2484_v9 }
 0x7d5   : > { %1189 = vrot.lane.b32.xlu1 %v2661_v34, %s2503_s26  ;;  %v2844_v41 = vpop.permute.xlu0 %1227  ;;  %v1218_v8 = vpop.permute.xlu1 %1217 }
 0x7d6   : > { %v1232_v58 = vsel %vm527_vm3, %v2844_v41, %v2751_v52  ;;  %v1040_v60 = vpack.c.bf16 %v1038_v55, %v1038_v55 }
 0x7d7   : > { %v1234_v62 = vmul.f32 %v1232_v58, %v2688_v42 }
 0x7d8   : > { %2301 = vmatmul.mubr.msk.bf16.vlgmr.msra.gmra.mxu1 %vm579_vm4, %v1040_v60 }
 0x7d9   : > { %1209 = vrot.lane.b32.xlu1 %v1205_v61, %s2503_s26  ;;  %1239 = vrot.lane.b32.xlu0 %v1234_v62, %s2502_s10  ;;  %v2853_v59 = vpop.permute.xlu0 %1199  ;;  %v849_v62 = vadd.f32 %v2807_v1, %v2613_v2 }
 0x7da   : > { %2312 = vmatprep.mubr.msk.bf16.mxu1 %vm2485_vm2, %v2484_v9  ;;  %v1204_v52 = vsel %vm527_vm3, %v2853_v59, %v2758_v57  ;;  %v1223_v57 = vmul.f32 %v1218_v8, %v2649_v30 }
 0x7db   : > { %v2451_v63 = vpop.eup %2450  ;;  %v1206_v6 = vmul.f32 %v1204_v52, %v2688_v42 }
 0x7dc   : > { %v1037_v0 = vmul.f32 %v2451_v63, %v2447_v28 }
 0x7dd   : > { %1191 = vrot.lane.b32.xlu0 %v2667_v35, %s2503_s26  ;;  %v1220_v13 = vpop.permute.xlu0 %1219 }
 0x7de   : > { %v1039_v4 = vpack.c.bf16 %v1037_v0, %v1037_v0  ;;  %v1224_v14 = vmul.f32 %v1220_v13, %v2653_v32 }
 0x7e0   : > { %2295 = vmatmul.mubr.msk.bf16.vlgmr.msra.gmra.mxu0 %vm579_vm4, %v1039_v4  ;;  %v850_v4 = vadd.f32 %v2809_v5, %v2618_v3 }
 0x7e1   : > { %1211 = vrot.lane.b32.xlu0 %v1206_v6, %s2503_s26  ;;  %2306 = vmatprep.mubr.msk.bf16.mxu0 %vm2485_vm2, %v2484_v9 }
 0x7e2   : > { %2305 = vmatpush3.bf16.msra.mxu0 %v1144_v7 }
 0x7e3   : > { %2316 = vmatprep.subr.bf16.mxu0 %v2484_v9 }
 0x843   : > { %v1238_v10 = vpop.permute.xlu1 %1237 }
 0x844   : > { %v1243_v11 = vadd.f32 %v1238_v10, %v1223_v57 }
 0x846   : > { %v1247_v12 = vpack.c.bf16 %v1243_v11, %v1243_v11 }
 0x847   : > { %v1190_v56 = vpop.permute.xlu1 %1189 }
 0x848   : > { %1253 = vrot.lane.b32.xlu1 %v1247_v12, %s2504_s28  ;;  %v1195_v15 = vmul.f32 %v1190_v56, %v2649_v30 }
 0x84b   : > { %v1210_v16 = vpop.permute.xlu1 %1209  ;;  %v1240_v17 = vpop.permute.xlu0 %1239 }
 0x84c   : > { %v1215_v19 = vadd.f32 %v1210_v16, %v1195_v15  ;;  %v1244_v20 = vadd.f32 %v1240_v17, %v1224_v14 }
 0x84e   : > { %v1245_v22 = vpack.c.bf16 %v1215_v19, %v1215_v19  ;;  %v1248_v23 = vpack.c.bf16 %v1244_v20, %v1244_v20 }
 0x84f   : > { %v1192_v24 = vpop.permute.xlu0 %1191 }
 0x850   : > { %1250 = vrot.lane.b32.xlu1 %v1245_v22, %s2505_s29  ;;  %1305 = vrot.lane.b32.xlu0 %v1248_v23, %s2504_s28  ;;  %v1196_v25 = vmul.f32 %v1192_v24, %v2653_v32 }
 0x853   : > { %v1212_v26 = vpop.permute.xlu0 %1211 }
 0x854   : > { %v1216_v27 = vadd.f32 %v1212_v26, %v1196_v25 }
 0x856   : > { %v1246_v28 = vpack.c.bf16 %v1216_v27, %v1216_v27 }
 0x858   : > { %1302 = vrot.lane.b32.xlu0 %v1246_v28, %s2505_s29 }
 0x898   : > { %v1131_v29 = vpop.f32.mrf.mxu1 }
 0x89a   : > { %v2302_v31 = vpop.f32.mrf.mxu1 }
 0x89c   : > { %v1134_v33 = vpop.f32.mrf.mxu1 }
 0x89e   : > { %v2303_v39 = vpop.f32.mrf.mxu1 }
 0x8a0   : > { %v1083_v44 = vpop.f32.mrf.mxu0 }
 0x8a1   : > { %v1137_v45 = vpack.c.bf16 %v1131_v29, %v1083_v44 }
 0x8a2   : > { %v2296_v46 = vpop.f32.mrf.mxu0 }
 0x8a3   : > { %2307 = vmatmul.mubr.msk.bf16.vlgmr.msra.gmra.mxu0 %vm579_vm4, %v1137_v45 }
 0x8a4   : > { %v1086_v50 = vpop.f32.mrf.mxu0  ;;  %2318 = vmatprep.mubr.msk.bf16.mxu0 %vm2485_vm2, %v2484_v9 }
 0x8a6   : > { %v2297_v51 = vpop.f32.mrf.mxu0 }
 0x8a7   : > { %v1536_v51 = vsel %vm527_vm3, %v2690_v43, %v2853_v59 }
 0x8ba   : > { %v1254_v53 = vpop.permute.xlu1 %1253 }
 0x8bb   : > { %v1259_v54 = vsel %vm579_vm4, %v1254_v53, 0 }
 0x8bc   : > { %2311 = vmatpush3.bf16.xpose.msra.mxu1 %v1259_v54 }
 0x8bd   : > { %2322 = vmatprep.subr.bf16.mxu1 %v2484_v9 }
 0x8c2   : > { %v1251_v55 = vpop.permute.xlu1 %1250  ;;  %v1306_v58 = vpop.permute.xlu0 %1305 }
 0x8c3   : > { %v1311_v60 = vsel %vm579_vm4, %v1306_v58, 0  ;;  %2313 = vmatmul.mubr.msk.bf16.vlgmr.msra.gmra.mxu1 %vm579_vm4, %v1251_v55  ;;  %v1538_v58 = vmul.f32 %v1536_v51, %v2688_v42 }
 0x8c4   : > { %2317 = vmatpush3.bf16.xpose.msra.mxu0 %v1311_v60  ;;  %2324 = vmatprep.mubr.msk.bf16.mxu1 %vm2485_vm2, %v2484_v9 }
 0x8c5   : > { %2328 = vmatprep.subr.bf16.mxu0 %v2484_v9 }
 0x8ca   : > { %v1303_v61 = vpop.permute.xlu0 %1302 }
 0x8cb   : > { %2319 = vmatmul.mubr.msk.bf16.vlgmr.msra.gmra.mxu0 %vm579_vm4, %v1303_v61  ;;  %v2169_v61 = vld [vmem:[%s2581_s21 + $0x8] sm:$0xf] }
 0x8cc   : > { %2330 = vmatprep.mubr.msk.bf16.mxu0 %vm2485_vm2, %v2484_v9 }
 0x963   : > { %v1180_v63 = vpop.f32.mrf.mxu0 }
 0x964   : > { %v2887_v52 = vadd.f32 %v1180_v63, %v849_v62  ;;  %v1482_v62 = vsel %vm707_vm5, %v2169_v61, 0 }
 0x965   : > { %v2308_v0 = vpop.f32.mrf.mxu0 }
 0x967   : > { %v1183_v6 = vpop.f32.mrf.mxu0 }
 0x968   : > { %v2891_v38 = vadd.f32 %v1183_v6, %v850_v4 }
 0x969   : > { %v2309_v7 = vpop.f32.mrf.mxu0 }
 0x983   : > { %v1295_v8 = vpop.f32.mrf.mxu1 }
 0x984   : > { %v1353_v57 = vmul.f32 0.35355338, %v1295_v8 }
 0x985   : > { %v2314_v10 = vpop.f32.mrf.mxu1 }
 0x986   : > { %v1355_v11 = vsel %vm579_vm4, %v1353_v57, -inf }
 0x987   : > { %1356 = vmax.xlane.f32.xlu1 %v1355_v11  ;;  %v1298_v12 = vpop.f32.mrf.mxu1 }
 0x989   : > { %v2315_v13 = vpop.f32.mrf.mxu1 }
 0x98b   : > { %v1347_v2 = vpop.f32.mrf.mxu0 }
 0x98c   : > { %v1354_v1 = vmul.f32 0.35355338, %v1347_v2 }
 0x98d   : > { %v2320_v56 = vpop.f32.mrf.mxu0 }
 0x98e   : > { %v1358_v14 = vsel %vm579_vm4, %v1354_v1, -inf }
 0x98f   : > { %1359 = vmax.xlane.f32.xlu0 %v1358_v14  ;;  %v1350_v15 = vpop.f32.mrf.mxu0 }
 0x991   : > { %v2321_v3 = vpop.f32.mrf.mxu0 }
 0xa10   : > { %v1357_v5 = vpop.xlane.xlu1 %1356 }
 0xa11   : > { %v1361_v16 = vsub.f32 %v1353_v57, %v1357_v5 }
 0xa13   : > { %v1363_v17 = vmul.f32 1.442695, %v1361_v16 }
 0xa15   : > { %2452 = vpow2.f32 %v1363_v17 }
 0xa18   : > { %v1360_v19 = vpop.xlane.xlu0 %1359 }
 0xa19   : > { %v1362_v20 = vsub.f32 %v1354_v1, %v1360_v19 }
 0xa1b   : > { %v1365_v22 = vmul.f32 1.442695, %v1362_v20 }
 0xa1d   : > { %2454 = vpow2.f32 %v1365_v22 }
 0xa22   : > { %v2453_v23 = vpop.eup %2452 }
 0xa23   : > { %v1367_v24 = vsel %vm579_vm4, %v2453_v23, 0.0 }
 0xa24   : > { %1368 = vadd.xlane.f32.xlu0 %v1367_v24 }
 0xa2a   : > { %v2455_v25 = vpop.eup %2454 }
 0xa2b   : > { %v1370_v26 = vsel %vm579_vm4, %v2455_v25, 0.0 }
 0xa2c   : > { %1371 = vadd.xlane.f32.xlu1 %v1370_v26 }
 0xa3a   : > { %1379 = vrot.lane.b32.xlu0 %v2731_v47, %s2502_s10 }
 0xa3d   : > { %1427 = vrot.lane.b32.xlu1 %v2737_v48, %s2502_s10 }
 0xa3e   : > { %1559 = vrot.lane.b32.xlu0 %v2653_v32, %s2506_s18 }
 0xa41   : > { %1557 = vrot.lane.b32.xlu1 %v2649_v30, %s2506_s18 }
 0xa42   : > { %1551 = vrot.lane.b32.xlu0 %v2667_v35, %s2499_s15 }
 0xa45   : > { %1549 = vrot.lane.b32.xlu1 %v2661_v34, %s2499_s15 }
 0xaad   : > { %v1369_v27 = vpop.xlane.xlu0 %1368 }
 0xaae   : > { %2456 = vrcp.f32 %v1369_v27 }
 0xab1   : > { %v1380_v28 = vpop.permute.xlu0 %1379 }
 0xab2   : > { %v1385_v29 = vsel %vm707_vm5, %v1380_v28, 0 }
 0xab3   : > { %2323 = vmatpush3.bf16.msra.mxu1 %v1385_v29 }
 0xab4   : > { %2334 = vmatprep.subr.bf16.mxu1 %v2484_v9 }
 0xab5   : > { %v1560_v31 = vpop.permute.xlu0 %1559  ;;  %v1372_v33 = vpop.xlane.xlu1 %1371 }
 0xab6   : > { %v1564_v39 = vsel %vm527_vm3, %v1560_v31, %v2844_v41  ;;  %2458 = vrcp.f32 %v1372_v33 }
 0xab7   : > { %v1566_v44 = vmul.f32 %v1564_v39, %v2688_v42 }
 0xab9   : > { %1571 = vrot.lane.b32.xlu0 %v1566_v44, %s2499_s15  ;;  %v1428_v45 = vpop.permute.xlu1 %1427  ;;  %v1552_v63 = vpop.permute.xlu0 %1551 }
 0xaba   : > { %v1433_v46 = vsel %vm707_vm5, %v1428_v45, 0 }
 0xabb   : > { %v2457_v50 = vpop.eup %2456  ;;  %2329 = vmatpush3.bf16.msra.mxu0 %v1433_v46 }
 0xabc   : > { %v1375_v53 = vmul.f32 %v2457_v50, %v2453_v23  ;;  %2340 = vmatprep.subr.bf16.mxu0 %v2484_v9 }
 0xabd   : > { %1529 = vrot.lane.b32.xlu0 %v2667_v35, %s2507_s14  ;;  %v1558_v41 = vpop.permute.xlu1 %1557  ;;  %v1535_v35 = vsel %vm527_vm3, %v2675_v37, %v2836_v49  ;;  %v1556_v37 = vmul.f32 %v1552_v63, %v2653_v32 }
 0xabe   : > { %v1563_v54 = vsel %vm527_vm3, %v1558_v41, %v2829_v40  ;;  %v1377_v55 = vpack.c.bf16 %v1375_v53, %v1375_v53  ;;  %v1537_v42 = vmul.f32 %v1535_v35, %v2673_v36 }
 0xabf   : > { %v1565_v60 = vmul.f32 %v1563_v54, %v2673_v36 }
 0xac0   : > { %2325 = vmatmul.mubr.msk.bf16.vlgmr.msra.gmra.mxu1 %vm579_vm4, %v1377_v55 }
 0xac1   : > { %1543 = vrot.lane.b32.xlu0 %v1538_v58, %s2507_s14  ;;  %1569 = vrot.lane.b32.xlu1 %v1565_v60, %s2499_s15  ;;  %v1550_v4 = vpop.permute.xlu1 %1549 }
 0xac2   : > { %2336 = vmatprep.mubr.msk.bf16.mxu1 %vm2485_vm2, %v2484_v9  ;;  %2335 = vmatpush3.bf16.msra.mxu1 %v1482_v62  ;;  %v1555_v6 = vmul.f32 %v1550_v4, %v2649_v30 }
 0xac3   : > { %v2459_v43 = vpop.eup %2458  ;;  %2346 = vmatprep.subr.bf16.mxu1 %v2484_v9 }
 0xac4   : > { %v1376_v40 = vmul.f32 %v2459_v43, %v2455_v25 }
 0xac5   : > { %1527 = vrot.lane.b32.xlu1 %v2661_v34, %s2507_s14 }
 0xac6   : > { %v1378_v59 = vpack.c.bf16 %v1376_v40, %v1376_v40 }
 0xac8   : > { %2331 = vmatmul.mubr.msk.bf16.vlgmr.msra.gmra.mxu0 %vm579_vm4, %v1378_v59 }
 0xac9   : > { %1541 = vrot.lane.b32.xlu1 %v1537_v42, %s2507_s14  ;;  %2342 = vmatprep.mubr.msk.bf16.mxu0 %vm2485_vm2, %v2484_v9 }
 0xb2b   : > { %v1572_v49 = vpop.permute.xlu0 %1571 }
 0xb2c   : > { %v1576_v34 = vadd.f32 %v1572_v49, %v1556_v37 }
 0xb2e   : > { %v1580_v0 = vpack.c.bf16 %v1576_v34, %v1576_v34 }
 0xb2f   : > { %v1530_v36 = vpop.permute.xlu0 %1529 }
 0xb30   : > { %1637 = vrot.lane.b32.xlu0 %v1580_v0, %s2508_s16  ;;  %v1534_v7 = vmul.f32 %v1530_v36, %v2653_v32 }
 0xb33   : > { %v1544_v8 = vpop.permute.xlu0 %1543  ;;  %v1570_v57 = vpop.permute.xlu1 %1569 }
 0xb34   : > { %v1548_v10 = vadd.f32 %v1544_v8, %v1534_v7  ;;  %v1575_v11 = vadd.f32 %v1570_v57, %v1555_v6 }
 0xb36   : > { %v1578_v12 = vpack.c.bf16 %v1548_v10, %v1548_v10  ;;  %v1579_v13 = vpack.c.bf16 %v1575_v11, %v1575_v11 }
 0xb37   : > { %v1528_v2 = vpop.permute.xlu1 %1527 }
 0xb38   : > { %1634 = vrot.lane.b32.xlu0 %v1578_v12, %s2509_s19  ;;  %1585 = vrot.lane.b32.xlu1 %v1579_v13, %s2508_s16  ;;  %v1533_v1 = vmul.f32 %v1528_v2, %v2649_v30  ;;  %v2175_v13 = vld [vmem:[%s2581_s21 + $0xc] sm:$0xf] }
 0xb39   : > { %v1814_v2 = vsel %vm707_vm5, %v2175_v13, 0 }
 0xb3b   : > { %v1542_v56 = vpop.permute.xlu1 %1541 }
 0xb3c   : > { %v1547_v14 = vadd.f32 %v1542_v56, %v1533_v1 }
 0xb3e   : > { %v1577_v15 = vpack.c.bf16 %v1547_v14, %v1547_v14 }
 0xb40   : > { %1582 = vrot.lane.b32.xlu1 %v1577_v15, %s2509_s19 }
 0xb80   : > { %v1421_v3 = vpop.f32.mrf.mxu1 }
 0xb82   : > { %v2326_v5 = vpop.f32.mrf.mxu1 }
 0xb84   : > { %v1424_v16 = vpop.f32.mrf.mxu1 }
 0xb86   : > { %v2327_v32 = vpop.f32.mrf.mxu1 }
 0xb88   : > { %v1469_v17 = vpop.f32.mrf.mxu0 }
 0xb89   : > { %v1475_v19 = vpack.c.bf16 %v1469_v17, %v1421_v3 }
 0xb8a   : > { %v2332_v20 = vpop.f32.mrf.mxu0 }
 0xb8b   : > { %2337 = vmatmul.mubr.msk.bf16.vlgmr.msra.gmra.mxu1 %vm579_vm4, %v1475_v19 }
 0xb8c   : > { %v1472_v22 = vpop.f32.mrf.mxu0  ;;  %2348 = vmatprep.mubr.msk.bf16.mxu1 %vm2485_vm2, %v2484_v9 }
 0xb8e   : > { %v2333_v23 = vpop.f32.mrf.mxu0 }
 0xba2   : > { %v1638_v24 = vpop.permute.xlu0 %1637 }
 0xba3   : > { %v1643_v30 = vsel %vm579_vm4, %v1638_v24, 0 }
 0xba4   : > { %2347 = vmatpush3.bf16.xpose.msra.mxu1 %v1643_v30 }
 0xba5   : > { %2358 = vmatprep.subr.bf16.mxu1 %v2484_v9 }
 0xbaa   : > { %v1635_v25 = vpop.permute.xlu0 %1634  ;;  %v1586_v26 = vpop.permute.xlu1 %1585 }
 0xbab   : > { %v1591_v27 = vsel %vm579_vm4, %v1586_v26, 0  ;;  %2349 = vmatmul.mubr.msk.bf16.vlgmr.msra.gmra.mxu1 %vm579_vm4, %v1635_v25 }
 0xbac   : > { %2341 = vmatpush3.bf16.xpose.msra.mxu0 %v1591_v27  ;;  %2360 = vmatprep.mubr.msk.bf16.mxu1 %vm2485_vm2, %v2484_v9 }
 0xbad   : > { %2352 = vmatprep.subr.bf16.mxu0 %v2484_v9 }
 0xbb2   : > { %v1583_v28 = vpop.permute.xlu1 %1582 }
 0xbb3   : > { %2343 = vmatmul.mubr.msk.bf16.vlgmr.msra.gmra.mxu0 %vm579_vm4, %v1583_v28 }
 0xbb4   : > { %2354 = vmatprep.mubr.msk.bf16.mxu0 %vm2485_vm2, %v2484_v9 }
 0xc4b   : > { %v1518_v29 = vpop.f32.mrf.mxu1 }
 0xc4c   : > { %v2956_v31 = vadd.f32 %v1518_v29, %v2887_v52  ;;  %v2426_v29 = vld [vmem:[%s2590_s27 + $0x8] sm:$0xff]  }
 0xc4d   : > { %v2338_v33 = vpop.f32.mrf.mxu1 }
 0xc4f   : > { %v1521_v39 = vpop.f32.mrf.mxu1 }
 0xc50   : > { %v2959_v44 = vadd.f32 %v1521_v39, %v2891_v38 }
 0xc51   : > { %v2339_v45 = vpop.f32.mrf.mxu1 }
 0xc6b   : > { %v1679_v46 = vpop.f32.mrf.mxu1 }
 0xc6c   : > { %v1686_v50 = vmul.f32 0.35355338, %v1679_v46 }
 0xc6d   : > { %v2350_v51 = vpop.f32.mrf.mxu1 }
 0xc6e   : > { %v1690_v53 = vsel %vm579_vm4, %v1686_v50, -inf  ;;  %v1859_v51 = vld [vmem:[%s395_s24] sm:$0x1] }
 0xc6f   : > { %1691 = vmax.xlane.f32.xlu0 %v1690_v53  ;;  %v1682_v41 = vpop.f32.mrf.mxu1  ;;  %v1876_v53 = vadd.f32 1.0, %v1859_v51 }
 0xc71   : > { %v2351_v54 = vpop.f32.mrf.mxu1 }
 0xc72   : > { %v1881_v54 = vrot.slane %v1876_v53, %v441_v21  ;;  %v2431_v21 = vld [vmem:[%s2596_s13] sm:$0xff]  }
 0xc73   : > { %v1627_v55 = vpop.f32.mrf.mxu0 }
 0xc74   : > { %v1685_v58 = vmul.f32 0.35355338, %v1627_v55 }
 0xc75   : > { %v2344_v60 = vpop.f32.mrf.mxu0 }
 0xc76   : > { %v1687_v52 = vsel %vm579_vm4, %v1685_v58, -inf }
 0xc77   : > { %1688 = vmax.xlane.f32.xlu1 %v1687_v52  ;;  %v1630_v43 = vpop.f32.mrf.mxu0 }
 0xc79   : > { %v2345_v35 = vpop.f32.mrf.mxu0 }
 0xcf8   : > { %v1692_v40 = vpop.xlane.xlu0 %1691 }
 0xcf9   : > { %v1694_v38 = vsub.f32 %v1686_v50, %v1692_v40  ;;  %v2428_v40 = vld [vmem:[%s2596_s13 + $0x18] sm:$0xff]  }
 0xcfb   : > { %v1697_v59 = vmul.f32 1.442695, %v1694_v38  ;;  %v2429_v38 = vld [vmem:[%s2596_s13 + $0x10] sm:$0xff]  }
 0xcfd   : > { %2460 = vpow2.f32 %v1697_v59 }
 0xd00   : > { %v1689_v42 = vpop.xlane.xlu1 %1688 }
 0xd01   : > { %v1693_v61 = vsub.f32 %v1685_v58, %v1689_v42 }
 0xd03   : > { %v1695_v62 = vmul.f32 1.442695, %v1693_v61 }
 0xd05   : > { %2462 = vpow2.f32 %v1695_v62 }
 0xd0a   : > { %v2461_v63 = vpop.eup %2460 }
 0xd0b   : > { %v1702_v37 = vsel %vm579_vm4, %v2461_v63, 0.0 }
 0xd0c   : > { %1703 = vadd.xlane.f32.xlu1 %v1702_v37 }
 0xd12   : > { %v2463_v49 = vpop.eup %2462 }
 0xd13   : > { %v1699_v34 = vsel %vm579_vm4, %v2463_v49, 0.0 }
 0xd14   : > { %1700 = vadd.xlane.f32.xlu0 %v1699_v34 }
 0xd1d   : > { %1759 = vrot.lane.b32.xlu1 %v2737_v48, %s2495_s17 }
 0xd2a   : > { %1711 = vrot.lane.b32.xlu0 %v2731_v47, %s2495_s17 }
 0xd95   : > { %v1704_v0 = vpop.xlane.xlu1 %1703 }
 0xd96   : > { %2464 = vrcp.f32 %v1704_v0 }
 0xd99   : > { %v1760_v4 = vpop.permute.xlu1 %1759 }
 0xd9a   : > { %v1765_v36 = vsel %vm707_vm5, %v1760_v4, 0 }
 0xd9b   : > { %2359 = vmatpush3.bf16.msra.mxu1 %v1765_v36 }
 0xd9c   : > { %2370 = vmatprep.subr.bf16.mxu1 %v2484_v9 }
 0xd9d   : > { %v1701_v6 = vpop.xlane.xlu0 %1700 }
 0xd9e   : > { %2466 = vrcp.f32 %v1701_v6 }
 0xda1   : > { %v1712_v7 = vpop.permute.xlu0 %1711 }
 0xda2   : > { %v1717_v8 = vsel %vm707_vm5, %v1712_v7, 0 }
 0xda3   : > { %v2465_v57 = vpop.eup %2464  ;;  %2353 = vmatpush3.bf16.msra.mxu0 %v1717_v8 }
 0xda4   : > { %v1708_v48 = vmul.f32 %v2465_v57, %v2461_v63  ;;  %2364 = vmatprep.subr.bf16.mxu0 %v2484_v9 }
 0xda6   : > { %v1710_v47 = vpack.c.bf16 %v1708_v48, %v1708_v48 }
 0xda8   : > { %2361 = vmatmul.mubr.msk.bf16.vlgmr.msra.gmra.mxu1 %vm579_vm4, %v1710_v47 }
 0xda9   : > { %2374 = vmatprep.mubr.msk.bf16.mxu1 %vm2485_vm2, %v2484_v9  ;;  %2371 = vmatpush3.bf16.msra.mxu1 %v2426_v29 }
 0xdaa   : > { %2372 = vmatprep.subr.bf16.mxu1 %v2484_v9 }
 0xdab   : > { %v2467_v10 = vpop.eup %2466 }
 0xdac   : > { %v1707_v11 = vmul.f32 %v2467_v10, %v2463_v49 }
 0xdae   : > { %v1709_v12 = vpack.c.bf16 %v1707_v11, %v1707_v11 }
 0xdb0   : > { %2355 = vmatmul.mubr.msk.bf16.vlgmr.msra.gmra.mxu0 %vm579_vm4, %v1709_v12 }
 0xdb1   : > { %2366 = vmatprep.mubr.msk.bf16.mxu0 %vm2485_vm2, %v2484_v9  ;;  %2365 = vmatpush3.bf16.msra.mxu0 %v1814_v2 }
 0xdb2   : > { %2378 = vmatprep.subr.bf16.mxu0 %v2484_v9 }
 0xe68   : > { %v1801_v1 = vpop.f32.mrf.mxu1 }
 0xe6a   : > { %v2362_v56 = vpop.f32.mrf.mxu1 }
 0xe6c   : > { %v1804_v14 = vpop.f32.mrf.mxu1 }
 0xe6e   : > { %v2363_v15 = vpop.f32.mrf.mxu1 }
 0xe70   : > { %v1753_v3 = vpop.f32.mrf.mxu0 }
 0xe71   : > { %v1807_v5 = vpack.c.bf16 %v1801_v1, %v1753_v3 }
 0xe72   : > { %v2356_v16 = vpop.f32.mrf.mxu0 }
 0xe73   : > { %2367 = vmatmul.mubr.msk.bf16.vlgmr.msra.gmra.mxu0 %vm579_vm4, %v1807_v5 }
 0xe74   : > { %v1756_v32 = vpop.f32.mrf.mxu0  ;;  %2386 = vmatprep.mubr.msk.bf16.mxu0 %vm2485_vm2, %v2484_v9  ;;  %2379 = vmatpush3.bf16.msra.mxu0 %v2428_v40 }
 0xe75   : > { %2380 = vmatprep.subr.bf16.mxu0 %v2484_v9 }
 0xe76   : > { %v2357_v17 = vpop.f32.mrf.mxu0 }
 0xe78   : > { %2381 = vmatpush3.bf16.msra.mxu0 %v2429_v38 }
 0xe79   : > { %2382 = vmatprep.subr.bf16.mxu0 %v2484_v9 }
 0xe7c   : > { %2383 = vmatpush3.bf16.msra.mxu0 %v2430_v18 }
 0xe7d   : > { %2384 = vmatprep.subr.bf16.mxu0 %v2484_v9 }
 0xe80   : > { %2385 = vmatpush3.bf16.msra.mxu0 %v2431_v21 }
 0xf33   : > { %v1850_v19 = vpop.f32.mrf.mxu0 }
 0xf34   : > { %v2986_v20 = vadd.f32 %v1850_v19, %v2956_v31  ;;  %v2427_v31 = vld [vmem:[%s2590_s27] sm:$0xff]  }
 0xf35   : > { %v2368_v22 = vpop.f32.mrf.mxu0  ;;  %2373 = vmatpush3.bf16.msra.mxu1 %v2427_v31 }
 0xf36   : > { %v1860_v23 = vmul.f32 %v2986_v20, %v2986_v20 }
 0xf37   : > { %v1853_v24 = vpop.f32.mrf.mxu0 }
 0xf38   : > { %v2991_v30 = vadd.f32 %v1853_v24, %v2959_v44  ;;  %v1862_v25 = vsel %vm421_vm1, %v1860_v23, 0.0 }
 0xf39   : > { %1863 = vadd.xlane.f32.xlu1 %v1862_v25  ;;  %v2369_v26 = vpop.f32.mrf.mxu0 }
 0xf3a   : > { %v1861_v27 = vmul.f32 %v2991_v30, %v2991_v30 }
 0xf3c   : > { %v1865_v28 = vsel %vm421_vm1, %v1861_v27, 0.0 }
 0xf3d   : > { %1866 = vadd.xlane.f32.xlu0 %v1865_v28 }
 0xfc2   : > { %v1864_v33 = vpop.xlane.xlu1 %1863 }
 0xfc3   : > { %v1868_v39 = vmul.f32 0.03125, %v1864_v33 }
 0xfc5   : > { %v1870_v44 = vadd.f32 1e-06, %v1868_v39 }
 0xfc6   : > { %v1867_v45 = vpop.xlane.xlu0 %1866 }
 0xfc7   : > { %2468 = vrsqrt.f32 %v1870_v44  ;;  %v1869_v46 = vmul.f32 0.03125, %v1867_v45 }
 0xfc9   : > { %v1871_v50 = vadd.f32 1e-06, %v1869_v46 }
 0xfcb   : > { %2470 = vrsqrt.f32 %v1871_v50 }
 0xfd4   : > { %v2469_v41 = vpop.eup %2468 }
 0xfd5   : > { %v1874_v55 = vmul.f32 %v2469_v41, %v2986_v20 }
 0xfd7   : > { %v1883_v52 = vmul.f32 %v1881_v54, %v1874_v55 }
 0xfd8   : > { %v2471_v58 = vpop.eup %2470 }
 0xfd9   : > { %v1875_v60 = vmul.f32 %v2471_v58, %v2991_v30 }
 0xfdb   : > { %v1884_v43 = vmul.f32 %v1881_v54, %v1875_v60 }
 0xfdd   : > { %v1885_v35 = vpack.c.bf16 %v1884_v43, %v1883_v52 }
 0xfdf   : > { %2375 = vmatmul.mubr.msk.bf16.vlgmr.msra.gmra.mxu1 %vm421_vm1, %v1885_v35 }
0x109f   : > { %v1939_v59 = vpop.f32.mrf.mxu1 }
0x10a0   : > { %1966 = vrot.lane.b32.xlu0 %v1939_v59, %s2492_s12  ;;  %v1946_v63 = vmul.f32 %v1939_v59, %v1939_v59 }
0x10a1   : > { %v2376_v42 = vpop.f32.mrf.mxu1 }
0x10a2   : > { %v1948_v49 = vmul.f32 %v1946_v63, %v1939_v59 }
0x10a3   : > { %v1942_v61 = vpop.f32.mrf.mxu1 }
0x10a4   : > { %1968 = vrot.lane.b32.xlu1 %v1942_v61, %s2492_s12  ;;  %v1947_v37 = vmul.f32 %v1942_v61, %v1942_v61  ;;  %v1950_v0 = vmul.f32 0.044715, %v1948_v49 }
0x10a5   : > { %v2377_v62 = vpop.f32.mrf.mxu1 }
0x10a6   : > { %v1949_v34 = vmul.f32 %v1947_v37, %v1942_v61  ;;  %v1952_v36 = vadd.f32 %v1950_v0, %v1939_v59 }
0x10a8   : > { %v1951_v4 = vmul.f32 0.044715, %v1949_v34  ;;  %v1954_v7 = vmul.f32 0.7978846, %v1952_v36 }
0x10aa   : > { %v1953_v6 = vadd.f32 %v1951_v4, %v1942_v61  ;;  %2472 = vtanh.f32 %v1954_v7 }
0x10ac   : > { %v1955_v9 = vmul.f32 0.7978846, %v1953_v6 }
0x10ae   : > { %2474 = vtanh.f32 %v1955_v9 }
0x10b7   : > { %v2473_v8 = vpop.eup %2472 }
0x10b8   : > { %v1958_v48 = vadd.f32 1.0, %v2473_v8 }
0x10ba   : > { %v1960_v10 = vmul.f32 0.5, %v1958_v48 }
0x10bb   : > { %v2475_v57 = vpop.eup %2474 }
0x10bc   : > { %v1959_v47 = vadd.f32 1.0, %v2475_v57  ;;  %v1962_v13 = vmul.f32 %v1960_v10, %v1939_v59 }
0x10be   : > { %v1961_v11 = vmul.f32 0.5, %v1959_v47 }
0x10c0   : > { %v1963_v2 = vmul.f32 %v1961_v11, %v1942_v61 }
0x1112   : > { %v1967_v12 = vpop.permute.xlu0 %1966 }
0x1113   : > { %v1972_v56 = vmul.f32 %v1967_v12, %v1962_v13 }
0x1116   : > { %v1969_v1 = vpop.permute.xlu1 %1968 }
0x1117   : > { %v1973_v14 = vmul.f32 %v1969_v1, %v1963_v2 }
0x1119   : > { %v1974_v15 = vpack.c.bf16 %v1973_v14, %v1972_v56 }
0x111b   : > { %2387 = vmatmul.mubr.msk.bf16.vlgmr.msra.gmra.mxu0 %vm2007_vm6, %v1974_v15 }
0x11db   : > { %v2045_v3 = vpop.f32.mrf.mxu0 }
0x11dc   : > { %v2052_v5 = vadd.f32 %v2045_v3, %v2986_v20 }
0x11dd   : > { %v2388_v16 = vpop.f32.mrf.mxu0 }
0x11de   : > { %2054 = vst.msk [vmem:[%s3041_s9] sm:$0xff] %vm421_vm1, %v2052_v5 }
0x11df   : > { %v2048_v32 = vpop.f32.mrf.mxu0 }
0x11e0   : > { %v2053_v17 = vadd.f32 %v2048_v32, %v2991_v30 }
0x11e1   : > { %v2389_v19 = vpop.f32.mrf.mxu0 }
0x11e2   : > { %2055 = vst.msk [vmem:[%s3041_s9 + $0x8] sm:$0xff] %vm421_vm1, %v2053_v17 }
0x11e3 PF: > { %s19_s30 = sadd.s32 1, %s2482_s30  }
0x11e4   : > { %p16_p5 = scmp.ge.s32.totalorder %s19_s30, 4  }
0x11e6   :  { %18 = sbr.rel (!%p16_p5) target bundleno = 1 (0x1), region = 104 }

</bundles_post_ra>
